<compile_context>
chip_gen: v7x
topology: tpu7x:2x2x1
jax: 0.10.0
libtpu: 0.0.40
codegen_flags: <defaults>
</compile_context>

<pallas_src>
import functools

import jax
import jax.numpy as jnp
from jax import lax
from jax.experimental import pallas as pl
from jax.experimental.pallas import tpu as pltpu

# ----------------------------- small config ---------------------------------
B = 2            # batch
S = 8            # sequence length
H = 32           # bert hidden_size (mini stand-in for 768)
N_HEADS = 4
D_HEAD = H // N_HEADS
N_LAYERS = 2     # mini stand-in for 12
FFN = 64         # intermediate size (mini stand-in for 3072)
VOCAB = 128
TYPE_VOCAB = 2
MAX_POS = 16
LSTM_H = 32      # per-direction LSTM hidden (mini stand-in for 256)
NUM_LABELS = 1
LN_EPS = 1e-12


# ----------------------------- kernel helpers --------------------------------
def _layer_norm(x, gamma, beta):
    mu = jnp.mean(x, axis=-1, keepdims=True)
    var = jnp.mean(jnp.square(x - mu), axis=-1, keepdims=True)
    return (x - mu) * lax.rsqrt(var + LN_EPS) * gamma + beta


# ----------------------------- fused BERT encoder ----------------------------
def _encoder_kernel(emb_ref, embln_ref, wqkv_ref, bqkv_ref, wo_ref, bo_ref,
                    ln1_ref, w1_ref, b1_ref, w2_ref, b2_ref, ln2_ref,
                    o_ref, x_scr, *, bsz, slen):
    """One grid step == one transformer layer; x carried in VMEM scratch."""
    layer = pl.program_id(0)

    @pl.when(layer == 0)
    def _embed_ln():
        x_scr[...] = _layer_norm(emb_ref[...], embln_ref[0], embln_ref[1])

    x = x_scr[...]                                   # (M, H) f32
    xb = x.astype(jnp.bfloat16)

    # ---- fused QKV projection: single MXU matmul against [wq|wk|wv] ----
    qkv = (jnp.dot(xb, wqkv_ref[0], preferred_element_type=jnp.float32)
           + bqkv_ref[0])                            # (M, 3H)
    q = qkv[:, 0:H].reshape(bsz, slen, H)
    k = qkv[:, H:2 * H].reshape(bsz, slen, H)
    v = qkv[:, 2 * H:3 * H].reshape(bsz, slen, H)

    # ---- attention: all batches & heads in this single grid step ----
    scale = 1.0 / (D_HEAD ** 0.5)
    ctx_heads = []
    for hh in range(N_HEADS):
        sl = slice(hh * D_HEAD, (hh + 1) * D_HEAD)
        # contract on the last axis of both operands: no k.T / XLU transpose
        s = jnp.einsum('bqd,bkd->bqk', q[:, :, sl], k[:, :, sl],
                       preferred_element_type=jnp.float32) * scale
        s = s - jnp.max(s, axis=-1, keepdims=True)
        p = jnp.exp(s)
        p = p * pl.reciprocal(jnp.sum(p, axis=-1, keepdims=True), approx=True)
        ctx_heads.append(jnp.einsum('bqk,bkd->bqd', p, v[:, :, sl],
                                    preferred_element_type=jnp.float32))
    ctx = jnp.concatenate(ctx_heads, axis=-1).reshape(bsz * slen, H)

    # ---- output projection + residual + LayerNorm (fused epilogue) ----
    attn = (jnp.dot(ctx.astype(jnp.bfloat16), wo_ref[0],
                    preferred_element_type=jnp.float32) + bo_ref[0])
    x1 = _layer_norm(x + attn, ln1_ref[0, 0], ln1_ref[0, 1])

    # ---- FFN: w1 + gelu + w2 fused, residual + LayerNorm epilogue ----
    hmid = (jnp.dot(x1.astype(jnp.bfloat16), w1_ref[0],
                    preferred_element_type=jnp.float32) + b1_ref[0])
    # TODO(synk): HF BERT uses erf-gelu; tanh approximation used here.
    hmid = jax.nn.gelu(hmid, approximate=True)
    ffn = (jnp.dot(hmid.astype(jnp.bfloat16), w2_ref[0],
                   preferred_element_type=jnp.float32) + b2_ref[0])
    x2 = _layer_norm(x1 + ffn, ln2_ref[0, 0], ln2_ref[0, 1])

    x_scr[...] = x2

    @pl.when(layer == pl.num_programs(0) - 1)
    def _writeback():
        o_ref[...] = x2


def bert_encoder(emb2d, pk, bsz, slen):
    """emb2d: (B*S, H) f32 embeddings (pre-LN) -> last_hidden_state (B*S, H)."""
    M = bsz * slen
    L = pk["wqkv"].shape[0]
    kern = functools.partial(_encoder_kernel, bsz=bsz, slen=slen)
    c2 = lambda i: (0, 0)
    c3 = lambda i: (0, 0, 0)
    l3 = lambda i: (i, 0, 0)
    l4 = lambda i: (i, 0, 0, 0)
    return pl.pallas_call(
        kern,
        out_shape=jax.ShapeDtypeStruct((M, H), jnp.float32),
        grid=(L,),
        in_specs=[
            pl.BlockSpec((M, H), c2),              # embeddings
            pl.BlockSpec((2, 1, H), c3),           # emb LN gamma/beta
            pl.BlockSpec((1, H, 3 * H), l3),       # fused QKV weight
            pl.BlockSpec((1, 1, 3 * H), l3),       # fused QKV bias
            pl.BlockSpec((1, H, H), l3),           # attn output weight
            pl.BlockSpec((1, 1, H), l3),           # attn output bias
            pl.BlockSpec((1, 2, 1, H), l4),        # LN1 gamma/beta
            pl.BlockSpec((1, H, FFN), l3),         # FFN w1
            pl.BlockSpec((1, 1, FFN), l3),         # FFN b1
            pl.BlockSpec((1, FFN, H), l3),         # FFN w2
            pl.BlockSpec((1, 1, H), l3),           # FFN b2
            pl.BlockSpec((1, 2, 1, H), l4),        # LN2 gamma/beta
        ],
        out_specs=pl.BlockSpec((M, H), c2),
        scratch_shapes=[pltpu.VMEM((M, H), jnp.float32)],
        compiler_params=pltpu.CompilerParams(
            dimension_semantics=("arbitrary",)),   # sequential carry over layers
    )(emb2d, pk["emb_ln"], pk["wqkv"], pk["bqkv"], pk["wo"], pk["bo"],
      pk["ln1"], pk["w1"], pk["b1"], pk["w2"], pk["b2"], pk["ln2"])


# ----------------------- fused BiLSTM + Linear + Sigmoid + BCE ----------------
def _bilstm_head_kernel(x_ref, wih_ref, bih_ref, whh_ref, lw_ref, lb_ref, *rest,
                        with_loss, bsz, slen):
    if with_loss:
        y_ref, logits_ref, loss_ref, xg_scr, hseq_scr = rest
    else:
        logits_ref, xg_scr, hseq_scr = rest
        y_ref = loss_ref = None

    # x is time-major: row = t*bsz + b
    xb = x_ref[...].astype(jnp.bfloat16)                        # (S*B, H)

    # Input-gate preactivations for ALL timesteps at once (one dot per
    # direction/gate; gate order i,f,g,o).  Per-gate weight blocks keep every
    # per-step value at lanes [0, LSTM_H) -> no lane shuffles in the recurrence.
    for d in range(2):
        for g in range(4):
            xg_scr[d, g] = (
                jnp.dot(xb, wih_ref[d, g], preferred_element_type=jnp.float32)
                + bih_ref[d, g])

    # hoist recurrent weights (bf16) out of the unrolled time loop
    whh = [[whh_ref[d, g] for g in range(4)] for d in range(2)]

    h_st = [jnp.zeros((bsz, LSTM_H), jnp.float32) for _ in range(2)]
    c_st = [jnp.zeros((bsz, LSTM_H), jnp.float32) for _ in range(2)]

    # Serial recurrence; forward and backward directions interleaved per step
    # for ILP.  slen is small & static so the loop is fully unrolled with
    # static slices; the time reversal is just the static index S-1-t.
    for t in range(slen):
        for d in range(2):
            tt = t if d == 0 else slen - 1 - t
            row = tt * bsz
            hb = h_st[d].astype(jnp.bfloat16)
            pre = [xg_scr[d, g, pl.ds(row, bsz), :]
                   + jnp.dot(hb, whh[d][g], preferred_element_type=jnp.float32)
                   for g in range(4)]
            i_g = jax.nn.sigmoid(pre[0])
            f_g = jax.nn.sigmoid(pre[1])
            g_g = jnp.tanh(pre[2])
            o_g = jax.nn.sigmoid(pre[3])
            c_new = f_g * c_st[d] + i_g * g_g
            h_new = o_g * jnp.tanh(c_new)
            c_st[d] = c_new
            h_st[d] = h_new
            hseq_scr[:, tt, d * LSTM_H:(d + 1) * LSTM_H] = h_new

    # TODO(synk): dropout(0.2) after the BiLSTM is the identity (inference).
    # Fused Linear(2*LSTM_H -> 1) + Sigmoid head (lane reduction, no extra
    # pallas_call / HBM round trip of the hidden sequence).
    hcat = hseq_scr[...]                                        # (B, S, 2*LSTM_H)
    z = jnp.sum(hcat * lw_ref[...], axis=-1, keepdims=True) + lb_ref[...]
    p = jax.nn.sigmoid(z)                                       # (B, S, 1)
    logits_ref[...] = p

    if with_loss:
        y = y_ref[...]
        # torch.nn.BCELoss clamps each log term at -100.
        logp = jnp.maximum(jnp.log(p), -100.0)
        log1mp = jnp.maximum(jnp.log(1.0 - p), -100.0)
        loss = -(y * logp + (1.0 - y) * log1mp)
        loss_ref[...] = jnp.mean(loss) * jnp.ones((1, 1), jnp.float32)


def bilstm_head(x_tm, pk, labels3, bsz, slen):
    """x_tm: (S*B, H) time-major hidden states -> (logits (B,S,1), loss or None)."""
    with_loss = labels3 is not None
    M = bsz * slen
    kern = functools.partial(_bilstm_head_kernel, with_loss=with_loss,
                             bsz=bsz, slen=slen)
    in_specs = [
        pl.BlockSpec((M, H), lambda i: (0, 0)),
        pl.BlockSpec((2, 4, H, LSTM_H), lambda i: (0, 0, 0, 0)),
        pl.BlockSpec((2, 4, 1, LSTM_H), lambda i: (0, 0, 0, 0)),
        pl.BlockSpec((2, 4, LSTM_H, LSTM_H), lambda i: (0, 0, 0, 0)),
        pl.BlockSpec((1, 1, 2 * LSTM_H), lambda i: (0, 0, 0)),
        pl.BlockSpec((1, 1), lambda i: (0, 0)),
    ]
    args = [x_tm, pk["lstm_wih"], pk["lstm_b"], pk["lstm_whh"],
            pk["lin_w"], pk["lin_b"]]
    out_shape = [jax.ShapeDtypeStruct((bsz, slen, NUM_LABELS), jnp.float32)]
    out_specs = [pl.BlockSpec((bsz, slen, NUM_LABELS), lambda i: (0, 0, 0))]
    if with_loss:
        in_specs.append(pl.BlockSpec((bsz, slen, 1), lambda i: (0, 0, 0)))
        args.append(labels3)
        out_shape.append(jax.ShapeDtypeStruct((1, 1), jnp.float32))
        out_specs.append(pl.BlockSpec((1, 1), lambda i: (0, 0)))

    outs = pl.pallas_call(
        kern,
        out_shape=tuple(out_shape),
        grid=(1,),
        in_specs=in_specs,
        out_specs=tuple(out_specs),
        scratch_shapes=[pltpu.VMEM((2, 4, M, LSTM_H), jnp.float32),
                        pltpu.VMEM((bsz, slen, 2 * LSTM_H), jnp.float32)],
    )(*args)

    if with_loss:
        logits, loss = outs
        return logits, loss[0, 0]
    return outs[0], None


# ----------------------------- forward (glue + kernels) ----------------------
def _forward(packed, input_ids, token_type_ids, labels=None):
    Bv, Sv = input_ids.shape
    # BERT embeddings (table gathers stay as XLA glue; LN is in the kernel).
    emb = (jnp.take(packed["word_emb"], input_ids, axis=0)
           + packed["pos_emb"][None, :Sv, :]
           + jnp.take(packed["type_emb"], token_type_ids, axis=0))
    # TODO(synk): embedding/attention dropout are identity (inference).

    x = bert_encoder(emb.reshape(Bv * Sv, H), packed, Bv, Sv)     # (B*S, H)

    # tiny layout plumbing: time-major rows for the LSTM kernel
    x_tm = x.reshape(Bv, Sv, H).transpose(1, 0, 2).reshape(Sv * Bv, H)
    labels3 = None if labels is None else labels.reshape(Bv, Sv, 1).astype(jnp.float32)

    logits, loss = bilstm_head(x_tm, packed, labels3, Bv, Sv)
    return {"loss": loss, "logits": logits}


forward = jax.jit(_forward)


# ----------------------------- deterministic params --------------------------
def init_params(key):
    keys = iter(jax.random.split(key, 64))

    def nrm(shape, scale=0.02):
        return (scale * jax.random.normal(next(keys), shape)).astype(jnp.float32)

    params = {
        "word_emb": nrm((VOCAB, H)),
        "pos_emb": nrm((MAX_POS, H)),
        "type_emb": nrm((TYPE_VOCAB, H)),
        "emb_ln_g": jnp.ones((H,), jnp.float32),
        "emb_ln_b": jnp.zeros((H,), jnp.float32),
        "layers": [],
    }
    for _ in range(N_LAYERS):
        params["layers"].append({
            "wq": nrm((H, H)), "bq": jnp.zeros((H,), jnp.float32),
            "wk": nrm((H, H)), "bk": jnp.zeros((H,), jnp.float32),
            "wv": nrm((H, H)), "bv": jnp.zeros((H,), jnp.float32),
            "wo": nrm((H, H)), "bo": jnp.zeros((H,), jnp.float32),
            "ln1_g": jnp.ones((H,), jnp.float32), "ln1_b": jnp.zeros((H,), jnp.float32),
            "w1": nrm((H, FFN)), "b1": jnp.zeros((FFN,), jnp.float32),
            "w2": nrm((FFN, H)), "b2": jnp.zeros((H,), jnp.float32),
            "ln2_g": jnp.ones((H,), jnp.float32), "ln2_b": jnp.zeros((H,), jnp.float32),
        })
    params["lstm"] = {
        # PyTorch shapes: weight_ih (4H, input), weight_hh (4H, H), biases (4H,)
        "w_ih_f": nrm((4 * LSTM_H, H), 0.1), "w_hh_f": nrm((4 * LSTM_H, LSTM_H), 0.1),
        "b_ih_f": jnp.zeros((4 * LSTM_H,), jnp.float32),
        "b_hh_f": jnp.zeros((4 * LSTM_H,), jnp.float32),
        "w_ih_b": nrm((4 * LSTM_H, H), 0.1), "w_hh_b": nrm((4 * LSTM_H, LSTM_H), 0.1),
        "b_ih_b": jnp.zeros((4 * LSTM_H,), jnp.float32),
        "b_hh_b": jnp.zeros((4 * LSTM_H,), jnp.float32),
    }
    params["linear_w"] = nrm((2 * LSTM_H, NUM_LABELS), 0.1)   # (in, out)
    params["linear_b"] = jnp.zeros((NUM_LABELS,), jnp.float32)
    return params


def pack_params(p):
    """One-time packing: stack per-layer weights, fuse QKV / biases, transpose
    LSTM weights into per-direction per-gate blocks, cast MXU operands to bf16."""
    bf16 = jnp.bfloat16

    def stack(fn):
        return jnp.stack([fn(lp) for lp in p["layers"]])

    packed = {
        "word_emb": p["word_emb"],
        "pos_emb": p["pos_emb"],
        "type_emb": p["type_emb"],
        "emb_ln": jnp.stack([p["emb_ln_g"], p["emb_ln_b"]]).reshape(2, 1, H),
        "wqkv": stack(lambda lp: jnp.concatenate([lp["wq"], lp["wk"], lp["wv"]],
                                                 axis=1)).astype(bf16),
        "bqkv": stack(lambda lp: jnp.concatenate([lp["bq"], lp["bk"], lp["bv"]]))[:, None, :],
        "wo": stack(lambda lp: lp["wo"]).astype(bf16),
        "bo": stack(lambda lp: lp["bo"])[:, None, :],
        "ln1": stack(lambda lp: jnp.stack([lp["ln1_g"], lp["ln1_b"]]))[:, :, None, :],
        "w1": stack(lambda lp: lp["w1"]).astype(bf16),
        "b1": stack(lambda lp: lp["b1"])[:, None, :],
        "w2": stack(lambda lp: lp["w2"]).astype(bf16),
        "b2": stack(lambda lp: lp["b2"])[:, None, :],
        "ln2": stack(lambda lp: jnp.stack([lp["ln2_g"], lp["ln2_b"]]))[:, :, None, :],
    }

    def pack_dir(w_ih, w_hh, b_ih, b_hh):
        # gate order i,f,g,o (PyTorch): -> (4, in, LSTM_H) / (4, LSTM_H, LSTM_H)
        wih = w_ih.reshape(4, LSTM_H, -1).transpose(0, 2, 1)
        whh = w_hh.reshape(4, LSTM_H, LSTM_H).transpose(0, 2, 1)
        bias = (b_ih + b_hh).reshape(4, 1, LSTM_H)
        return wih, whh, bias

    lw = p["lstm"]
    wih_f, whh_f, b_f = pack_dir(lw["w_ih_f"], lw["w_hh_f"], lw["b_ih_f"], lw["b_hh_f"])
    wih_b, whh_b, b_b = pack_dir(lw["w_ih_b"], lw["w_hh_b"], lw["b_ih_b"], lw["b_hh_b"])
    packed["lstm_wih"] = jnp.stack([wih_f, wih_b]).astype(bf16)   # (2,4,H,LSTM_H)
    packed["lstm_whh"] = jnp.stack([whh_f, whh_b]).astype(bf16)   # (2,4,LSTM_H,LSTM_H)
    packed["lstm_b"] = jnp.stack([b_f, b_b])                      # (2,4,1,LSTM_H)
    packed["lin_w"] = p["linear_w"].reshape(1, 1, 2 * LSTM_H)     # (1,1,64)
    packed["lin_b"] = p["linear_b"].reshape(1, 1)
    return packed


# ----------------------------- main -------------------------------------------
if __name__ == "__main__":
    key = jax.random.PRNGKey(0)
    pkey, ikey, lkey = jax.random.split(key, 3)
    params = init_params(pkey)
    packed = pack_params(params)

    input_ids = jax.random.randint(ikey, (B, S), 0, VOCAB, dtype=jnp.int32)
    token_type_ids = jnp.zeros((B, S), jnp.int32)
    labels = jax.random.bernoulli(lkey, 0.3, (B, S)).astype(jnp.float32)

    out = forward(packed, input_ids, token_type_ids, labels)
    jax.block_until_ready(out["logits"])
    jax.block_until_ready(out["loss"])

    assert out["logits"].shape == (B, S, NUM_LABELS)
    assert out["logits"].dtype == jnp.float32
    assert out["loss"].shape == ()
    assert bool(jnp.isfinite(out["loss"]))
    print("KERNEL_OK")
</pallas_src>

<mosaic_0001>
module attributes {stable_mosaic.version = 11 : i64} {
  func.func @_encoder_kernel(%arg0: i32, %arg1: memref<16x32xf32, #tpu.memory_space<vmem>>, %arg2: memref<2x1x32xf32, #tpu.memory_space<vmem>>, %arg3: memref<1x32x96xbf16, #tpu.memory_space<vmem>>, %arg4: memref<1x1x96xf32, #tpu.memory_space<vmem>>, %arg5: memref<1x32x32xbf16, #tpu.memory_space<vmem>>, %arg6: memref<1x1x32xf32, #tpu.memory_space<vmem>>, %arg7: memref<1x2x1x32xf32, #tpu.memory_space<vmem>>, %arg8: memref<1x32x64xbf16, #tpu.memory_space<vmem>>, %arg9: memref<1x1x64xf32, #tpu.memory_space<vmem>>, %arg10: memref<1x64x32xbf16, #tpu.memory_space<vmem>>, %arg11: memref<1x1x32xf32, #tpu.memory_space<vmem>>, %arg12: memref<1x2x1x32xf32, #tpu.memory_space<vmem>>, %arg13: memref<16x32xf32, #tpu.memory_space<vmem>>, %arg14: memref<16x32xf32, #tpu.memory_space<vmem>>) attributes {dimension_semantics = [#tpu.dimension_semantics<arbitrary>], iteration_bounds = array<i64: 2>, scalar_prefetch = 0 : i64, scratch_operands = 1 : i64, tpu.core_type = #tpu.core_type<tc>, window_params = [{pipeline_mode = #tpu.pipeline_mode<synchronous>, transform_indices = @transform_0, window_bounds = array<i64: 16, 32>}, {pipeline_mode = #tpu.pipeline_mode<synchronous>, transform_indices = @transform_1, window_bounds = array<i64: 2, 1, 32>}, {transform_indices = @transform_2, window_bounds = array<i64: 1, 32, 96>}, {transform_indices = @transform_3, window_bounds = array<i64: 1, 1, 96>}, {transform_indices = @transform_4, window_bounds = array<i64: 1, 32, 32>}, {transform_indices = @transform_5, window_bounds = array<i64: 1, 1, 32>}, {transform_indices = @transform_6, window_bounds = array<i64: 1, 2, 1, 32>}, {transform_indices = @transform_7, window_bounds = array<i64: 1, 32, 64>}, {transform_indices = @transform_8, window_bounds = array<i64: 1, 1, 64>}, {transform_indices = @transform_9, window_bounds = array<i64: 1, 64, 32>}, {transform_indices = @transform_10, window_bounds = array<i64: 1, 1, 32>}, {transform_indices = @transform_11, window_bounds = array<i64: 1, 2, 1, 32>}, {pipeline_mode = #tpu.pipeline_mode<synchronous>, transform_indices = @transform_12, window_bounds = array<i64: 16, 32>}]} {
    %c0_i32 = arith.constant 0 : i32
    %0 = arith.cmpi eq, %arg0, %c0_i32 : i32
    %1 = arith.extui %0 : i1 to i32
    %c0_i32_0 = arith.constant 0 : i32
    %2 = arith.cmpi ne, %1, %c0_i32_0 : i32
    scf.if %2 {
      %c0_81 = arith.constant 0 : index
      %c0_82 = arith.constant 0 : index
      %183 = vector.load %arg1[%c0_81, %c0_82] : memref<16x32xf32, #tpu.memory_space<vmem>>, vector<16x32xf32>
      %c0_83 = arith.constant 0 : index
      %c0_84 = arith.constant 0 : index
      %c0_85 = arith.constant 0 : index
      %184 = vector.load %arg2[%c0_83, %c0_84, %c0_85] : memref<2x1x32xf32, #tpu.memory_space<vmem>>, vector<1x1x32xf32>
      %185 = vector.shape_cast %184 : vector<1x1x32xf32> to vector<1x32xf32>
      %c1_86 = arith.constant 1 : index
      %c0_87 = arith.constant 0 : index
      %c0_88 = arith.constant 0 : index
      %186 = vector.load %arg2[%c1_86, %c0_87, %c0_88] : memref<2x1x32xf32, #tpu.memory_space<vmem>>, vector<1x1x32xf32>
      %187 = vector.shape_cast %186 : vector<1x1x32xf32> to vector<1x32xf32>
      %cst_89 = arith.constant dense<0.000000e+00> : vector<16xf32>
      %188 = vector.multi_reduction <add>, %183, %cst_89 [1] : vector<16x32xf32> to vector<16xf32>
      %189 = vector.shape_cast %188 : vector<16xf32> to vector<16x1xf32>
      %cst_90 = arith.constant 3.200000e+01 : f32
      %190 = vector.broadcast %cst_90 : f32 to vector<16x1xf32>
      %191 = arith.divf %189, %190 : vector<16x1xf32>
      %192 = vector.broadcast %191 : vector<16x1xf32> to vector<16x32xf32>
      %193 = arith.subf %183, %192 : vector<16x32xf32>
      %194 = arith.mulf %193, %193 : vector<16x32xf32>
      %cst_91 = arith.constant dense<0.000000e+00> : vector<16xf32>
      %195 = vector.multi_reduction <add>, %194, %cst_91 [1] : vector<16x32xf32> to vector<16xf32>
      %196 = vector.shape_cast %195 : vector<16xf32> to vector<16x1xf32>
      %cst_92 = arith.constant 3.200000e+01 : f32
      %197 = vector.broadcast %cst_92 : f32 to vector<16x1xf32>
      %198 = arith.divf %196, %197 : vector<16x1xf32>
      %199 = vector.broadcast %191 : vector<16x1xf32> to vector<16x32xf32>
      %200 = arith.subf %183, %199 : vector<16x32xf32>
      %cst_93 = arith.constant 9.99999996E-13 : f32
      %201 = vector.broadcast %cst_93 : f32 to vector<16x1xf32>
      %202 = arith.addf %198, %201 : vector<16x1xf32>
      %203 = math.rsqrt %202 : vector<16x1xf32>
      %204 = vector.broadcast %203 : vector<16x1xf32> to vector<16x32xf32>
      %205 = arith.mulf %200, %204 : vector<16x32xf32>
      %206 = vector.broadcast %185 : vector<1x32xf32> to vector<16x32xf32>
      %207 = arith.mulf %205, %206 : vector<16x32xf32>
      %208 = vector.broadcast %187 : vector<1x32xf32> to vector<16x32xf32>
      %209 = arith.addf %207, %208 : vector<16x32xf32>
      %c0_94 = arith.constant 0 : index
      %c0_95 = arith.constant 0 : index
      %210 = vector.load %arg14[%c0_94, %c0_95] : memref<16x32xf32, #tpu.memory_space<vmem>>, vector<16x32xf32>
      tpu.vector_store %arg14[%c0_94, %c0_95], %209 {strides = array<i32>} : memref<16x32xf32, #tpu.memory_space<vmem>>, vector<16x32xf32>,
    } else {
    }
    %c0 = arith.constant 0 : index
    %c0_1 = arith.constant 0 : index
    %3 = vector.load %arg14[%c0, %c0_1] : memref<16x32xf32, #tpu.memory_space<vmem>>, vector<16x32xf32>
    %4 = arith.truncf %3 : vector<16x32xf32> to vector<16x32xbf16>
    %c0_2 = arith.constant 0 : index
    %c0_3 = arith.constant 0 : index
    %c0_4 = arith.constant 0 : index
    %5 = vector.load %arg3[%c0_2, %c0_3, %c0_4] : memref<1x32x96xbf16, #tpu.memory_space<vmem>>, vector<1x32x96xbf16>
    %6 = vector.shape_cast %5 : vector<1x32x96xbf16> to vector<32x96xbf16>
    %cst = arith.constant dense<0.000000e+00> : vector<16x96xf32>
    %7 = tpu.matmul %4, %6, %cst {dimension_numbers = #tpu.dot_dimension_numbers<[1], [0], [0], [1], [0, 0, 1, 1], [], []>} : vector<16x32xbf16>, vector<32x96xbf16>, vector<16x96xf32> -> vector<16x96xf32>
    %c0_5 = arith.constant 0 : index
    %c0_6 = arith.constant 0 : index
    %c0_7 = arith.constant 0 : index
    %8 = vector.load %arg4[%c0_5, %c0_6, %c0_7] : memref<1x1x96xf32, #tpu.memory_space<vmem>>, vector<1x1x96xf32>
    %9 = vector.shape_cast %8 : vector<1x1x96xf32> to vector<1x96xf32>
    %10 = vector.broadcast %9 : vector<1x96xf32> to vector<16x96xf32>
    %11 = arith.addf %7, %10 : vector<16x96xf32>
    %12 = vector.extract_strided_slice %11 {offsets = [0, 0], sizes = [16, 32], strides = [1, 1]} : vector<16x96xf32> to vector<16x32xf32>
    %13 = vector.shape_cast %12 : vector<16x32xf32> to vector<2x8x32xf32>
    %14 = vector.extract_strided_slice %11 {offsets = [0, 32], sizes = [16, 32], strides = [1, 1]} : vector<16x96xf32> to vector<16x32xf32>
    %15 = vector.shape_cast %14 : vector<16x32xf32> to vector<2x8x32xf32>
    %16 = vector.extract_strided_slice %11 {offsets = [0, 64], sizes = [16, 32], strides = [1, 1]} : vector<16x96xf32> to vector<16x32xf32>
    %17 = vector.shape_cast %16 : vector<16x32xf32> to vector<2x8x32xf32>
    %18 = vector.extract_strided_slice %13 {offsets = [0, 0, 0], sizes = [2, 8, 8], strides = [1, 1, 1]} : vector<2x8x32xf32> to vector<2x8x8xf32>
    %19 = vector.extract_strided_slice %15 {offsets = [0, 0, 0], sizes = [2, 8, 8], strides = [1, 1, 1]} : vector<2x8x32xf32> to vector<2x8x8xf32>
    "tpu.trace_start"() <{level = 10 : i32, message = "bqd,bkd->bqk"}> : () -> ()
    %cst_8 = arith.constant dense<0.000000e+00> : vector<2x8x8xf32>
    %20 = tpu.matmul %18, %19, %cst_8 {dimension_numbers = #tpu.dot_dimension_numbers<[2], [2], [1], [1], [0, 0, 0, 1, 1, 1], [0], [0]>} : vector<2x8x8xf32>, vector<2x8x8xf32>, vector<2x8x8xf32> -> vector<2x8x8xf32>
    "tpu.trace_stop"() : () -> ()
    %cst_9 = arith.constant 0.353553385 : f32
    %21 = vector.broadcast %cst_9 : f32 to vector<2x8x8xf32>
    %22 = arith.mulf %20, %21 : vector<2x8x8xf32>
    %cst_10 = arith.constant dense<0xFF800000> : vector<2x8xf32>
    %23 = vector.multi_reduction <maximumf>, %22, %cst_10 [2] : vector<2x8x8xf32> to vector<2x8xf32>
    %24 = vector.shape_cast %23 : vector<2x8xf32> to vector<2x8x1xf32>
    %25 = vector.broadcast %24 : vector<2x8x1xf32> to vector<2x8x8xf32>
    %26 = arith.subf %22, %25 : vector<2x8x8xf32>
    %27 = math.exp %26 : vector<2x8x8xf32>
    %cst_11 = arith.constant dense<0.000000e+00> : vector<2x8xf32>
    %28 = vector.multi_reduction <add>, %27, %cst_11 [2] : vector<2x8x8xf32> to vector<2x8xf32>
    %29 = vector.shape_cast %28 : vector<2x8xf32> to vector<2x8x1xf32>
    %30 = tpu.reciprocal %29 {approx = true} : vector<2x8x1xf32> -> vector<2x8x1xf32>
    %31 = vector.broadcast %30 : vector<2x8x1xf32> to vector<2x8x8xf32>
    %32 = arith.mulf %27, %31 : vector<2x8x8xf32>
    %33 = vector.extract_strided_slice %17 {offsets = [0, 0, 0], sizes = [2, 8, 8], strides = [1, 1, 1]} : vector<2x8x32xf32> to vector<2x8x8xf32>
    "tpu.trace_start"() <{level = 10 : i32, message = "bqk,bkd->bqd"}> : () -> ()
    %cst_12 = arith.constant dense<0.000000e+00> : vector<2x8x8xf32>
    %34 = tpu.matmul %32, %33, %cst_12 {dimension_numbers = #tpu.dot_dimension_numbers<[2], [1], [1], [2], [0, 0, 0, 1, 1, 2], [0], [0]>} : vector<2x8x8xf32>, vector<2x8x8xf32>, vector<2x8x8xf32> -> vector<2x8x8xf32>
    "tpu.trace_stop"() : () -> ()
    %35 = vector.extract_strided_slice %13 {offsets = [0, 0, 8], sizes = [2, 8, 8], strides = [1, 1, 1]} : vector<2x8x32xf32> to vector<2x8x8xf32>
    %36 = vector.extract_strided_slice %15 {offsets = [0, 0, 8], sizes = [2, 8, 8], strides = [1, 1, 1]} : vector<2x8x32xf32> to vector<2x8x8xf32>
    "tpu.trace_start"() <{level = 10 : i32, message = "bqd,bkd->bqk"}> : () -> ()
    %cst_13 = arith.constant dense<0.000000e+00> : vector<2x8x8xf32>
    %37 = tpu.matmul %35, %36, %cst_13 {dimension_numbers = #tpu.dot_dimension_numbers<[2], [2], [1], [1], [0, 0, 0, 1, 1, 1], [0], [0]>} : vector<2x8x8xf32>, vector<2x8x8xf32>, vector<2x8x8xf32> -> vector<2x8x8xf32>
    "tpu.trace_stop"() : () -> ()
    %cst_14 = arith.constant 0.353553385 : f32
    %38 = vector.broadcast %cst_14 : f32 to vector<2x8x8xf32>
    %39 = arith.mulf %37, %38 : vector<2x8x8xf32>
    %cst_15 = arith.constant dense<0xFF800000> : vector<2x8xf32>
    %40 = vector.multi_reduction <maximumf>, %39, %cst_15 [2] : vector<2x8x8xf32> to vector<2x8xf32>
    %41 = vector.shape_cast %40 : vector<2x8xf32> to vector<2x8x1xf32>
    %42 = vector.broadcast %41 : vector<2x8x1xf32> to vector<2x8x8xf32>
    %43 = arith.subf %39, %42 : vector<2x8x8xf32>
    %44 = math.exp %43 : vector<2x8x8xf32>
    %cst_16 = arith.constant dense<0.000000e+00> : vector<2x8xf32>
    %45 = vector.multi_reduction <add>, %44, %cst_16 [2] : vector<2x8x8xf32> to vector<2x8xf32>
    %46 = vector.shape_cast %45 : vector<2x8xf32> to vector<2x8x1xf32>
    %47 = tpu.reciprocal %46 {approx = true} : vector<2x8x1xf32> -> vector<2x8x1xf32>
    %48 = vector.broadcast %47 : vector<2x8x1xf32> to vector<2x8x8xf32>
    %49 = arith.mulf %44, %48 : vector<2x8x8xf32>
    %50 = vector.extract_strided_slice %17 {offsets = [0, 0, 8], sizes = [2, 8, 8], strides = [1, 1, 1]} : vector<2x8x32xf32> to vector<2x8x8xf32>
    "tpu.trace_start"() <{level = 10 : i32, message = "bqk,bkd->bqd"}> : () -> ()
    %cst_17 = arith.constant dense<0.000000e+00> : vector<2x8x8xf32>
    %51 = tpu.matmul %49, %50, %cst_17 {dimension_numbers = #tpu.dot_dimension_numbers<[2], [1], [1], [2], [0, 0, 0, 1, 1, 2], [0], [0]>} : vector<2x8x8xf32>, vector<2x8x8xf32>, vector<2x8x8xf32> -> vector<2x8x8xf32>
    "tpu.trace_stop"() : () -> ()
    %52 = vector.extract_strided_slice %13 {offsets = [0, 0, 16], sizes = [2, 8, 8], strides = [1, 1, 1]} : vector<2x8x32xf32> to vector<2x8x8xf32>
    %53 = vector.extract_strided_slice %15 {offsets = [0, 0, 16], sizes = [2, 8, 8], strides = [1, 1, 1]} : vector<2x8x32xf32> to vector<2x8x8xf32>
    "tpu.trace_start"() <{level = 10 : i32, message = "bqd,bkd->bqk"}> : () -> ()
    %cst_18 = arith.constant dense<0.000000e+00> : vector<2x8x8xf32>
    %54 = tpu.matmul %52, %53, %cst_18 {dimension_numbers = #tpu.dot_dimension_numbers<[2], [2], [1], [1], [0, 0, 0, 1, 1, 1], [0], [0]>} : vector<2x8x8xf32>, vector<2x8x8xf32>, vector<2x8x8xf32> -> vector<2x8x8xf32>
    "tpu.trace_stop"() : () -> ()
    %cst_19 = arith.constant 0.353553385 : f32
    %55 = vector.broadcast %cst_19 : f32 to vector<2x8x8xf32>
    %56 = arith.mulf %54, %55 : vector<2x8x8xf32>
    %cst_20 = arith.constant dense<0xFF800000> : vector<2x8xf32>
    %57 = vector.multi_reduction <maximumf>, %56, %cst_20 [2] : vector<2x8x8xf32> to vector<2x8xf32>
    %58 = vector.shape_cast %57 : vector<2x8xf32> to vector<2x8x1xf32>
    %59 = vector.broadcast %58 : vector<2x8x1xf32> to vector<2x8x8xf32>
    %60 = arith.subf %56, %59 : vector<2x8x8xf32>
    %61 = math.exp %60 : vector<2x8x8xf32>
    %cst_21 = arith.constant dense<0.000000e+00> : vector<2x8xf32>
    %62 = vector.multi_reduction <add>, %61, %cst_21 [2] : vector<2x8x8xf32> to vector<2x8xf32>
    %63 = vector.shape_cast %62 : vector<2x8xf32> to vector<2x8x1xf32>
    %64 = tpu.reciprocal %63 {approx = true} : vector<2x8x1xf32> -> vector<2x8x1xf32>
    %65 = vector.broadcast %64 : vector<2x8x1xf32> to vector<2x8x8xf32>
    %66 = arith.mulf %61, %65 : vector<2x8x8xf32>
    %67 = vector.extract_strided_slice %17 {offsets = [0, 0, 16], sizes = [2, 8, 8], strides = [1, 1, 1]} : vector<2x8x32xf32> to vector<2x8x8xf32>
    "tpu.trace_start"() <{level = 10 : i32, message = "bqk,bkd->bqd"}> : () -> ()
    %cst_22 = arith.constant dense<0.000000e+00> : vector<2x8x8xf32>
    %68 = tpu.matmul %66, %67, %cst_22 {dimension_numbers = #tpu.dot_dimension_numbers<[2], [1], [1], [2], [0, 0, 0, 1, 1, 2], [0], [0]>} : vector<2x8x8xf32>, vector<2x8x8xf32>, vector<2x8x8xf32> -> vector<2x8x8xf32>
    "tpu.trace_stop"() : () -> ()
    %69 = vector.extract_strided_slice %13 {offsets = [0, 0, 24], sizes = [2, 8, 8], strides = [1, 1, 1]} : vector<2x8x32xf32> to vector<2x8x8xf32>
    %70 = vector.extract_strided_slice %15 {offsets = [0, 0, 24], sizes = [2, 8, 8], strides = [1, 1, 1]} : vector<2x8x32xf32> to vector<2x8x8xf32>
    "tpu.trace_start"() <{level = 10 : i32, message = "bqd,bkd->bqk"}> : () -> ()
    %cst_23 = arith.constant dense<0.000000e+00> : vector<2x8x8xf32>
    %71 = tpu.matmul %69, %70, %cst_23 {dimension_numbers = #tpu.dot_dimension_numbers<[2], [2], [1], [1], [0, 0, 0, 1, 1, 1], [0], [0]>} : vector<2x8x8xf32>, vector<2x8x8xf32>, vector<2x8x8xf32> -> vector<2x8x8xf32>
    "tpu.trace_stop"() : () -> ()
    %cst_24 = arith.constant 0.353553385 : f32
    %72 = vector.broadcast %cst_24 : f32 to vector<2x8x8xf32>
    %73 = arith.mulf %71, %72 : vector<2x8x8xf32>
    %cst_25 = arith.constant dense<0xFF800000> : vector<2x8xf32>
    %74 = vector.multi_reduction <maximumf>, %73, %cst_25 [2] : vector<2x8x8xf32> to vector<2x8xf32>
    %75 = vector.shape_cast %74 : vector<2x8xf32> to vector<2x8x1xf32>
    %76 = vector.broadcast %75 : vector<2x8x1xf32> to vector<2x8x8xf32>
    %77 = arith.subf %73, %76 : vector<2x8x8xf32>
    %78 = math.exp %77 : vector<2x8x8xf32>
    %cst_26 = arith.constant dense<0.000000e+00> : vector<2x8xf32>
    %79 = vector.multi_reduction <add>, %78, %cst_26 [2] : vector<2x8x8xf32> to vector<2x8xf32>
    %80 = vector.shape_cast %79 : vector<2x8xf32> to vector<2x8x1xf32>
    %81 = tpu.reciprocal %80 {approx = true} : vector<2x8x1xf32> -> vector<2x8x1xf32>
    %82 = vector.broadcast %81 : vector<2x8x1xf32> to vector<2x8x8xf32>
    %83 = arith.mulf %78, %82 : vector<2x8x8xf32>
    %84 = vector.extract_strided_slice %17 {offsets = [0, 0, 24], sizes = [2, 8, 8], strides = [1, 1, 1]} : vector<2x8x32xf32> to vector<2x8x8xf32>
    "tpu.trace_start"() <{level = 10 : i32, message = "bqk,bkd->bqd"}> : () -> ()
    %cst_27 = arith.constant dense<0.000000e+00> : vector<2x8x8xf32>
    %85 = tpu.matmul %83, %84, %cst_27 {dimension_numbers = #tpu.dot_dimension_numbers<[2], [1], [1], [2], [0, 0, 0, 1, 1, 2], [0], [0]>} : vector<2x8x8xf32>, vector<2x8x8xf32>, vector<2x8x8xf32> -> vector<2x8x8xf32>
    "tpu.trace_stop"() : () -> ()
    %86 = tpu.concatenate %34, %51, %68, %85 in 2 : vector<2x8x8xf32>, vector<2x8x8xf32>, vector<2x8x8xf32>, vector<2x8x8xf32> -> vector<2x8x32xf32>
    %87 = vector.shape_cast %86 : vector<2x8x32xf32> to vector<16x32xf32>
    %88 = arith.truncf %87 : vector<16x32xf32> to vector<16x32xbf16>
    %c0_28 = arith.constant 0 : index
    %c0_29 = arith.constant 0 : index
    %c0_30 = arith.constant 0 : index
    %89 = vector.load %arg5[%c0_28, %c0_29, %c0_30] : memref<1x32x32xbf16, #tpu.memory_space<vmem>>, vector<1x32x32xbf16>
    %90 = vector.shape_cast %89 : vector<1x32x32xbf16> to vector<32x32xbf16>
    %cst_31 = arith.constant dense<0.000000e+00> : vector<16x32xf32>
    %91 = tpu.matmul %88, %90, %cst_31 {dimension_numbers = #tpu.dot_dimension_numbers<[1], [0], [0], [1], [0, 0, 1, 1], [], []>} : vector<16x32xbf16>, vector<32x32xbf16>, vector<16x32xf32> -> vector<16x32xf32>
    %c0_32 = arith.constant 0 : index
    %c0_33 = arith.constant 0 : index
    %c0_34 = arith.constant 0 : index
    %92 = vector.load %arg6[%c0_32, %c0_33, %c0_34] : memref<1x1x32xf32, #tpu.memory_space<vmem>>, vector<1x1x32xf32>
    %93 = vector.shape_cast %92 : vector<1x1x32xf32> to vector<1x32xf32>
    %94 = vector.broadcast %93 : vector<1x32xf32> to vector<16x32xf32>
    %95 = arith.addf %91, %94 : vector<16x32xf32>
    %96 = arith.addf %3, %95 : vector<16x32xf32>
    %c0_35 = arith.constant 0 : index
    %c0_36 = arith.constant 0 : index
    %c0_37 = arith.constant 0 : index
    %c0_38 = arith.constant 0 : index
    %97 = vector.load %arg7[%c0_35, %c0_36, %c0_37, %c0_38] : memref<1x2x1x32xf32, #tpu.memory_space<vmem>>, vector<1x1x1x32xf32>
    %98 = vector.shape_cast %97 : vector<1x1x1x32xf32> to vector<1x32xf32>
    %c0_39 = arith.constant 0 : index
    %c1 = arith.constant 1 : index
    %c0_40 = arith.constant 0 : index
    %c0_41 = arith.constant 0 : index
    %99 = vector.load %arg7[%c0_39, %c1, %c0_40, %c0_41] : memref<1x2x1x32xf32, #tpu.memory_space<vmem>>, vector<1x1x1x32xf32>
    %100 = vector.shape_cast %99 : vector<1x1x1x32xf32> to vector<1x32xf32>
    %cst_42 = arith.constant dense<0.000000e+00> : vector<16xf32>
    %101 = vector.multi_reduction <add>, %96, %cst_42 [1] : vector<16x32xf32> to vector<16xf32>
    %102 = vector.shape_cast %101 : vector<16xf32> to vector<16x1xf32>
    %cst_43 = arith.constant 3.200000e+01 : f32
    %103 = vector.broadcast %cst_43 : f32 to vector<16x1xf32>
    %104 = arith.divf %102, %103 : vector<16x1xf32>
    %105 = vector.broadcast %104 : vector<16x1xf32> to vector<16x32xf32>
    %106 = arith.subf %96, %105 : vector<16x32xf32>
    %107 = arith.mulf %106, %106 : vector<16x32xf32>
    %cst_44 = arith.constant dense<0.000000e+00> : vector<16xf32>
    %108 = vector.multi_reduction <add>, %107, %cst_44 [1] : vector<16x32xf32> to vector<16xf32>
    %109 = vector.shape_cast %108 : vector<16xf32> to vector<16x1xf32>
    %cst_45 = arith.constant 3.200000e+01 : f32
    %110 = vector.broadcast %cst_45 : f32 to vector<16x1xf32>
    %111 = arith.divf %109, %110 : vector<16x1xf32>
    %112 = vector.broadcast %104 : vector<16x1xf32> to vector<16x32xf32>
    %113 = arith.subf %96, %112 : vector<16x32xf32>
    %cst_46 = arith.constant 9.99999996E-13 : f32
    %114 = vector.broadcast %cst_46 : f32 to vector<16x1xf32>
    %115 = arith.addf %111, %114 : vector<16x1xf32>
    %116 = math.rsqrt %115 : vector<16x1xf32>
    %117 = vector.broadcast %116 : vector<16x1xf32> to vector<16x32xf32>
    %118 = arith.mulf %113, %117 : vector<16x32xf32>
    %119 = vector.broadcast %98 : vector<1x32xf32> to vector<16x32xf32>
    %120 = arith.mulf %118, %119 : vector<16x32xf32>
    %121 = vector.broadcast %100 : vector<1x32xf32> to vector<16x32xf32>
    %122 = arith.addf %120, %121 : vector<16x32xf32>
    %123 = arith.truncf %122 : vector<16x32xf32> to vector<16x32xbf16>
    %c0_47 = arith.constant 0 : index
    %c0_48 = arith.constant 0 : index
    %c0_49 = arith.constant 0 : index
    %124 = vector.load %arg8[%c0_47, %c0_48, %c0_49] : memref<1x32x64xbf16, #tpu.memory_space<vmem>>, vector<1x32x64xbf16>
    %125 = vector.shape_cast %124 : vector<1x32x64xbf16> to vector<32x64xbf16>
    %cst_50 = arith.constant dense<0.000000e+00> : vector<16x64xf32>
    %126 = tpu.matmul %123, %125, %cst_50 {dimension_numbers = #tpu.dot_dimension_numbers<[1], [0], [0], [1], [0, 0, 1, 1], [], []>} : vector<16x32xbf16>, vector<32x64xbf16>, vector<16x64xf32> -> vector<16x64xf32>
    %c0_51 = arith.constant 0 : index
    %c0_52 = arith.constant 0 : index
    %c0_53 = arith.constant 0 : index
    %127 = vector.load %arg9[%c0_51, %c0_52, %c0_53] : memref<1x1x64xf32, #tpu.memory_space<vmem>>, vector<1x1x64xf32>
    %128 = vector.shape_cast %127 : vector<1x1x64xf32> to vector<1x64xf32>
    %129 = vector.broadcast %128 : vector<1x64xf32> to vector<16x64xf32>
    %130 = arith.addf %126, %129 : vector<16x64xf32>
    %131 = arith.mulf %130, %130 : vector<16x64xf32>
    %132 = arith.mulf %130, %131 : vector<16x64xf32>
    %cst_54 = arith.constant 4.471500e-02 : f32
    %133 = vector.broadcast %cst_54 : f32 to vector<16x64xf32>
    %134 = arith.mulf %133, %132 : vector<16x64xf32>
    %135 = arith.addf %130, %134 : vector<16x64xf32>
    %cst_55 = arith.constant 0.797884583 : f32
    %136 = vector.broadcast %cst_55 : f32 to vector<16x64xf32>
    %137 = arith.mulf %136, %135 : vector<16x64xf32>
    %138 = math.tanh %137 : vector<16x64xf32>
    %cst_56 = arith.constant 1.000000e+00 : f32
    %139 = vector.broadcast %cst_56 : f32 to vector<16x64xf32>
    %140 = arith.addf %139, %138 : vector<16x64xf32>
    %cst_57 = arith.constant 5.000000e-01 : f32
    %141 = vector.broadcast %cst_57 : f32 to vector<16x64xf32>
    %142 = arith.mulf %141, %140 : vector<16x64xf32>
    %143 = arith.mulf %130, %142 : vector<16x64xf32>
    %144 = arith.truncf %143 : vector<16x64xf32> to vector<16x64xbf16>
    %c0_58 = arith.constant 0 : index
    %c0_59 = arith.constant 0 : index
    %c0_60 = arith.constant 0 : index
    %145 = vector.load %arg10[%c0_58, %c0_59, %c0_60] : memref<1x64x32xbf16, #tpu.memory_space<vmem>>, vector<1x64x32xbf16>
    %146 = vector.shape_cast %145 : vector<1x64x32xbf16> to vector<64x32xbf16>
    %cst_61 = arith.constant dense<0.000000e+00> : vector<16x32xf32>
    %147 = tpu.matmul %144, %146, %cst_61 {dimension_numbers = #tpu.dot_dimension_numbers<[1], [0], [0], [1], [0, 0, 1, 1], [], []>} : vector<16x64xbf16>, vector<64x32xbf16>, vector<16x32xf32> -> vector<16x32xf32>
    %c0_62 = arith.constant 0 : index
    %c0_63 = arith.constant 0 : index
    %c0_64 = arith.constant 0 : index
    %148 = vector.load %arg11[%c0_62, %c0_63, %c0_64] : memref<1x1x32xf32, #tpu.memory_space<vmem>>, vector<1x1x32xf32>
    %149 = vector.shape_cast %148 : vector<1x1x32xf32> to vector<1x32xf32>
    %150 = vector.broadcast %149 : vector<1x32xf32> to vector<16x32xf32>
    %151 = arith.addf %147, %150 : vector<16x32xf32>
    %152 = arith.addf %122, %151 : vector<16x32xf32>
    %c0_65 = arith.constant 0 : index
    %c0_66 = arith.constant 0 : index
    %c0_67 = arith.constant 0 : index
    %c0_68 = arith.constant 0 : index
    %153 = vector.load %arg12[%c0_65, %c0_66, %c0_67, %c0_68] : memref<1x2x1x32xf32, #tpu.memory_space<vmem>>, vector<1x1x1x32xf32>
    %154 = vector.shape_cast %153 : vector<1x1x1x32xf32> to vector<1x32xf32>
    %c0_69 = arith.constant 0 : index
    %c1_70 = arith.constant 1 : index
    %c0_71 = arith.constant 0 : index
    %c0_72 = arith.constant 0 : index
    %155 = vector.load %arg12[%c0_69, %c1_70, %c0_71, %c0_72] : memref<1x2x1x32xf32, #tpu.memory_space<vmem>>, vector<1x1x1x32xf32>
    %156 = vector.shape_cast %155 : vector<1x1x1x32xf32> to vector<1x32xf32>
    %cst_73 = arith.constant dense<0.000000e+00> : vector<16xf32>
    %157 = vector.multi_reduction <add>, %152, %cst_73 [1] : vector<16x32xf32> to vector<16xf32>
    %158 = vector.shape_cast %157 : vector<16xf32> to vector<16x1xf32>
    %cst_74 = arith.constant 3.200000e+01 : f32
    %159 = vector.broadcast %cst_74 : f32 to vector<16x1xf32>
    %160 = arith.divf %158, %159 : vector<16x1xf32>
    %161 = vector.broadcast %160 : vector<16x1xf32> to vector<16x32xf32>
    %162 = arith.subf %152, %161 : vector<16x32xf32>
    %163 = arith.mulf %162, %162 : vector<16x32xf32>
    %cst_75 = arith.constant dense<0.000000e+00> : vector<16xf32>
    %164 = vector.multi_reduction <add>, %163, %cst_75 [1] : vector<16x32xf32> to vector<16xf32>
    %165 = vector.shape_cast %164 : vector<16xf32> to vector<16x1xf32>
    %cst_76 = arith.constant 3.200000e+01 : f32
    %166 = vector.broadcast %cst_76 : f32 to vector<16x1xf32>
    %167 = arith.divf %165, %166 : vector<16x1xf32>
    %168 = vector.broadcast %160 : vector<16x1xf32> to vector<16x32xf32>
    %169 = arith.subf %152, %168 : vector<16x32xf32>
    %cst_77 = arith.constant 9.99999996E-13 : f32
    %170 = vector.broadcast %cst_77 : f32 to vector<16x1xf32>
    %171 = arith.addf %167, %170 : vector<16x1xf32>
    %172 = math.rsqrt %171 : vector<16x1xf32>
    %173 = vector.broadcast %172 : vector<16x1xf32> to vector<16x32xf32>
    %174 = arith.mulf %169, %173 : vector<16x32xf32>
    %175 = vector.broadcast %154 : vector<1x32xf32> to vector<16x32xf32>
    %176 = arith.mulf %174, %175 : vector<16x32xf32>
    %177 = vector.broadcast %156 : vector<1x32xf32> to vector<16x32xf32>
    %178 = arith.addf %176, %177 : vector<16x32xf32>
    %c0_78 = arith.constant 0 : index
    %c0_79 = arith.constant 0 : index
    %179 = vector.load %arg14[%c0_78, %c0_79] : memref<16x32xf32, #tpu.memory_space<vmem>>, vector<16x32xf32>
    tpu.vector_store %arg14[%c0_78, %c0_79], %178 {strides = array<i32>} : memref<16x32xf32, #tpu.memory_space<vmem>>, vector<16x32xf32>,
    %c1_i32 = arith.constant 1 : i32
    %180 = arith.cmpi eq, %arg0, %c1_i32 : i32
    %181 = arith.extui %180 : i1 to i32
    %c0_i32_80 = arith.constant 0 : i32
    %182 = arith.cmpi ne, %181, %c0_i32_80 : i32
    scf.if %182 {
      %c0_81 = arith.constant 0 : index
      %c0_82 = arith.constant 0 : index
      %183 = vector.load %arg13[%c0_81, %c0_82] : memref<16x32xf32, #tpu.memory_space<vmem>>, vector<16x32xf32>
      tpu.vector_store %arg13[%c0_81, %c0_82], %178 {strides = array<i32>} : memref<16x32xf32, #tpu.memory_space<vmem>>, vector<16x32xf32>,
    } else {
    }
    return
  }
  func.func @transform_0(%arg0: i32) -> (i32, i32) {
    %c0_i32 = arith.constant 0 : i32
    %c0_i32_0 = arith.constant 0 : i32
    %c0_i32_1 = arith.constant 0 : i32
    return %c0_i32, %c0_i32_0 : i32, i32
  }
  func.func @transform_1(%arg0: i32) -> (i32, i32, i32) {
    %c0_i32 = arith.constant 0 : i32
    %c0_i32_0 = arith.constant 0 : i32
    %c0_i32_1 = arith.constant 0 : i32
    %c0_i32_2 = arith.constant 0 : i32
    return %c0_i32, %c0_i32_0, %c0_i32_1 : i32, i32, i32
  }
  func.func @transform_2(%arg0: i32) -> (i32, i32, i32) {
    %c0_i32 = arith.constant 0 : i32
    %c0_i32_0 = arith.constant 0 : i32
    %c0_i32_1 = arith.constant 0 : i32
    return %arg0, %c0_i32, %c0_i32_0 : i32, i32, i32
  }
  func.func @transform_3(%arg0: i32) -> (i32, i32, i32) {
    %c0_i32 = arith.constant 0 : i32
    %c0_i32_0 = arith.constant 0 : i32
    %c0_i32_1 = arith.constant 0 : i32
    return %arg0, %c0_i32, %c0_i32_0 : i32, i32, i32
  }
  func.func @transform_4(%arg0: i32) -> (i32, i32, i32) {
    %c0_i32 = arith.constant 0 : i32
    %c0_i32_0 = arith.constant 0 : i32
    %c0_i32_1 = arith.constant 0 : i32
    return %arg0, %c0_i32, %c0_i32_0 : i32, i32, i32
  }
  func.func @transform_5(%arg0: i32) -> (i32, i32, i32) {
    %c0_i32 = arith.constant 0 : i32
    %c0_i32_0 = arith.constant 0 : i32
    %c0_i32_1 = arith.constant 0 : i32
    return %arg0, %c0_i32, %c0_i32_0 : i32, i32, i32
  }
  func.func @transform_6(%arg0: i32) -> (i32, i32, i32, i32) {
    %c0_i32 = arith.constant 0 : i32
    %c0_i32_0 = arith.constant 0 : i32
    %c0_i32_1 = arith.constant 0 : i32
    %c0_i32_2 = arith.constant 0 : i32
    return %arg0, %c0_i32, %c0_i32_0, %c0_i32_1 : i32, i32, i32, i32
  }
  func.func @transform_7(%arg0: i32) -> (i32, i32, i32) {
    %c0_i32 = arith.constant 0 : i32
    %c0_i32_0 = arith.constant 0 : i32
    %c0_i32_1 = arith.constant 0 : i32
    return %arg0, %c0_i32, %c0_i32_0 : i32, i32, i32
  }
  func.func @transform_8(%arg0: i32) -> (i32, i32, i32) {
    %c0_i32 = arith.constant 0 : i32
    %c0_i32_0 = arith.constant 0 : i32
    %c0_i32_1 = arith.constant 0 : i32
    return %arg0, %c0_i32, %c0_i32_0 : i32, i32, i32
  }
  func.func @transform_9(%arg0: i32) -> (i32, i32, i32) {
    %c0_i32 = arith.constant 0 : i32
    %c0_i32_0 = arith.constant 0 : i32
    %c0_i32_1 = arith.constant 0 : i32
    return %arg0, %c0_i32, %c0_i32_0 : i32, i32, i32
  }
  func.func @transform_10(%arg0: i32) -> (i32, i32, i32) {
    %c0_i32 = arith.constant 0 : i32
    %c0_i32_0 = arith.constant 0 : i32
    %c0_i32_1 = arith.constant 0 : i32
    return %arg0, %c0_i32, %c0_i32_0 : i32, i32, i32
  }
  func.func @transform_11(%arg0: i32) -> (i32, i32, i32, i32) {
    %c0_i32 = arith.constant 0 : i32
    %c0_i32_0 = arith.constant 0 : i32
    %c0_i32_1 = arith.constant 0 : i32
    %c0_i32_2 = arith.constant 0 : i32
    return %arg0, %c0_i32, %c0_i32_0, %c0_i32_1 : i32, i32, i32, i32
  }
  func.func @transform_12(%arg0: i32) -> (i32, i32) {
    %c0_i32 = arith.constant 0 : i32
    %c0_i32_0 = arith.constant 0 : i32
    %c0_i32_1 = arith.constant 0 : i32
    return %c0_i32, %c0_i32_0 : i32, i32
  }
}

module attributes {stable_mosaic.version = 11 : i64} {
  func.func @_bilstm_head_kernel(%arg0: i32, %arg1: memref<16x32xf32, #tpu.memory_space<vmem>>, %arg2: memref<2x4x32x32xbf16, #tpu.memory_space<vmem>>, %arg3: memref<2x4x1x32xf32, #tpu.memory_space<vmem>>, %arg4: memref<2x4x32x32xbf16, #tpu.memory_space<vmem>>, %arg5: memref<1x1x64xf32, #tpu.memory_space<vmem>>, %arg6: memref<1x1xf32, #tpu.memory_space<vmem>>, %arg7: memref<2x8x1xf32, #tpu.memory_space<vmem>>, %arg8: memref<2x8x1xf32, #tpu.memory_space<vmem>>, %arg9: memref<1x1xf32, #tpu.memory_space<vmem>>, %arg10: memref<2x4x16x32xf32, #tpu.memory_space<vmem>>, %arg11: memref<2x8x64xf32, #tpu.memory_space<vmem>>) attributes {dimension_semantics = [#tpu.dimension_semantics<arbitrary>], iteration_bounds = array<i64: 1>, scalar_prefetch = 0 : i64, scratch_operands = 2 : i64, tpu.core_type = #tpu.core_type<tc>, window_params = [{pipeline_mode = #tpu.pipeline_mode<synchronous>, transform_indices = @transform_0, window_bounds = array<i64: 16, 32>}, {pipeline_mode = #tpu.pipeline_mode<synchronous>, transform_indices = @transform_1, window_bounds = array<i64: 2, 4, 32, 32>}, {pipeline_mode = #tpu.pipeline_mode<synchronous>, transform_indices = @transform_2, window_bounds = array<i64: 2, 4, 1, 32>}, {pipeline_mode = #tpu.pipeline_mode<synchronous>, transform_indices = @transform_3, window_bounds = array<i64: 2, 4, 32, 32>}, {pipeline_mode = #tpu.pipeline_mode<synchronous>, transform_indices = @transform_4, window_bounds = array<i64: 1, 1, 64>}, {pipeline_mode = #tpu.pipeline_mode<synchronous>, transform_indices = @transform_5, window_bounds = array<i64: 1, 1>}, {pipeline_mode = #tpu.pipeline_mode<synchronous>, transform_indices = @transform_6, window_bounds = array<i64: 2, 8, 1>}, {pipeline_mode = #tpu.pipeline_mode<synchronous>, transform_indices = @transform_7, window_bounds = array<i64: 2, 8, 1>}, {pipeline_mode = #tpu.pipeline_mode<synchronous>, transform_indices = @transform_8, window_bounds = array<i64: 1, 1>}]} {
    %c0 = arith.constant 0 : index
    %c0_0 = arith.constant 0 : index
    %0 = vector.load %arg1[%c0, %c0_0] : memref<16x32xf32, #tpu.memory_space<vmem>>, vector<16x32xf32>
    %1 = arith.truncf %0 : vector<16x32xf32> to vector<16x32xbf16>
    %c0_1 = arith.constant 0 : index
    %c0_2 = arith.constant 0 : index
    %c0_3 = arith.constant 0 : index
    %c0_4 = arith.constant 0 : index
    %2 = vector.load %arg2[%c0_1, %c0_2, %c0_3, %c0_4] : memref<2x4x32x32xbf16, #tpu.memory_space<vmem>>, vector<1x1x32x32xbf16>
    %3 = vector.shape_cast %2 : vector<1x1x32x32xbf16> to vector<32x32xbf16>
    %cst = arith.constant dense<0.000000e+00> : vector<16x32xf32>
    %4 = tpu.matmul %1, %3, %cst {dimension_numbers = #tpu.dot_dimension_numbers<[1], [0], [0], [1], [0, 0, 1, 1], [], []>} : vector<16x32xbf16>, vector<32x32xbf16>, vector<16x32xf32> -> vector<16x32xf32>
    %c0_5 = arith.constant 0 : index
    %c0_6 = arith.constant 0 : index
    %c0_7 = arith.constant 0 : index
    %c0_8 = arith.constant 0 : index
    %5 = vector.load %arg3[%c0_5, %c0_6, %c0_7, %c0_8] : memref<2x4x1x32xf32, #tpu.memory_space<vmem>>, vector<1x1x1x32xf32>
    %6 = vector.shape_cast %5 : vector<1x1x1x32xf32> to vector<1x32xf32>
    %7 = vector.broadcast %6 : vector<1x32xf32> to vector<16x32xf32>
    %8 = arith.addf %4, %7 : vector<16x32xf32>
    %c0_9 = arith.constant 0 : index
    %c0_10 = arith.constant 0 : index
    %c0_11 = arith.constant 0 : index
    %c0_12 = arith.constant 0 : index
    %9 = vector.load %arg10[%c0_9, %c0_10, %c0_11, %c0_12] : memref<2x4x16x32xf32, #tpu.memory_space<vmem>>, vector<1x1x16x32xf32>
    %10 = vector.shape_cast %9 : vector<1x1x16x32xf32> to vector<16x32xf32>
    %11 = vector.shape_cast %8 : vector<16x32xf32> to vector<1x1x16x32xf32>
    tpu.vector_store %arg10[%c0_9, %c0_10, %c0_11, %c0_12], %11 {strides = array<i32>} : memref<2x4x16x32xf32, #tpu.memory_space<vmem>>, vector<1x1x16x32xf32>,
    %c0_13 = arith.constant 0 : index
    %c1 = arith.constant 1 : index
    %c0_14 = arith.constant 0 : index
    %c0_15 = arith.constant 0 : index
    %12 = vector.load %arg2[%c0_13, %c1, %c0_14, %c0_15] : memref<2x4x32x32xbf16, #tpu.memory_space<vmem>>, vector<1x1x32x32xbf16>
    %13 = vector.shape_cast %12 : vector<1x1x32x32xbf16> to vector<32x32xbf16>
    %cst_16 = arith.constant dense<0.000000e+00> : vector<16x32xf32>
    %14 = tpu.matmul %1, %13, %cst_16 {dimension_numbers = #tpu.dot_dimension_numbers<[1], [0], [0], [1], [0, 0, 1, 1], [], []>} : vector<16x32xbf16>, vector<32x32xbf16>, vector<16x32xf32> -> vector<16x32xf32>
    %c0_17 = arith.constant 0 : index
    %c1_18 = arith.constant 1 : index
    %c0_19 = arith.constant 0 : index
    %c0_20 = arith.constant 0 : index
    %15 = vector.load %arg3[%c0_17, %c1_18, %c0_19, %c0_20] : memref<2x4x1x32xf32, #tpu.memory_space<vmem>>, vector<1x1x1x32xf32>
    %16 = vector.shape_cast %15 : vector<1x1x1x32xf32> to vector<1x32xf32>
    %17 = vector.broadcast %16 : vector<1x32xf32> to vector<16x32xf32>
    %18 = arith.addf %14, %17 : vector<16x32xf32>
    %c0_21 = arith.constant 0 : index
    %c1_22 = arith.constant 1 : index
    %c0_23 = arith.constant 0 : index
    %c0_24 = arith.constant 0 : index
    %19 = vector.load %arg10[%c0_21, %c1_22, %c0_23, %c0_24] : memref<2x4x16x32xf32, #tpu.memory_space<vmem>>, vector<1x1x16x32xf32>
    %20 = vector.shape_cast %19 : vector<1x1x16x32xf32> to vector<16x32xf32>
    %21 = vector.shape_cast %18 : vector<16x32xf32> to vector<1x1x16x32xf32>
    tpu.vector_store %arg10[%c0_21, %c1_22, %c0_23, %c0_24], %21 {strides = array<i32>} : memref<2x4x16x32xf32, #tpu.memory_space<vmem>>, vector<1x1x16x32xf32>,
    %c0_25 = arith.constant 0 : index
    %c2 = arith.constant 2 : index
    %c0_26 = arith.constant 0 : index
    %c0_27 = arith.constant 0 : index
    %22 = vector.load %arg2[%c0_25, %c2, %c0_26, %c0_27] : memref<2x4x32x32xbf16, #tpu.memory_space<vmem>>, vector<1x1x32x32xbf16>
    %23 = vector.shape_cast %22 : vector<1x1x32x32xbf16> to vector<32x32xbf16>
    %cst_28 = arith.constant dense<0.000000e+00> : vector<16x32xf32>
    %24 = tpu.matmul %1, %23, %cst_28 {dimension_numbers = #tpu.dot_dimension_numbers<[1], [0], [0], [1], [0, 0, 1, 1], [], []>} : vector<16x32xbf16>, vector<32x32xbf16>, vector<16x32xf32> -> vector<16x32xf32>
    %c0_29 = arith.constant 0 : index
    %c2_30 = arith.constant 2 : index
    %c0_31 = arith.constant 0 : index
    %c0_32 = arith.constant 0 : index
    %25 = vector.load %arg3[%c0_29, %c2_30, %c0_31, %c0_32] : memref<2x4x1x32xf32, #tpu.memory_space<vmem>>, vector<1x1x1x32xf32>
    %26 = vector.shape_cast %25 : vector<1x1x1x32xf32> to vector<1x32xf32>
    %27 = vector.broadcast %26 : vector<1x32xf32> to vector<16x32xf32>
    %28 = arith.addf %24, %27 : vector<16x32xf32>
    %c0_33 = arith.constant 0 : index
    %c2_34 = arith.constant 2 : index
    %c0_35 = arith.constant 0 : index
    %c0_36 = arith.constant 0 : index
    %29 = vector.load %arg10[%c0_33, %c2_34, %c0_35, %c0_36] : memref<2x4x16x32xf32, #tpu.memory_space<vmem>>, vector<1x1x16x32xf32>
    %30 = vector.shape_cast %29 : vector<1x1x16x32xf32> to vector<16x32xf32>
    %31 = vector.shape_cast %28 : vector<16x32xf32> to vector<1x1x16x32xf32>
    tpu.vector_store %arg10[%c0_33, %c2_34, %c0_35, %c0_36], %31 {strides = array<i32>} : memref<2x4x16x32xf32, #tpu.memory_space<vmem>>, vector<1x1x16x32xf32>,
    %c0_37 = arith.constant 0 : index
    %c3 = arith.constant 3 : index
    %c0_38 = arith.constant 0 : index
    %c0_39 = arith.constant 0 : index
    %32 = vector.load %arg2[%c0_37, %c3, %c0_38, %c0_39] : memref<2x4x32x32xbf16, #tpu.memory_space<vmem>>, vector<1x1x32x32xbf16>
    %33 = vector.shape_cast %32 : vector<1x1x32x32xbf16> to vector<32x32xbf16>
    %cst_40 = arith.constant dense<0.000000e+00> : vector<16x32xf32>
    %34 = tpu.matmul %1, %33, %cst_40 {dimension_numbers = #tpu.dot_dimension_numbers<[1], [0], [0], [1], [0, 0, 1, 1], [], []>} : vector<16x32xbf16>, vector<32x32xbf16>, vector<16x32xf32> -> vector<16x32xf32>
    %c0_41 = arith.constant 0 : index
    %c3_42 = arith.constant 3 : index
    %c0_43 = arith.constant 0 : index
    %c0_44 = arith.constant 0 : index
    %35 = vector.load %arg3[%c0_41, %c3_42, %c0_43, %c0_44] : memref<2x4x1x32xf32, #tpu.memory_space<vmem>>, vector<1x1x1x32xf32>
    %36 = vector.shape_cast %35 : vector<1x1x1x32xf32> to vector<1x32xf32>
    %37 = vector.broadcast %36 : vector<1x32xf32> to vector<16x32xf32>
    %38 = arith.addf %34, %37 : vector<16x32xf32>
    %c0_45 = arith.constant 0 : index
    %c3_46 = arith.constant 3 : index
    %c0_47 = arith.constant 0 : index
    %c0_48 = arith.constant 0 : index
    %39 = vector.load %arg10[%c0_45, %c3_46, %c0_47, %c0_48] : memref<2x4x16x32xf32, #tpu.memory_space<vmem>>, vector<1x1x16x32xf32>
    %40 = vector.shape_cast %39 : vector<1x1x16x32xf32> to vector<16x32xf32>
    %41 = vector.shape_cast %38 : vector<16x32xf32> to vector<1x1x16x32xf32>
    tpu.vector_store %arg10[%c0_45, %c3_46, %c0_47, %c0_48], %41 {strides = array<i32>} : memref<2x4x16x32xf32, #tpu.memory_space<vmem>>, vector<1x1x16x32xf32>,
    %c1_49 = arith.constant 1 : index
    %c0_50 = arith.constant 0 : index
    %c0_51 = arith.constant 0 : index
    %c0_52 = arith.constant 0 : index
    %42 = vector.load %arg2[%c1_49, %c0_50, %c0_51, %c0_52] : memref<2x4x32x32xbf16, #tpu.memory_space<vmem>>, vector<1x1x32x32xbf16>
    %43 = vector.shape_cast %42 : vector<1x1x32x32xbf16> to vector<32x32xbf16>
    %cst_53 = arith.constant dense<0.000000e+00> : vector<16x32xf32>
    %44 = tpu.matmul %1, %43, %cst_53 {dimension_numbers = #tpu.dot_dimension_numbers<[1], [0], [0], [1], [0, 0, 1, 1], [], []>} : vector<16x32xbf16>, vector<32x32xbf16>, vector<16x32xf32> -> vector<16x32xf32>
    %c1_54 = arith.constant 1 : index
    %c0_55 = arith.constant 0 : index
    %c0_56 = arith.constant 0 : index
    %c0_57 = arith.constant 0 : index
    %45 = vector.load %arg3[%c1_54, %c0_55, %c0_56, %c0_57] : memref<2x4x1x32xf32, #tpu.memory_space<vmem>>, vector<1x1x1x32xf32>
    %46 = vector.shape_cast %45 : vector<1x1x1x32xf32> to vector<1x32xf32>
    %47 = vector.broadcast %46 : vector<1x32xf32> to vector<16x32xf32>
    %48 = arith.addf %44, %47 : vector<16x32xf32>
    %c1_58 = arith.constant 1 : index
    %c0_59 = arith.constant 0 : index
    %c0_60 = arith.constant 0 : index
    %c0_61 = arith.constant 0 : index
    %49 = vector.load %arg10[%c1_58, %c0_59, %c0_60, %c0_61] : memref<2x4x16x32xf32, #tpu.memory_space<vmem>>, vector<1x1x16x32xf32>
    %50 = vector.shape_cast %49 : vector<1x1x16x32xf32> to vector<16x32xf32>
    %51 = vector.shape_cast %48 : vector<16x32xf32> to vector<1x1x16x32xf32>
    tpu.vector_store %arg10[%c1_58, %c0_59, %c0_60, %c0_61], %51 {strides = array<i32>} : memref<2x4x16x32xf32, #tpu.memory_space<vmem>>, vector<1x1x16x32xf32>,
    %c1_62 = arith.constant 1 : index
    %c1_63 = arith.constant 1 : index
    %c0_64 = arith.constant 0 : index
    %c0_65 = arith.constant 0 : index
    %52 = vector.load %arg2[%c1_62, %c1_63, %c0_64, %c0_65] : memref<2x4x32x32xbf16, #tpu.memory_space<vmem>>, vector<1x1x32x32xbf16>
    %53 = vector.shape_cast %52 : vector<1x1x32x32xbf16> to vector<32x32xbf16>
    %cst_66 = arith.constant dense<0.000000e+00> : vector<16x32xf32>
    %54 = tpu.matmul %1, %53, %cst_66 {dimension_numbers = #tpu.dot_dimension_numbers<[1], [0], [0], [1], [0, 0, 1, 1], [], []>} : vector<16x32xbf16>, vector<32x32xbf16>, vector<16x32xf32> -> vector<16x32xf32>
    %c1_67 = arith.constant 1 : index
    %c1_68 = arith.constant 1 : index
    %c0_69 = arith.constant 0 : index
    %c0_70 = arith.constant 0 : index
    %55 = vector.load %arg3[%c1_67, %c1_68, %c0_69, %c0_70] : memref<2x4x1x32xf32, #tpu.memory_space<vmem>>, vector<1x1x1x32xf32>
    %56 = vector.shape_cast %55 : vector<1x1x1x32xf32> to vector<1x32xf32>
    %57 = vector.broadcast %56 : vector<1x32xf32> to vector<16x32xf32>
    %58 = arith.addf %54, %57 : vector<16x32xf32>
    %c1_71 = arith.constant 1 : index
    %c1_72 = arith.constant 1 : index
    %c0_73 = arith.constant 0 : index
    %c0_74 = arith.constant 0 : index
    %59 = vector.load %arg10[%c1_71, %c1_72, %c0_73, %c0_74] : memref<2x4x16x32xf32, #tpu.memory_space<vmem>>, vector<1x1x16x32xf32>
    %60 = vector.shape_cast %59 : vector<1x1x16x32xf32> to vector<16x32xf32>
    %61 = vector.shape_cast %58 : vector<16x32xf32> to vector<1x1x16x32xf32>
    tpu.vector_store %arg10[%c1_71, %c1_72, %c0_73, %c0_74], %61 {strides = array<i32>} : memref<2x4x16x32xf32, #tpu.memory_space<vmem>>, vector<1x1x16x32xf32>,
    %c1_75 = arith.constant 1 : index
    %c2_76 = arith.constant 2 : index
    %c0_77 = arith.constant 0 : index
    %c0_78 = arith.constant 0 : index
    %62 = vector.load %arg2[%c1_75, %c2_76, %c0_77, %c0_78] : memref<2x4x32x32xbf16, #tpu.memory_space<vmem>>, vector<1x1x32x32xbf16>
    %63 = vector.shape_cast %62 : vector<1x1x32x32xbf16> to vector<32x32xbf16>
    %cst_79 = arith.constant dense<0.000000e+00> : vector<16x32xf32>
    %64 = tpu.matmul %1, %63, %cst_79 {dimension_numbers = #tpu.dot_dimension_numbers<[1], [0], [0], [1], [0, 0, 1, 1], [], []>} : vector<16x32xbf16>, vector<32x32xbf16>, vector<16x32xf32> -> vector<16x32xf32>
    %c1_80 = arith.constant 1 : index
    %c2_81 = arith.constant 2 : index
    %c0_82 = arith.constant 0 : index
    %c0_83 = arith.constant 0 : index
    %65 = vector.load %arg3[%c1_80, %c2_81, %c0_82, %c0_83] : memref<2x4x1x32xf32, #tpu.memory_space<vmem>>, vector<1x1x1x32xf32>
    %66 = vector.shape_cast %65 : vector<1x1x1x32xf32> to vector<1x32xf32>
    %67 = vector.broadcast %66 : vector<1x32xf32> to vector<16x32xf32>
    %68 = arith.addf %64, %67 : vector<16x32xf32>
    %c1_84 = arith.constant 1 : index
    %c2_85 = arith.constant 2 : index
    %c0_86 = arith.constant 0 : index
    %c0_87 = arith.constant 0 : index
    %69 = vector.load %arg10[%c1_84, %c2_85, %c0_86, %c0_87] : memref<2x4x16x32xf32, #tpu.memory_space<vmem>>, vector<1x1x16x32xf32>
    %70 = vector.shape_cast %69 : vector<1x1x16x32xf32> to vector<16x32xf32>
    %71 = vector.shape_cast %68 : vector<16x32xf32> to vector<1x1x16x32xf32>
    tpu.vector_store %arg10[%c1_84, %c2_85, %c0_86, %c0_87], %71 {strides = array<i32>} : memref<2x4x16x32xf32, #tpu.memory_space<vmem>>, vector<1x1x16x32xf32>,
    %c1_88 = arith.constant 1 : index
    %c3_89 = arith.constant 3 : index
    %c0_90 = arith.constant 0 : index
    %c0_91 = arith.constant 0 : index
    %72 = vector.load %arg2[%c1_88, %c3_89, %c0_90, %c0_91] : memref<2x4x32x32xbf16, #tpu.memory_space<vmem>>, vector<1x1x32x32xbf16>
    %73 = vector.shape_cast %72 : vector<1x1x32x32xbf16> to vector<32x32xbf16>
    %cst_92 = arith.constant dense<0.000000e+00> : vector<16x32xf32>
    %74 = tpu.matmul %1, %73, %cst_92 {dimension_numbers = #tpu.dot_dimension_numbers<[1], [0], [0], [1], [0, 0, 1, 1], [], []>} : vector<16x32xbf16>, vector<32x32xbf16>, vector<16x32xf32> -> vector<16x32xf32>
    %c1_93 = arith.constant 1 : index
    %c3_94 = arith.constant 3 : index
    %c0_95 = arith.constant 0 : index
    %c0_96 = arith.constant 0 : index
    %75 = vector.load %arg3[%c1_93, %c3_94, %c0_95, %c0_96] : memref<2x4x1x32xf32, #tpu.memory_space<vmem>>, vector<1x1x1x32xf32>
    %76 = vector.shape_cast %75 : vector<1x1x1x32xf32> to vector<1x32xf32>
    %77 = vector.broadcast %76 : vector<1x32xf32> to vector<16x32xf32>
    %78 = arith.addf %74, %77 : vector<16x32xf32>
    %c1_97 = arith.constant 1 : index
    %c3_98 = arith.constant 3 : index
    %c0_99 = arith.constant 0 : index
    %c0_100 = arith.constant 0 : index
    %79 = vector.load %arg10[%c1_97, %c3_98, %c0_99, %c0_100] : memref<2x4x16x32xf32, #tpu.memory_space<vmem>>, vector<1x1x16x32xf32>
    %80 = vector.shape_cast %79 : vector<1x1x16x32xf32> to vector<16x32xf32>
    %81 = vector.shape_cast %78 : vector<16x32xf32> to vector<1x1x16x32xf32>
    tpu.vector_store %arg10[%c1_97, %c3_98, %c0_99, %c0_100], %81 {strides = array<i32>} : memref<2x4x16x32xf32, #tpu.memory_space<vmem>>, vector<1x1x16x32xf32>,
    %c0_101 = arith.constant 0 : index
    %c0_102 = arith.constant 0 : index
    %c0_103 = arith.constant 0 : index
    %c0_104 = arith.constant 0 : index
    %82 = vector.load %arg4[%c0_101, %c0_102, %c0_103, %c0_104] : memref<2x4x32x32xbf16, #tpu.memory_space<vmem>>, vector<1x1x32x32xbf16>
    %83 = vector.shape_cast %82 : vector<1x1x32x32xbf16> to vector<32x32xbf16>
    %c0_105 = arith.constant 0 : index
    %c1_106 = arith.constant 1 : index
    %c0_107 = arith.constant 0 : index
    %c0_108 = arith.constant 0 : index
    %84 = vector.load %arg4[%c0_105, %c1_106, %c0_107, %c0_108] : memref<2x4x32x32xbf16, #tpu.memory_space<vmem>>, vector<1x1x32x32xbf16>
    %85 = vector.shape_cast %84 : vector<1x1x32x32xbf16> to vector<32x32xbf16>
    %c0_109 = arith.constant 0 : index
    %c2_110 = arith.constant 2 : index
    %c0_111 = arith.constant 0 : index
    %c0_112 = arith.constant 0 : index
    %86 = vector.load %arg4[%c0_109, %c2_110, %c0_111, %c0_112] : memref<2x4x32x32xbf16, #tpu.memory_space<vmem>>, vector<1x1x32x32xbf16>
    %87 = vector.shape_cast %86 : vector<1x1x32x32xbf16> to vector<32x32xbf16>
    %c0_113 = arith.constant 0 : index
    %c3_114 = arith.constant 3 : index
    %c0_115 = arith.constant 0 : index
    %c0_116 = arith.constant 0 : index
    %88 = vector.load %arg4[%c0_113, %c3_114, %c0_115, %c0_116] : memref<2x4x32x32xbf16, #tpu.memory_space<vmem>>, vector<1x1x32x32xbf16>
    %89 = vector.shape_cast %88 : vector<1x1x32x32xbf16> to vector<32x32xbf16>
    %c1_117 = arith.constant 1 : index
    %c0_118 = arith.constant 0 : index
    %c0_119 = arith.constant 0 : index
    %c0_120 = arith.constant 0 : index
    %90 = vector.load %arg4[%c1_117, %c0_118, %c0_119, %c0_120] : memref<2x4x32x32xbf16, #tpu.memory_space<vmem>>, vector<1x1x32x32xbf16>
    %91 = vector.shape_cast %90 : vector<1x1x32x32xbf16> to vector<32x32xbf16>
    %c1_121 = arith.constant 1 : index
    %c1_122 = arith.constant 1 : index
    %c0_123 = arith.constant 0 : index
    %c0_124 = arith.constant 0 : index
    %92 = vector.load %arg4[%c1_121, %c1_122, %c0_123, %c0_124] : memref<2x4x32x32xbf16, #tpu.memory_space<vmem>>, vector<1x1x32x32xbf16>
    %93 = vector.shape_cast %92 : vector<1x1x32x32xbf16> to vector<32x32xbf16>
    %c1_125 = arith.constant 1 : index
    %c2_126 = arith.constant 2 : index
    %c0_127 = arith.constant 0 : index
    %c0_128 = arith.constant 0 : index
    %94 = vector.load %arg4[%c1_125, %c2_126, %c0_127, %c0_128] : memref<2x4x32x32xbf16, #tpu.memory_space<vmem>>, vector<1x1x32x32xbf16>
    %95 = vector.shape_cast %94 : vector<1x1x32x32xbf16> to vector<32x32xbf16>
    %c1_129 = arith.constant 1 : index
    %c3_130 = arith.constant 3 : index
    %c0_131 = arith.constant 0 : index
    %c0_132 = arith.constant 0 : index
    %96 = vector.load %arg4[%c1_129, %c3_130, %c0_131, %c0_132] : memref<2x4x32x32xbf16, #tpu.memory_space<vmem>>, vector<1x1x32x32xbf16>
    %97 = vector.shape_cast %96 : vector<1x1x32x32xbf16> to vector<32x32xbf16>
    %cst_133 = arith.constant 0.000000e+00 : f32
    %98 = vector.broadcast %cst_133 : f32 to vector<2x32xf32>
    %cst_134 = arith.constant 0.000000e+00 : f32
    %99 = vector.broadcast %cst_134 : f32 to vector<2x32xf32>
    %cst_135 = arith.constant 0.000000e+00 : f32
    %100 = vector.broadcast %cst_135 : f32 to vector<2x32xf32>
    %cst_136 = arith.constant 0.000000e+00 : f32
    %101 = vector.broadcast %cst_136 : f32 to vector<2x32xf32>
    %102 = arith.truncf %98 : vector<2x32xf32> to vector<2x32xbf16>
    %c0_137 = arith.constant 0 : index
    %c0_138 = arith.constant 0 : index
    %c0_139 = arith.constant 0 : index
    %c0_140 = arith.constant 0 : index
    %103 = vector.load %arg10[%c0_137, %c0_138, %c0_139, %c0_140] : memref<2x4x16x32xf32, #tpu.memory_space<vmem>>, vector<1x1x2x32xf32>
    %104 = vector.shape_cast %103 : vector<1x1x2x32xf32> to vector<2x32xf32>
    %cst_141 = arith.constant dense<0.000000e+00> : vector<2x32xf32>
    %105 = tpu.matmul %102, %83, %cst_141 {dimension_numbers = #tpu.dot_dimension_numbers<[1], [0], [0], [1], [0, 0, 1, 1], [], []>} : vector<2x32xbf16>, vector<32x32xbf16>, vector<2x32xf32> -> vector<2x32xf32>
    %106 = arith.addf %104, %105 : vector<2x32xf32>
    %c0_142 = arith.constant 0 : index
    %c1_143 = arith.constant 1 : index
    %c0_144 = arith.constant 0 : index
    %c0_145 = arith.constant 0 : index
    %107 = vector.load %arg10[%c0_142, %c1_143, %c0_144, %c0_145] : memref<2x4x16x32xf32, #tpu.memory_space<vmem>>, vector<1x1x2x32xf32>
    %108 = vector.shape_cast %107 : vector<1x1x2x32xf32> to vector<2x32xf32>
    %cst_146 = arith.constant dense<0.000000e+00> : vector<2x32xf32>
    %109 = tpu.matmul %102, %85, %cst_146 {dimension_numbers = #tpu.dot_dimension_numbers<[1], [0], [0], [1], [0, 0, 1, 1], [], []>} : vector<2x32xbf16>, vector<32x32xbf16>, vector<2x32xf32> -> vector<2x32xf32>
    %110 = arith.addf %108, %109 : vector<2x32xf32>
    %c0_147 = arith.constant 0 : index
    %c2_148 = arith.constant 2 : index
    %c0_149 = arith.constant 0 : index
    %c0_150 = arith.constant 0 : index
    %111 = vector.load %arg10[%c0_147, %c2_148, %c0_149, %c0_150] : memref<2x4x16x32xf32, #tpu.memory_space<vmem>>, vector<1x1x2x32xf32>
    %112 = vector.shape_cast %111 : vector<1x1x2x32xf32> to vector<2x32xf32>
    %cst_151 = arith.constant dense<0.000000e+00> : vector<2x32xf32>
    %113 = tpu.matmul %102, %87, %cst_151 {dimension_numbers = #tpu.dot_dimension_numbers<[1], [0], [0], [1], [0, 0, 1, 1], [], []>} : vector<2x32xbf16>, vector<32x32xbf16>, vector<2x32xf32> -> vector<2x32xf32>
    %114 = arith.addf %112, %113 : vector<2x32xf32>
    %c0_152 = arith.constant 0 : index
    %c3_153 = arith.constant 3 : index
    %c0_154 = arith.constant 0 : index
    %c0_155 = arith.constant 0 : index
    %115 = vector.load %arg10[%c0_152, %c3_153, %c0_154, %c0_155] : memref<2x4x16x32xf32, #tpu.memory_space<vmem>>, vector<1x1x2x32xf32>
    %116 = vector.shape_cast %115 : vector<1x1x2x32xf32> to vector<2x32xf32>
    %cst_156 = arith.constant dense<0.000000e+00> : vector<2x32xf32>
    %117 = tpu.matmul %102, %89, %cst_156 {dimension_numbers = #tpu.dot_dimension_numbers<[1], [0], [0], [1], [0, 0, 1, 1], [], []>} : vector<2x32xbf16>, vector<32x32xbf16>, vector<2x32xf32> -> vector<2x32xf32>
    %118 = arith.addf %116, %117 : vector<2x32xf32>
    %119 = arith.negf %106 : vector<2x32xf32>
    %120 = math.exp %119 : vector<2x32xf32>
    %cst_157 = arith.constant 1.000000e+00 : f32
    %121 = vector.broadcast %cst_157 : f32 to vector<2x32xf32>
    %122 = arith.addf %121, %120 : vector<2x32xf32>
    %123 = arith.divf %121, %122 : vector<2x32xf32>
    %124 = arith.negf %110 : vector<2x32xf32>
    %125 = math.exp %124 : vector<2x32xf32>
    %cst_158 = arith.constant 1.000000e+00 : f32
    %126 = vector.broadcast %cst_158 : f32 to vector<2x32xf32>
    %127 = arith.addf %126, %125 : vector<2x32xf32>
    %128 = arith.divf %126, %127 : vector<2x32xf32>
    %129 = math.tanh %114 : vector<2x32xf32>
    %130 = arith.negf %118 : vector<2x32xf32>
    %131 = math.exp %130 : vector<2x32xf32>
    %cst_159 = arith.constant 1.000000e+00 : f32
    %132 = vector.broadcast %cst_159 : f32 to vector<2x32xf32>
    %133 = arith.addf %132, %131 : vector<2x32xf32>
    %134 = arith.divf %132, %133 : vector<2x32xf32>
    %135 = arith.mulf %128, %100 : vector<2x32xf32>
    %136 = arith.mulf %123, %129 : vector<2x32xf32>
    %137 = arith.addf %135, %136 : vector<2x32xf32>
    %138 = math.tanh %137 : vector<2x32xf32>
    %139 = arith.mulf %134, %138 : vector<2x32xf32>
    %c0_160 = arith.constant 0 : index
    %c0_161 = arith.constant 0 : index
    %c0_162 = arith.constant 0 : index
    %140 = vector.load %arg11[%c0_160, %c0_161, %c0_162] : memref<2x8x64xf32, #tpu.memory_space<vmem>>, vector<2x1x32xf32>
    %141 = vector.shape_cast %140 : vector<2x1x32xf32> to vector<2x32xf32>
    %142 = vector.shape_cast %139 : vector<2x32xf32> to vector<2x1x32xf32>
    tpu.vector_store %arg11[%c0_160, %c0_161, %c0_162], %142 {strides = array<i32>} : memref<2x8x64xf32, #tpu.memory_space<vmem>>, vector<2x1x32xf32>,
    %143 = arith.truncf %99 : vector<2x32xf32> to vector<2x32xbf16>
    %c1_163 = arith.constant 1 : index
    %c0_164 = arith.constant 0 : index
    %c14 = arith.constant 14 : index
    %c0_165 = arith.constant 0 : index
    %144 = vector.load %arg10[%c1_163, %c0_164, %c14, %c0_165] : memref<2x4x16x32xf32, #tpu.memory_space<vmem>>, vector<1x1x2x32xf32>
    %145 = vector.shape_cast %144 : vector<1x1x2x32xf32> to vector<2x32xf32>
    %cst_166 = arith.constant dense<0.000000e+00> : vector<2x32xf32>
    %146 = tpu.matmul %143, %91, %cst_166 {dimension_numbers = #tpu.dot_dimension_numbers<[1], [0], [0], [1], [0, 0, 1, 1], [], []>} : vector<2x32xbf16>, vector<32x32xbf16>, vector<2x32xf32> -> vector<2x32xf32>
    %147 = arith.addf %145, %146 : vector<2x32xf32>
    %c1_167 = arith.constant 1 : index
    %c1_168 = arith.constant 1 : index
    %c14_169 = arith.constant 14 : index
    %c0_170 = arith.constant 0 : index
    %148 = vector.load %arg10[%c1_167, %c1_168, %c14_169, %c0_170] : memref<2x4x16x32xf32, #tpu.memory_space<vmem>>, vector<1x1x2x32xf32>
    %149 = vector.shape_cast %148 : vector<1x1x2x32xf32> to vector<2x32xf32>
    %cst_171 = arith.constant dense<0.000000e+00> : vector<2x32xf32>
    %150 = tpu.matmul %143, %93, %cst_171 {dimension_numbers = #tpu.dot_dimension_numbers<[1], [0], [0], [1], [0, 0, 1, 1], [], []>} : vector<2x32xbf16>, vector<32x32xbf16>, vector<2x32xf32> -> vector<2x32xf32>
    %151 = arith.addf %149, %150 : vector<2x32xf32>
    %c1_172 = arith.constant 1 : index
    %c2_173 = arith.constant 2 : index
    %c14_174 = arith.constant 14 : index
    %c0_175 = arith.constant 0 : index
    %152 = vector.load %arg10[%c1_172, %c2_173, %c14_174, %c0_175] : memref<2x4x16x32xf32, #tpu.memory_space<vmem>>, vector<1x1x2x32xf32>
    %153 = vector.shape_cast %152 : vector<1x1x2x32xf32> to vector<2x32xf32>
    %cst_176 = arith.constant dense<0.000000e+00> : vector<2x32xf32>
    %154 = tpu.matmul %143, %95, %cst_176 {dimension_numbers = #tpu.dot_dimension_numbers<[1], [0], [0], [1], [0, 0, 1, 1], [], []>} : vector<2x32xbf16>, vector<32x32xbf16>, vector<2x32xf32> -> vector<2x32xf32>
    %155 = arith.addf %153, %154 : vector<2x32xf32>
    %c1_177 = arith.constant 1 : index
    %c3_178 = arith.constant 3 : index
    %c14_179 = arith.constant 14 : index
    %c0_180 = arith.constant 0 : index
    %156 = vector.load %arg10[%c1_177, %c3_178, %c14_179, %c0_180] : memref<2x4x16x32xf32, #tpu.memory_space<vmem>>, vector<1x1x2x32xf32>
    %157 = vector.shape_cast %156 : vector<1x1x2x32xf32> to vector<2x32xf32>
    %cst_181 = arith.constant dense<0.000000e+00> : vector<2x32xf32>
    %158 = tpu.matmul %143, %97, %cst_181 {dimension_numbers = #tpu.dot_dimension_numbers<[1], [0], [0], [1], [0, 0, 1, 1], [], []>} : vector<2x32xbf16>, vector<32x32xbf16>, vector<2x32xf32> -> vector<2x32xf32>
    %159 = arith.addf %157, %158 : vector<2x32xf32>
    %160 = arith.negf %147 : vector<2x32xf32>
    %161 = math.exp %160 : vector<2x32xf32>
    %cst_182 = arith.constant 1.000000e+00 : f32
    %162 = vector.broadcast %cst_182 : f32 to vector<2x32xf32>
    %163 = arith.addf %162, %161 : vector<2x32xf32>
    %164 = arith.divf %162, %163 : vector<2x32xf32>
    %165 = arith.negf %151 : vector<2x32xf32>
    %166 = math.exp %165 : vector<2x32xf32>
    %cst_183 = arith.constant 1.000000e+00 : f32
    %167 = vector.broadcast %cst_183 : f32 to vector<2x32xf32>
    %168 = arith.addf %167, %166 : vector<2x32xf32>
    %169 = arith.divf %167, %168 : vector<2x32xf32>
    %170 = math.tanh %155 : vector<2x32xf32>
    %171 = arith.negf %159 : vector<2x32xf32>
    %172 = math.exp %171 : vector<2x32xf32>
    %cst_184 = arith.constant 1.000000e+00 : f32
    %173 = vector.broadcast %cst_184 : f32 to vector<2x32xf32>
    %174 = arith.addf %173, %172 : vector<2x32xf32>
    %175 = arith.divf %173, %174 : vector<2x32xf32>
    %176 = arith.mulf %169, %101 : vector<2x32xf32>
    %177 = arith.mulf %164, %170 : vector<2x32xf32>
    %178 = arith.addf %176, %177 : vector<2x32xf32>
    %179 = math.tanh %178 : vector<2x32xf32>
    %180 = arith.mulf %175, %179 : vector<2x32xf32>
    %c0_185 = arith.constant 0 : index
    %c7 = arith.constant 7 : index
    %c32 = arith.constant 32 : index
    %181 = vector.load %arg11[%c0_185, %c7, %c32] : memref<2x8x64xf32, #tpu.memory_space<vmem>>, vector<2x1x32xf32>
    %182 = vector.shape_cast %181 : vector<2x1x32xf32> to vector<2x32xf32>
    %183 = vector.shape_cast %180 : vector<2x32xf32> to vector<2x1x32xf32>
    tpu.vector_store %arg11[%c0_185, %c7, %c32], %183 {strides = array<i32>} : memref<2x8x64xf32, #tpu.memory_space<vmem>>, vector<2x1x32xf32>,
    %184 = arith.truncf %139 : vector<2x32xf32> to vector<2x32xbf16>
    %c0_186 = arith.constant 0 : index
    %c0_187 = arith.constant 0 : index
    %c2_188 = arith.constant 2 : index
    %c0_189 = arith.constant 0 : index
    %185 = vector.load %arg10[%c0_186, %c0_187, %c2_188, %c0_189] : memref<2x4x16x32xf32, #tpu.memory_space<vmem>>, vector<1x1x2x32xf32>
    %186 = vector.shape_cast %185 : vector<1x1x2x32xf32> to vector<2x32xf32>
    %cst_190 = arith.constant dense<0.000000e+00> : vector<2x32xf32>
    %187 = tpu.matmul %184, %83, %cst_190 {dimension_numbers = #tpu.dot_dimension_numbers<[1], [0], [0], [1], [0, 0, 1, 1], [], []>} : vector<2x32xbf16>, vector<32x32xbf16>, vector<2x32xf32> -> vector<2x32xf32>
    %188 = arith.addf %186, %187 : vector<2x32xf32>
    %c0_191 = arith.constant 0 : index
    %c1_192 = arith.constant 1 : index
    %c2_193 = arith.constant 2 : index
    %c0_194 = arith.constant 0 : index
    %189 = vector.load %arg10[%c0_191, %c1_192, %c2_193, %c0_194] : memref<2x4x16x32xf32, #tpu.memory_space<vmem>>, vector<1x1x2x32xf32>
    %190 = vector.shape_cast %189 : vector<1x1x2x32xf32> to vector<2x32xf32>
    %cst_195 = arith.constant dense<0.000000e+00> : vector<2x32xf32>
    %191 = tpu.matmul %184, %85, %cst_195 {dimension_numbers = #tpu.dot_dimension_numbers<[1], [0], [0], [1], [0, 0, 1, 1], [], []>} : vector<2x32xbf16>, vector<32x32xbf16>, vector<2x32xf32> -> vector<2x32xf32>
    %192 = arith.addf %190, %191 : vector<2x32xf32>
    %c0_196 = arith.constant 0 : index
    %c2_197 = arith.constant 2 : index
    %c2_198 = arith.constant 2 : index
    %c0_199 = arith.constant 0 : index
    %193 = vector.load %arg10[%c0_196, %c2_197, %c2_198, %c0_199] : memref<2x4x16x32xf32, #tpu.memory_space<vmem>>, vector<1x1x2x32xf32>
    %194 = vector.shape_cast %193 : vector<1x1x2x32xf32> to vector<2x32xf32>
    %cst_200 = arith.constant dense<0.000000e+00> : vector<2x32xf32>
    %195 = tpu.matmul %184, %87, %cst_200 {dimension_numbers = #tpu.dot_dimension_numbers<[1], [0], [0], [1], [0, 0, 1, 1], [], []>} : vector<2x32xbf16>, vector<32x32xbf16>, vector<2x32xf32> -> vector<2x32xf32>
    %196 = arith.addf %194, %195 : vector<2x32xf32>
    %c0_201 = arith.constant 0 : index
    %c3_202 = arith.constant 3 : index
    %c2_203 = arith.constant 2 : index
    %c0_204 = arith.constant 0 : index
    %197 = vector.load %arg10[%c0_201, %c3_202, %c2_203, %c0_204] : memref<2x4x16x32xf32, #tpu.memory_space<vmem>>, vector<1x1x2x32xf32>
    %198 = vector.shape_cast %197 : vector<1x1x2x32xf32> to vector<2x32xf32>
    %cst_205 = arith.constant dense<0.000000e+00> : vector<2x32xf32>
    %199 = tpu.matmul %184, %89, %cst_205 {dimension_numbers = #tpu.dot_dimension_numbers<[1], [0], [0], [1], [0, 0, 1, 1], [], []>} : vector<2x32xbf16>, vector<32x32xbf16>, vector<2x32xf32> -> vector<2x32xf32>
    %200 = arith.addf %198, %199 : vector<2x32xf32>
    %201 = arith.negf %188 : vector<2x32xf32>
    %202 = math.exp %201 : vector<2x32xf32>
    %cst_206 = arith.constant 1.000000e+00 : f32
    %203 = vector.broadcast %cst_206 : f32 to vector<2x32xf32>
    %204 = arith.addf %203, %202 : vector<2x32xf32>
    %205 = arith.divf %203, %204 : vector<2x32xf32>
    %206 = arith.negf %192 : vector<2x32xf32>
    %207 = math.exp %206 : vector<2x32xf32>
    %cst_207 = arith.constant 1.000000e+00 : f32
    %208 = vector.broadcast %cst_207 : f32 to vector<2x32xf32>
    %209 = arith.addf %208, %207 : vector<2x32xf32>
    %210 = arith.divf %208, %209 : vector<2x32xf32>
    %211 = math.tanh %196 : vector<2x32xf32>
    %212 = arith.negf %200 : vector<2x32xf32>
    %213 = math.exp %212 : vector<2x32xf32>
    %cst_208 = arith.constant 1.000000e+00 : f32
    %214 = vector.broadcast %cst_208 : f32 to vector<2x32xf32>
    %215 = arith.addf %214, %213 : vector<2x32xf32>
    %216 = arith.divf %214, %215 : vector<2x32xf32>
    %217 = arith.mulf %210, %137 : vector<2x32xf32>
    %218 = arith.mulf %205, %211 : vector<2x32xf32>
    %219 = arith.addf %217, %218 : vector<2x32xf32>
    %220 = math.tanh %219 : vector<2x32xf32>
    %221 = arith.mulf %216, %220 : vector<2x32xf32>
    %c0_209 = arith.constant 0 : index
    %c1_210 = arith.constant 1 : index
    %c0_211 = arith.constant 0 : index
    %222 = vector.load %arg11[%c0_209, %c1_210, %c0_211] : memref<2x8x64xf32, #tpu.memory_space<vmem>>, vector<2x1x32xf32>
    %223 = vector.shape_cast %222 : vector<2x1x32xf32> to vector<2x32xf32>
    %224 = vector.shape_cast %221 : vector<2x32xf32> to vector<2x1x32xf32>
    tpu.vector_store %arg11[%c0_209, %c1_210, %c0_211], %224 {strides = array<i32>} : memref<2x8x64xf32, #tpu.memory_space<vmem>>, vector<2x1x32xf32>,
    %225 = arith.truncf %180 : vector<2x32xf32> to vector<2x32xbf16>
    %c1_212 = arith.constant 1 : index
    %c0_213 = arith.constant 0 : index
    %c12 = arith.constant 12 : index
    %c0_214 = arith.constant 0 : index
    %226 = vector.load %arg10[%c1_212, %c0_213, %c12, %c0_214] : memref<2x4x16x32xf32, #tpu.memory_space<vmem>>, vector<1x1x2x32xf32>
    %227 = vector.shape_cast %226 : vector<1x1x2x32xf32> to vector<2x32xf32>
    %cst_215 = arith.constant dense<0.000000e+00> : vector<2x32xf32>
    %228 = tpu.matmul %225, %91, %cst_215 {dimension_numbers = #tpu.dot_dimension_numbers<[1], [0], [0], [1], [0, 0, 1, 1], [], []>} : vector<2x32xbf16>, vector<32x32xbf16>, vector<2x32xf32> -> vector<2x32xf32>
    %229 = arith.addf %227, %228 : vector<2x32xf32>
    %c1_216 = arith.constant 1 : index
    %c1_217 = arith.constant 1 : index
    %c12_218 = arith.constant 12 : index
    %c0_219 = arith.constant 0 : index
    %230 = vector.load %arg10[%c1_216, %c1_217, %c12_218, %c0_219] : memref<2x4x16x32xf32, #tpu.memory_space<vmem>>, vector<1x1x2x32xf32>
    %231 = vector.shape_cast %230 : vector<1x1x2x32xf32> to vector<2x32xf32>
    %cst_220 = arith.constant dense<0.000000e+00> : vector<2x32xf32>
    %232 = tpu.matmul %225, %93, %cst_220 {dimension_numbers = #tpu.dot_dimension_numbers<[1], [0], [0], [1], [0, 0, 1, 1], [], []>} : vector<2x32xbf16>, vector<32x32xbf16>, vector<2x32xf32> -> vector<2x32xf32>
    %233 = arith.addf %231, %232 : vector<2x32xf32>
    %c1_221 = arith.constant 1 : index
    %c2_222 = arith.constant 2 : index
    %c12_223 = arith.constant 12 : index
    %c0_224 = arith.constant 0 : index
    %234 = vector.load %arg10[%c1_221, %c2_222, %c12_223, %c0_224] : memref<2x4x16x32xf32, #tpu.memory_space<vmem>>, vector<1x1x2x32xf32>
    %235 = vector.shape_cast %234 : vector<1x1x2x32xf32> to vector<2x32xf32>
    %cst_225 = arith.constant dense<0.000000e+00> : vector<2x32xf32>
    %236 = tpu.matmul %225, %95, %cst_225 {dimension_numbers = #tpu.dot_dimension_numbers<[1], [0], [0], [1], [0, 0, 1, 1], [], []>} : vector<2x32xbf16>, vector<32x32xbf16>, vector<2x32xf32> -> vector<2x32xf32>
    %237 = arith.addf %235, %236 : vector<2x32xf32>
    %c1_226 = arith.constant 1 : index
    %c3_227 = arith.constant 3 : index
    %c12_228 = arith.constant 12 : index
    %c0_229 = arith.constant 0 : index
    %238 = vector.load %arg10[%c1_226, %c3_227, %c12_228, %c0_229] : memref<2x4x16x32xf32, #tpu.memory_space<vmem>>, vector<1x1x2x32xf32>
    %239 = vector.shape_cast %238 : vector<1x1x2x32xf32> to vector<2x32xf32>
    %cst_230 = arith.constant dense<0.000000e+00> : vector<2x32xf32>
    %240 = tpu.matmul %225, %97, %cst_230 {dimension_numbers = #tpu.dot_dimension_numbers<[1], [0], [0], [1], [0, 0, 1, 1], [], []>} : vector<2x32xbf16>, vector<32x32xbf16>, vector<2x32xf32> -> vector<2x32xf32>
    %241 = arith.addf %239, %240 : vector<2x32xf32>
    %242 = arith.negf %229 : vector<2x32xf32>
    %243 = math.exp %242 : vector<2x32xf32>
    %cst_231 = arith.constant 1.000000e+00 : f32
    %244 = vector.broadcast %cst_231 : f32 to vector<2x32xf32>
    %245 = arith.addf %244, %243 : vector<2x32xf32>
    %246 = arith.divf %244, %245 : vector<2x32xf32>
    %247 = arith.negf %233 : vector<2x32xf32>
    %248 = math.exp %247 : vector<2x32xf32>
    %cst_232 = arith.constant 1.000000e+00 : f32
    %249 = vector.broadcast %cst_232 : f32 to vector<2x32xf32>
    %250 = arith.addf %249, %248 : vector<2x32xf32>
    %251 = arith.divf %249, %250 : vector<2x32xf32>
    %252 = math.tanh %237 : vector<2x32xf32>
    %253 = arith.negf %241 : vector<2x32xf32>
    %254 = math.exp %253 : vector<2x32xf32>
    %cst_233 = arith.constant 1.000000e+00 : f32
    %255 = vector.broadcast %cst_233 : f32 to vector<2x32xf32>
    %256 = arith.addf %255, %254 : vector<2x32xf32>
    %257 = arith.divf %255, %256 : vector<2x32xf32>
    %258 = arith.mulf %251, %178 : vector<2x32xf32>
    %259 = arith.mulf %246, %252 : vector<2x32xf32>
    %260 = arith.addf %258, %259 : vector<2x32xf32>
    %261 = math.tanh %260 : vector<2x32xf32>
    %262 = arith.mulf %257, %261 : vector<2x32xf32>
    %c0_234 = arith.constant 0 : index
    %c6 = arith.constant 6 : index
    %c32_235 = arith.constant 32 : index
    %263 = vector.load %arg11[%c0_234, %c6, %c32_235] : memref<2x8x64xf32, #tpu.memory_space<vmem>>, vector<2x1x32xf32>
    %264 = vector.shape_cast %263 : vector<2x1x32xf32> to vector<2x32xf32>
    %265 = vector.shape_cast %262 : vector<2x32xf32> to vector<2x1x32xf32>
    tpu.vector_store %arg11[%c0_234, %c6, %c32_235], %265 {strides = array<i32>} : memref<2x8x64xf32, #tpu.memory_space<vmem>>, vector<2x1x32xf32>,
    %266 = arith.truncf %221 : vector<2x32xf32> to vector<2x32xbf16>
    %c0_236 = arith.constant 0 : index
    %c0_237 = arith.constant 0 : index
    %c4 = arith.constant 4 : index
    %c0_238 = arith.constant 0 : index
    %267 = vector.load %arg10[%c0_236, %c0_237, %c4, %c0_238] : memref<2x4x16x32xf32, #tpu.memory_space<vmem>>, vector<1x1x2x32xf32>
    %268 = vector.shape_cast %267 : vector<1x1x2x32xf32> to vector<2x32xf32>
    %cst_239 = arith.constant dense<0.000000e+00> : vector<2x32xf32>
    %269 = tpu.matmul %266, %83, %cst_239 {dimension_numbers = #tpu.dot_dimension_numbers<[1], [0], [0], [1], [0, 0, 1, 1], [], []>} : vector<2x32xbf16>, vector<32x32xbf16>, vector<2x32xf32> -> vector<2x32xf32>
    %270 = arith.addf %268, %269 : vector<2x32xf32>
    %c0_240 = arith.constant 0 : index
    %c1_241 = arith.constant 1 : index
    %c4_242 = arith.constant 4 : index
    %c0_243 = arith.constant 0 : index
    %271 = vector.load %arg10[%c0_240, %c1_241, %c4_242, %c0_243] : memref<2x4x16x32xf32, #tpu.memory_space<vmem>>, vector<1x1x2x32xf32>
    %272 = vector.shape_cast %271 : vector<1x1x2x32xf32> to vector<2x32xf32>
    %cst_244 = arith.constant dense<0.000000e+00> : vector<2x32xf32>
    %273 = tpu.matmul %266, %85, %cst_244 {dimension_numbers = #tpu.dot_dimension_numbers<[1], [0], [0], [1], [0, 0, 1, 1], [], []>} : vector<2x32xbf16>, vector<32x32xbf16>, vector<2x32xf32> -> vector<2x32xf32>
    %274 = arith.addf %272, %273 : vector<2x32xf32>
    %c0_245 = arith.constant 0 : index
    %c2_246 = arith.constant 2 : index
    %c4_247 = arith.constant 4 : index
    %c0_248 = arith.constant 0 : index
    %275 = vector.load %arg10[%c0_245, %c2_246, %c4_247, %c0_248] : memref<2x4x16x32xf32, #tpu.memory_space<vmem>>, vector<1x1x2x32xf32>
    %276 = vector.shape_cast %275 : vector<1x1x2x32xf32> to vector<2x32xf32>
    %cst_249 = arith.constant dense<0.000000e+00> : vector<2x32xf32>
    %277 = tpu.matmul %266, %87, %cst_249 {dimension_numbers = #tpu.dot_dimension_numbers<[1], [0], [0], [1], [0, 0, 1, 1], [], []>} : vector<2x32xbf16>, vector<32x32xbf16>, vector<2x32xf32> -> vector<2x32xf32>
    %278 = arith.addf %276, %277 : vector<2x32xf32>
    %c0_250 = arith.constant 0 : index
    %c3_251 = arith.constant 3 : index
    %c4_252 = arith.constant 4 : index
    %c0_253 = arith.constant 0 : index
    %279 = vector.load %arg10[%c0_250, %c3_251, %c4_252, %c0_253] : memref<2x4x16x32xf32, #tpu.memory_space<vmem>>, vector<1x1x2x32xf32>
    %280 = vector.shape_cast %279 : vector<1x1x2x32xf32> to vector<2x32xf32>
    %cst_254 = arith.constant dense<0.000000e+00> : vector<2x32xf32>
    %281 = tpu.matmul %266, %89, %cst_254 {dimension_numbers = #tpu.dot_dimension_numbers<[1], [0], [0], [1], [0, 0, 1, 1], [], []>} : vector<2x32xbf16>, vector<32x32xbf16>, vector<2x32xf32> -> vector<2x32xf32>
    %282 = arith.addf %280, %281 : vector<2x32xf32>
    %283 = arith.negf %270 : vector<2x32xf32>
    %284 = math.exp %283 : vector<2x32xf32>
    %cst_255 = arith.constant 1.000000e+00 : f32
    %285 = vector.broadcast %cst_255 : f32 to vector<2x32xf32>
    %286 = arith.addf %285, %284 : vector<2x32xf32>
    %287 = arith.divf %285, %286 : vector<2x32xf32>
    %288 = arith.negf %274 : vector<2x32xf32>
    %289 = math.exp %288 : vector<2x32xf32>
    %cst_256 = arith.constant 1.000000e+00 : f32
    %290 = vector.broadcast %cst_256 : f32 to vector<2x32xf32>
    %291 = arith.addf %290, %289 : vector<2x32xf32>
    %292 = arith.divf %290, %291 : vector<2x32xf32>
    %293 = math.tanh %278 : vector<2x32xf32>
    %294 = arith.negf %282 : vector<2x32xf32>
    %295 = math.exp %294 : vector<2x32xf32>
    %cst_257 = arith.constant 1.000000e+00 : f32
    %296 = vector.broadcast %cst_257 : f32 to vector<2x32xf32>
    %297 = arith.addf %296, %295 : vector<2x32xf32>
    %298 = arith.divf %296, %297 : vector<2x32xf32>
    %299 = arith.mulf %292, %219 : vector<2x32xf32>
    %300 = arith.mulf %287, %293 : vector<2x32xf32>
    %301 = arith.addf %299, %300 : vector<2x32xf32>
    %302 = math.tanh %301 : vector<2x32xf32>
    %303 = arith.mulf %298, %302 : vector<2x32xf32>
    %c0_258 = arith.constant 0 : index
    %c2_259 = arith.constant 2 : index
    %c0_260 = arith.constant 0 : index
    %304 = vector.load %arg11[%c0_258, %c2_259, %c0_260] : memref<2x8x64xf32, #tpu.memory_space<vmem>>, vector<2x1x32xf32>
    %305 = vector.shape_cast %304 : vector<2x1x32xf32> to vector<2x32xf32>
    %306 = vector.shape_cast %303 : vector<2x32xf32> to vector<2x1x32xf32>
    tpu.vector_store %arg11[%c0_258, %c2_259, %c0_260], %306 {strides = array<i32>} : memref<2x8x64xf32, #tpu.memory_space<vmem>>, vector<2x1x32xf32>,
    %307 = arith.truncf %262 : vector<2x32xf32> to vector<2x32xbf16>
    %c1_261 = arith.constant 1 : index
    %c0_262 = arith.constant 0 : index
    %c10 = arith.constant 10 : index
    %c0_263 = arith.constant 0 : index
    %308 = vector.load %arg10[%c1_261, %c0_262, %c10, %c0_263] : memref<2x4x16x32xf32, #tpu.memory_space<vmem>>, vector<1x1x2x32xf32>
    %309 = vector.shape_cast %308 : vector<1x1x2x32xf32> to vector<2x32xf32>
    %cst_264 = arith.constant dense<0.000000e+00> : vector<2x32xf32>
    %310 = tpu.matmul %307, %91, %cst_264 {dimension_numbers = #tpu.dot_dimension_numbers<[1], [0], [0], [1], [0, 0, 1, 1], [], []>} : vector<2x32xbf16>, vector<32x32xbf16>, vector<2x32xf32> -> vector<2x32xf32>
    %311 = arith.addf %309, %310 : vector<2x32xf32>
    %c1_265 = arith.constant 1 : index
    %c1_266 = arith.constant 1 : index
    %c10_267 = arith.constant 10 : index
    %c0_268 = arith.constant 0 : index
    %312 = vector.load %arg10[%c1_265, %c1_266, %c10_267, %c0_268] : memref<2x4x16x32xf32, #tpu.memory_space<vmem>>, vector<1x1x2x32xf32>
    %313 = vector.shape_cast %312 : vector<1x1x2x32xf32> to vector<2x32xf32>
    %cst_269 = arith.constant dense<0.000000e+00> : vector<2x32xf32>
    %314 = tpu.matmul %307, %93, %cst_269 {dimension_numbers = #tpu.dot_dimension_numbers<[1], [0], [0], [1], [0, 0, 1, 1], [], []>} : vector<2x32xbf16>, vector<32x32xbf16>, vector<2x32xf32> -> vector<2x32xf32>
    %315 = arith.addf %313, %314 : vector<2x32xf32>
    %c1_270 = arith.constant 1 : index
    %c2_271 = arith.constant 2 : index
    %c10_272 = arith.constant 10 : index
    %c0_273 = arith.constant 0 : index
    %316 = vector.load %arg10[%c1_270, %c2_271, %c10_272, %c0_273] : memref<2x4x16x32xf32, #tpu.memory_space<vmem>>, vector<1x1x2x32xf32>
    %317 = vector.shape_cast %316 : vector<1x1x2x32xf32> to vector<2x32xf32>
    %cst_274 = arith.constant dense<0.000000e+00> : vector<2x32xf32>
    %318 = tpu.matmul %307, %95, %cst_274 {dimension_numbers = #tpu.dot_dimension_numbers<[1], [0], [0], [1], [0, 0, 1, 1], [], []>} : vector<2x32xbf16>, vector<32x32xbf16>, vector<2x32xf32> -> vector<2x32xf32>
    %319 = arith.addf %317, %318 : vector<2x32xf32>
    %c1_275 = arith.constant 1 : index
    %c3_276 = arith.constant 3 : index
    %c10_277 = arith.constant 10 : index
    %c0_278 = arith.constant 0 : index
    %320 = vector.load %arg10[%c1_275, %c3_276, %c10_277, %c0_278] : memref<2x4x16x32xf32, #tpu.memory_space<vmem>>, vector<1x1x2x32xf32>
    %321 = vector.shape_cast %320 : vector<1x1x2x32xf32> to vector<2x32xf32>
    %cst_279 = arith.constant dense<0.000000e+00> : vector<2x32xf32>
    %322 = tpu.matmul %307, %97, %cst_279 {dimension_numbers = #tpu.dot_dimension_numbers<[1], [0], [0], [1], [0, 0, 1, 1], [], []>} : vector<2x32xbf16>, vector<32x32xbf16>, vector<2x32xf32> -> vector<2x32xf32>
    %323 = arith.addf %321, %322 : vector<2x32xf32>
    %324 = arith.negf %311 : vector<2x32xf32>
    %325 = math.exp %324 : vector<2x32xf32>
    %cst_280 = arith.constant 1.000000e+00 : f32
    %326 = vector.broadcast %cst_280 : f32 to vector<2x32xf32>
    %327 = arith.addf %326, %325 : vector<2x32xf32>
    %328 = arith.divf %326, %327 : vector<2x32xf32>
    %329 = arith.negf %315 : vector<2x32xf32>
    %330 = math.exp %329 : vector<2x32xf32>
    %cst_281 = arith.constant 1.000000e+00 : f32
    %331 = vector.broadcast %cst_281 : f32 to vector<2x32xf32>
    %332 = arith.addf %331, %330 : vector<2x32xf32>
    %333 = arith.divf %331, %332 : vector<2x32xf32>
    %334 = math.tanh %319 : vector<2x32xf32>
    %335 = arith.negf %323 : vector<2x32xf32>
    %336 = math.exp %335 : vector<2x32xf32>
    %cst_282 = arith.constant 1.000000e+00 : f32
    %337 = vector.broadcast %cst_282 : f32 to vector<2x32xf32>
    %338 = arith.addf %337, %336 : vector<2x32xf32>
    %339 = arith.divf %337, %338 : vector<2x32xf32>
    %340 = arith.mulf %333, %260 : vector<2x32xf32>
    %341 = arith.mulf %328, %334 : vector<2x32xf32>
    %342 = arith.addf %340, %341 : vector<2x32xf32>
    %343 = math.tanh %342 : vector<2x32xf32>
    %344 = arith.mulf %339, %343 : vector<2x32xf32>
    %c0_283 = arith.constant 0 : index
    %c5 = arith.constant 5 : index
    %c32_284 = arith.constant 32 : index
    %345 = vector.load %arg11[%c0_283, %c5, %c32_284] : memref<2x8x64xf32, #tpu.memory_space<vmem>>, vector<2x1x32xf32>
    %346 = vector.shape_cast %345 : vector<2x1x32xf32> to vector<2x32xf32>
    %347 = vector.shape_cast %344 : vector<2x32xf32> to vector<2x1x32xf32>
    tpu.vector_store %arg11[%c0_283, %c5, %c32_284], %347 {strides = array<i32>} : memref<2x8x64xf32, #tpu.memory_space<vmem>>, vector<2x1x32xf32>,
    %348 = arith.truncf %303 : vector<2x32xf32> to vector<2x32xbf16>
    %c0_285 = arith.constant 0 : index
    %c0_286 = arith.constant 0 : index
    %c6_287 = arith.constant 6 : index
    %c0_288 = arith.constant 0 : index
    %349 = vector.load %arg10[%c0_285, %c0_286, %c6_287, %c0_288] : memref<2x4x16x32xf32, #tpu.memory_space<vmem>>, vector<1x1x2x32xf32>
    %350 = vector.shape_cast %349 : vector<1x1x2x32xf32> to vector<2x32xf32>
    %cst_289 = arith.constant dense<0.000000e+00> : vector<2x32xf32>
    %351 = tpu.matmul %348, %83, %cst_289 {dimension_numbers = #tpu.dot_dimension_numbers<[1], [0], [0], [1], [0, 0, 1, 1], [], []>} : vector<2x32xbf16>, vector<32x32xbf16>, vector<2x32xf32> -> vector<2x32xf32>
    %352 = arith.addf %350, %351 : vector<2x32xf32>
    %c0_290 = arith.constant 0 : index
    %c1_291 = arith.constant 1 : index
    %c6_292 = arith.constant 6 : index
    %c0_293 = arith.constant 0 : index
    %353 = vector.load %arg10[%c0_290, %c1_291, %c6_292, %c0_293] : memref<2x4x16x32xf32, #tpu.memory_space<vmem>>, vector<1x1x2x32xf32>
    %354 = vector.shape_cast %353 : vector<1x1x2x32xf32> to vector<2x32xf32>
    %cst_294 = arith.constant dense<0.000000e+00> : vector<2x32xf32>
    %355 = tpu.matmul %348, %85, %cst_294 {dimension_numbers = #tpu.dot_dimension_numbers<[1], [0], [0], [1], [0, 0, 1, 1], [], []>} : vector<2x32xbf16>, vector<32x32xbf16>, vector<2x32xf32> -> vector<2x32xf32>
    %356 = arith.addf %354, %355 : vector<2x32xf32>
    %c0_295 = arith.constant 0 : index
    %c2_296 = arith.constant 2 : index
    %c6_297 = arith.constant 6 : index
    %c0_298 = arith.constant 0 : index
    %357 = vector.load %arg10[%c0_295, %c2_296, %c6_297, %c0_298] : memref<2x4x16x32xf32, #tpu.memory_space<vmem>>, vector<1x1x2x32xf32>
    %358 = vector.shape_cast %357 : vector<1x1x2x32xf32> to vector<2x32xf32>
    %cst_299 = arith.constant dense<0.000000e+00> : vector<2x32xf32>
    %359 = tpu.matmul %348, %87, %cst_299 {dimension_numbers = #tpu.dot_dimension_numbers<[1], [0], [0], [1], [0, 0, 1, 1], [], []>} : vector<2x32xbf16>, vector<32x32xbf16>, vector<2x32xf32> -> vector<2x32xf32>
    %360 = arith.addf %358, %359 : vector<2x32xf32>
    %c0_300 = arith.constant 0 : index
    %c3_301 = arith.constant 3 : index
    %c6_302 = arith.constant 6 : index
    %c0_303 = arith.constant 0 : index
    %361 = vector.load %arg10[%c0_300, %c3_301, %c6_302, %c0_303] : memref<2x4x16x32xf32, #tpu.memory_space<vmem>>, vector<1x1x2x32xf32>
    %362 = vector.shape_cast %361 : vector<1x1x2x32xf32> to vector<2x32xf32>
    %cst_304 = arith.constant dense<0.000000e+00> : vector<2x32xf32>
    %363 = tpu.matmul %348, %89, %cst_304 {dimension_numbers = #tpu.dot_dimension_numbers<[1], [0], [0], [1], [0, 0, 1, 1], [], []>} : vector<2x32xbf16>, vector<32x32xbf16>, vector<2x32xf32> -> vector<2x32xf32>
    %364 = arith.addf %362, %363 : vector<2x32xf32>
    %365 = arith.negf %352 : vector<2x32xf32>
    %366 = math.exp %365 : vector<2x32xf32>
    %cst_305 = arith.constant 1.000000e+00 : f32
    %367 = vector.broadcast %cst_305 : f32 to vector<2x32xf32>
    %368 = arith.addf %367, %366 : vector<2x32xf32>
    %369 = arith.divf %367, %368 : vector<2x32xf32>
    %370 = arith.negf %356 : vector<2x32xf32>
    %371 = math.exp %370 : vector<2x32xf32>
    %cst_306 = arith.constant 1.000000e+00 : f32
    %372 = vector.broadcast %cst_306 : f32 to vector<2x32xf32>
    %373 = arith.addf %372, %371 : vector<2x32xf32>
    %374 = arith.divf %372, %373 : vector<2x32xf32>
    %375 = math.tanh %360 : vector<2x32xf32>
    %376 = arith.negf %364 : vector<2x32xf32>
    %377 = math.exp %376 : vector<2x32xf32>
    %cst_307 = arith.constant 1.000000e+00 : f32
    %378 = vector.broadcast %cst_307 : f32 to vector<2x32xf32>
    %379 = arith.addf %378, %377 : vector<2x32xf32>
    %380 = arith.divf %378, %379 : vector<2x32xf32>
    %381 = arith.mulf %374, %301 : vector<2x32xf32>
    %382 = arith.mulf %369, %375 : vector<2x32xf32>
    %383 = arith.addf %381, %382 : vector<2x32xf32>
    %384 = math.tanh %383 : vector<2x32xf32>
    %385 = arith.mulf %380, %384 : vector<2x32xf32>
    %c0_308 = arith.constant 0 : index
    %c3_309 = arith.constant 3 : index
    %c0_310 = arith.constant 0 : index
    %386 = vector.load %arg11[%c0_308, %c3_309, %c0_310] : memref<2x8x64xf32, #tpu.memory_space<vmem>>, vector<2x1x32xf32>
    %387 = vector.shape_cast %386 : vector<2x1x32xf32> to vector<2x32xf32>
    %388 = vector.shape_cast %385 : vector<2x32xf32> to vector<2x1x32xf32>
    tpu.vector_store %arg11[%c0_308, %c3_309, %c0_310], %388 {strides = array<i32>} : memref<2x8x64xf32, #tpu.memory_space<vmem>>, vector<2x1x32xf32>,
    %389 = arith.truncf %344 : vector<2x32xf32> to vector<2x32xbf16>
    %c1_311 = arith.constant 1 : index
    %c0_312 = arith.constant 0 : index
    %c8 = arith.constant 8 : index
    %c0_313 = arith.constant 0 : index
    %390 = vector.load %arg10[%c1_311, %c0_312, %c8, %c0_313] : memref<2x4x16x32xf32, #tpu.memory_space<vmem>>, vector<1x1x2x32xf32>
    %391 = vector.shape_cast %390 : vector<1x1x2x32xf32> to vector<2x32xf32>
    %cst_314 = arith.constant dense<0.000000e+00> : vector<2x32xf32>
    %392 = tpu.matmul %389, %91, %cst_314 {dimension_numbers = #tpu.dot_dimension_numbers<[1], [0], [0], [1], [0, 0, 1, 1], [], []>} : vector<2x32xbf16>, vector<32x32xbf16>, vector<2x32xf32> -> vector<2x32xf32>
    %393 = arith.addf %391, %392 : vector<2x32xf32>
    %c1_315 = arith.constant 1 : index
    %c1_316 = arith.constant 1 : index
    %c8_317 = arith.constant 8 : index
    %c0_318 = arith.constant 0 : index
    %394 = vector.load %arg10[%c1_315, %c1_316, %c8_317, %c0_318] : memref<2x4x16x32xf32, #tpu.memory_space<vmem>>, vector<1x1x2x32xf32>
    %395 = vector.shape_cast %394 : vector<1x1x2x32xf32> to vector<2x32xf32>
    %cst_319 = arith.constant dense<0.000000e+00> : vector<2x32xf32>
    %396 = tpu.matmul %389, %93, %cst_319 {dimension_numbers = #tpu.dot_dimension_numbers<[1], [0], [0], [1], [0, 0, 1, 1], [], []>} : vector<2x32xbf16>, vector<32x32xbf16>, vector<2x32xf32> -> vector<2x32xf32>
    %397 = arith.addf %395, %396 : vector<2x32xf32>
    %c1_320 = arith.constant 1 : index
    %c2_321 = arith.constant 2 : index
    %c8_322 = arith.constant 8 : index
    %c0_323 = arith.constant 0 : index
    %398 = vector.load %arg10[%c1_320, %c2_321, %c8_322, %c0_323] : memref<2x4x16x32xf32, #tpu.memory_space<vmem>>, vector<1x1x2x32xf32>
    %399 = vector.shape_cast %398 : vector<1x1x2x32xf32> to vector<2x32xf32>
    %cst_324 = arith.constant dense<0.000000e+00> : vector<2x32xf32>
    %400 = tpu.matmul %389, %95, %cst_324 {dimension_numbers = #tpu.dot_dimension_numbers<[1], [0], [0], [1], [0, 0, 1, 1], [], []>} : vector<2x32xbf16>, vector<32x32xbf16>, vector<2x32xf32> -> vector<2x32xf32>
    %401 = arith.addf %399, %400 : vector<2x32xf32>
    %c1_325 = arith.constant 1 : index
    %c3_326 = arith.constant 3 : index
    %c8_327 = arith.constant 8 : index
    %c0_328 = arith.constant 0 : index
    %402 = vector.load %arg10[%c1_325, %c3_326, %c8_327, %c0_328] : memref<2x4x16x32xf32, #tpu.memory_space<vmem>>, vector<1x1x2x32xf32>
    %403 = vector.shape_cast %402 : vector<1x1x2x32xf32> to vector<2x32xf32>
    %cst_329 = arith.constant dense<0.000000e+00> : vector<2x32xf32>
    %404 = tpu.matmul %389, %97, %cst_329 {dimension_numbers = #tpu.dot_dimension_numbers<[1], [0], [0], [1], [0, 0, 1, 1], [], []>} : vector<2x32xbf16>, vector<32x32xbf16>, vector<2x32xf32> -> vector<2x32xf32>
    %405 = arith.addf %403, %404 : vector<2x32xf32>
    %406 = arith.negf %393 : vector<2x32xf32>
    %407 = math.exp %406 : vector<2x32xf32>
    %cst_330 = arith.constant 1.000000e+00 : f32
    %408 = vector.broadcast %cst_330 : f32 to vector<2x32xf32>
    %409 = arith.addf %408, %407 : vector<2x32xf32>
    %410 = arith.divf %408, %409 : vector<2x32xf32>
    %411 = arith.negf %397 : vector<2x32xf32>
    %412 = math.exp %411 : vector<2x32xf32>
    %cst_331 = arith.constant 1.000000e+00 : f32
    %413 = vector.broadcast %cst_331 : f32 to vector<2x32xf32>
    %414 = arith.addf %413, %412 : vector<2x32xf32>
    %415 = arith.divf %413, %414 : vector<2x32xf32>
    %416 = math.tanh %401 : vector<2x32xf32>
    %417 = arith.negf %405 : vector<2x32xf32>
    %418 = math.exp %417 : vector<2x32xf32>
    %cst_332 = arith.constant 1.000000e+00 : f32
    %419 = vector.broadcast %cst_332 : f32 to vector<2x32xf32>
    %420 = arith.addf %419, %418 : vector<2x32xf32>
    %421 = arith.divf %419, %420 : vector<2x32xf32>
    %422 = arith.mulf %415, %342 : vector<2x32xf32>
    %423 = arith.mulf %410, %416 : vector<2x32xf32>
    %424 = arith.addf %422, %423 : vector<2x32xf32>
    %425 = math.tanh %424 : vector<2x32xf32>
    %426 = arith.mulf %421, %425 : vector<2x32xf32>
    %c0_333 = arith.constant 0 : index
    %c4_334 = arith.constant 4 : index
    %c32_335 = arith.constant 32 : index
    %427 = vector.load %arg11[%c0_333, %c4_334, %c32_335] : memref<2x8x64xf32, #tpu.memory_space<vmem>>, vector<2x1x32xf32>
    %428 = vector.shape_cast %427 : vector<2x1x32xf32> to vector<2x32xf32>
    %429 = vector.shape_cast %426 : vector<2x32xf32> to vector<2x1x32xf32>
    tpu.vector_store %arg11[%c0_333, %c4_334, %c32_335], %429 {strides = array<i32>} : memref<2x8x64xf32, #tpu.memory_space<vmem>>, vector<2x1x32xf32>,
    %430 = arith.truncf %385 : vector<2x32xf32> to vector<2x32xbf16>
    %c0_336 = arith.constant 0 : index
    %c0_337 = arith.constant 0 : index
    %c8_338 = arith.constant 8 : index
    %c0_339 = arith.constant 0 : index
    %431 = vector.load %arg10[%c0_336, %c0_337, %c8_338, %c0_339] : memref<2x4x16x32xf32, #tpu.memory_space<vmem>>, vector<1x1x2x32xf32>
    %432 = vector.shape_cast %431 : vector<1x1x2x32xf32> to vector<2x32xf32>
    %cst_340 = arith.constant dense<0.000000e+00> : vector<2x32xf32>
    %433 = tpu.matmul %430, %83, %cst_340 {dimension_numbers = #tpu.dot_dimension_numbers<[1], [0], [0], [1], [0, 0, 1, 1], [], []>} : vector<2x32xbf16>, vector<32x32xbf16>, vector<2x32xf32> -> vector<2x32xf32>
    %434 = arith.addf %432, %433 : vector<2x32xf32>
    %c0_341 = arith.constant 0 : index
    %c1_342 = arith.constant 1 : index
    %c8_343 = arith.constant 8 : index
    %c0_344 = arith.constant 0 : index
    %435 = vector.load %arg10[%c0_341, %c1_342, %c8_343, %c0_344] : memref<2x4x16x32xf32, #tpu.memory_space<vmem>>, vector<1x1x2x32xf32>
    %436 = vector.shape_cast %435 : vector<1x1x2x32xf32> to vector<2x32xf32>
    %cst_345 = arith.constant dense<0.000000e+00> : vector<2x32xf32>
    %437 = tpu.matmul %430, %85, %cst_345 {dimension_numbers = #tpu.dot_dimension_numbers<[1], [0], [0], [1], [0, 0, 1, 1], [], []>} : vector<2x32xbf16>, vector<32x32xbf16>, vector<2x32xf32> -> vector<2x32xf32>
    %438 = arith.addf %436, %437 : vector<2x32xf32>
    %c0_346 = arith.constant 0 : index
    %c2_347 = arith.constant 2 : index
    %c8_348 = arith.constant 8 : index
    %c0_349 = arith.constant 0 : index
    %439 = vector.load %arg10[%c0_346, %c2_347, %c8_348, %c0_349] : memref<2x4x16x32xf32, #tpu.memory_space<vmem>>, vector<1x1x2x32xf32>
    %440 = vector.shape_cast %439 : vector<1x1x2x32xf32> to vector<2x32xf32>
    %cst_350 = arith.constant dense<0.000000e+00> : vector<2x32xf32>
    %441 = tpu.matmul %430, %87, %cst_350 {dimension_numbers = #tpu.dot_dimension_numbers<[1], [0], [0], [1], [0, 0, 1, 1], [], []>} : vector<2x32xbf16>, vector<32x32xbf16>, vector<2x32xf32> -> vector<2x32xf32>
    %442 = arith.addf %440, %441 : vector<2x32xf32>
    %c0_351 = arith.constant 0 : index
    %c3_352 = arith.constant 3 : index
    %c8_353 = arith.constant 8 : index
    %c0_354 = arith.constant 0 : index
    %443 = vector.load %arg10[%c0_351, %c3_352, %c8_353, %c0_354] : memref<2x4x16x32xf32, #tpu.memory_space<vmem>>, vector<1x1x2x32xf32>
    %444 = vector.shape_cast %443 : vector<1x1x2x32xf32> to vector<2x32xf32>
    %cst_355 = arith.constant dense<0.000000e+00> : vector<2x32xf32>
    %445 = tpu.matmul %430, %89, %cst_355 {dimension_numbers = #tpu.dot_dimension_numbers<[1], [0], [0], [1], [0, 0, 1, 1], [], []>} : vector<2x32xbf16>, vector<32x32xbf16>, vector<2x32xf32> -> vector<2x32xf32>
    %446 = arith.addf %444, %445 : vector<2x32xf32>
    %447 = arith.negf %434 : vector<2x32xf32>
    %448 = math.exp %447 : vector<2x32xf32>
    %cst_356 = arith.constant 1.000000e+00 : f32
    %449 = vector.broadcast %cst_356 : f32 to vector<2x32xf32>
    %450 = arith.addf %449, %448 : vector<2x32xf32>
    %451 = arith.divf %449, %450 : vector<2x32xf32>
    %452 = arith.negf %438 : vector<2x32xf32>
    %453 = math.exp %452 : vector<2x32xf32>
    %cst_357 = arith.constant 1.000000e+00 : f32
    %454 = vector.broadcast %cst_357 : f32 to vector<2x32xf32>
    %455 = arith.addf %454, %453 : vector<2x32xf32>
    %456 = arith.divf %454, %455 : vector<2x32xf32>
    %457 = math.tanh %442 : vector<2x32xf32>
    %458 = arith.negf %446 : vector<2x32xf32>
    %459 = math.exp %458 : vector<2x32xf32>
    %cst_358 = arith.constant 1.000000e+00 : f32
    %460 = vector.broadcast %cst_358 : f32 to vector<2x32xf32>
    %461 = arith.addf %460, %459 : vector<2x32xf32>
    %462 = arith.divf %460, %461 : vector<2x32xf32>
    %463 = arith.mulf %456, %383 : vector<2x32xf32>
    %464 = arith.mulf %451, %457 : vector<2x32xf32>
    %465 = arith.addf %463, %464 : vector<2x32xf32>
    %466 = math.tanh %465 : vector<2x32xf32>
    %467 = arith.mulf %462, %466 : vector<2x32xf32>
    %c0_359 = arith.constant 0 : index
    %c4_360 = arith.constant 4 : index
    %c0_361 = arith.constant 0 : index
    %468 = vector.load %arg11[%c0_359, %c4_360, %c0_361] : memref<2x8x64xf32, #tpu.memory_space<vmem>>, vector<2x1x32xf32>
    %469 = vector.shape_cast %468 : vector<2x1x32xf32> to vector<2x32xf32>
    %470 = vector.shape_cast %467 : vector<2x32xf32> to vector<2x1x32xf32>
    tpu.vector_store %arg11[%c0_359, %c4_360, %c0_361], %470 {strides = array<i32>} : memref<2x8x64xf32, #tpu.memory_space<vmem>>, vector<2x1x32xf32>,
    %471 = arith.truncf %426 : vector<2x32xf32> to vector<2x32xbf16>
    %c1_362 = arith.constant 1 : index
    %c0_363 = arith.constant 0 : index
    %c6_364 = arith.constant 6 : index
    %c0_365 = arith.constant 0 : index
    %472 = vector.load %arg10[%c1_362, %c0_363, %c6_364, %c0_365] : memref<2x4x16x32xf32, #tpu.memory_space<vmem>>, vector<1x1x2x32xf32>
    %473 = vector.shape_cast %472 : vector<1x1x2x32xf32> to vector<2x32xf32>
    %cst_366 = arith.constant dense<0.000000e+00> : vector<2x32xf32>
    %474 = tpu.matmul %471, %91, %cst_366 {dimension_numbers = #tpu.dot_dimension_numbers<[1], [0], [0], [1], [0, 0, 1, 1], [], []>} : vector<2x32xbf16>, vector<32x32xbf16>, vector<2x32xf32> -> vector<2x32xf32>
    %475 = arith.addf %473, %474 : vector<2x32xf32>
    %c1_367 = arith.constant 1 : index
    %c1_368 = arith.constant 1 : index
    %c6_369 = arith.constant 6 : index
    %c0_370 = arith.constant 0 : index
    %476 = vector.load %arg10[%c1_367, %c1_368, %c6_369, %c0_370] : memref<2x4x16x32xf32, #tpu.memory_space<vmem>>, vector<1x1x2x32xf32>
    %477 = vector.shape_cast %476 : vector<1x1x2x32xf32> to vector<2x32xf32>
    %cst_371 = arith.constant dense<0.000000e+00> : vector<2x32xf32>
    %478 = tpu.matmul %471, %93, %cst_371 {dimension_numbers = #tpu.dot_dimension_numbers<[1], [0], [0], [1], [0, 0, 1, 1], [], []>} : vector<2x32xbf16>, vector<32x32xbf16>, vector<2x32xf32> -> vector<2x32xf32>
    %479 = arith.addf %477, %478 : vector<2x32xf32>
    %c1_372 = arith.constant 1 : index
    %c2_373 = arith.constant 2 : index
    %c6_374 = arith.constant 6 : index
    %c0_375 = arith.constant 0 : index
    %480 = vector.load %arg10[%c1_372, %c2_373, %c6_374, %c0_375] : memref<2x4x16x32xf32, #tpu.memory_space<vmem>>, vector<1x1x2x32xf32>
    %481 = vector.shape_cast %480 : vector<1x1x2x32xf32> to vector<2x32xf32>
    %cst_376 = arith.constant dense<0.000000e+00> : vector<2x32xf32>
    %482 = tpu.matmul %471, %95, %cst_376 {dimension_numbers = #tpu.dot_dimension_numbers<[1], [0], [0], [1], [0, 0, 1, 1], [], []>} : vector<2x32xbf16>, vector<32x32xbf16>, vector<2x32xf32> -> vector<2x32xf32>
    %483 = arith.addf %481, %482 : vector<2x32xf32>
    %c1_377 = arith.constant 1 : index
    %c3_378 = arith.constant 3 : index
    %c6_379 = arith.constant 6 : index
    %c0_380 = arith.constant 0 : index
    %484 = vector.load %arg10[%c1_377, %c3_378, %c6_379, %c0_380] : memref<2x4x16x32xf32, #tpu.memory_space<vmem>>, vector<1x1x2x32xf32>
    %485 = vector.shape_cast %484 : vector<1x1x2x32xf32> to vector<2x32xf32>
    %cst_381 = arith.constant dense<0.000000e+00> : vector<2x32xf32>
    %486 = tpu.matmul %471, %97, %cst_381 {dimension_numbers = #tpu.dot_dimension_numbers<[1], [0], [0], [1], [0, 0, 1, 1], [], []>} : vector<2x32xbf16>, vector<32x32xbf16>, vector<2x32xf32> -> vector<2x32xf32>
    %487 = arith.addf %485, %486 : vector<2x32xf32>
    %488 = arith.negf %475 : vector<2x32xf32>
    %489 = math.exp %488 : vector<2x32xf32>
    %cst_382 = arith.constant 1.000000e+00 : f32
    %490 = vector.broadcast %cst_382 : f32 to vector<2x32xf32>
    %491 = arith.addf %490, %489 : vector<2x32xf32>
    %492 = arith.divf %490, %491 : vector<2x32xf32>
    %493 = arith.negf %479 : vector<2x32xf32>
    %494 = math.exp %493 : vector<2x32xf32>
    %cst_383 = arith.constant 1.000000e+00 : f32
    %495 = vector.broadcast %cst_383 : f32 to vector<2x32xf32>
    %496 = arith.addf %495, %494 : vector<2x32xf32>
    %497 = arith.divf %495, %496 : vector<2x32xf32>
    %498 = math.tanh %483 : vector<2x32xf32>
    %499 = arith.negf %487 : vector<2x32xf32>
    %500 = math.exp %499 : vector<2x32xf32>
    %cst_384 = arith.constant 1.000000e+00 : f32
    %501 = vector.broadcast %cst_384 : f32 to vector<2x32xf32>
    %502 = arith.addf %501, %500 : vector<2x32xf32>
    %503 = arith.divf %501, %502 : vector<2x32xf32>
    %504 = arith.mulf %497, %424 : vector<2x32xf32>
    %505 = arith.mulf %492, %498 : vector<2x32xf32>
    %506 = arith.addf %504, %505 : vector<2x32xf32>
    %507 = math.tanh %506 : vector<2x32xf32>
    %508 = arith.mulf %503, %507 : vector<2x32xf32>
    %c0_385 = arith.constant 0 : index
    %c3_386 = arith.constant 3 : index
    %c32_387 = arith.constant 32 : index
    %509 = vector.load %arg11[%c0_385, %c3_386, %c32_387] : memref<2x8x64xf32, #tpu.memory_space<vmem>>, vector<2x1x32xf32>
    %510 = vector.shape_cast %509 : vector<2x1x32xf32> to vector<2x32xf32>
    %511 = vector.shape_cast %508 : vector<2x32xf32> to vector<2x1x32xf32>
    tpu.vector_store %arg11[%c0_385, %c3_386, %c32_387], %511 {strides = array<i32>} : memref<2x8x64xf32, #tpu.memory_space<vmem>>, vector<2x1x32xf32>,
    %512 = arith.truncf %467 : vector<2x32xf32> to vector<2x32xbf16>
    %c0_388 = arith.constant 0 : index
    %c0_389 = arith.constant 0 : index
    %c10_390 = arith.constant 10 : index
    %c0_391 = arith.constant 0 : index
    %513 = vector.load %arg10[%c0_388, %c0_389, %c10_390, %c0_391] : memref<2x4x16x32xf32, #tpu.memory_space<vmem>>, vector<1x1x2x32xf32>
    %514 = vector.shape_cast %513 : vector<1x1x2x32xf32> to vector<2x32xf32>
    %cst_392 = arith.constant dense<0.000000e+00> : vector<2x32xf32>
    %515 = tpu.matmul %512, %83, %cst_392 {dimension_numbers = #tpu.dot_dimension_numbers<[1], [0], [0], [1], [0, 0, 1, 1], [], []>} : vector<2x32xbf16>, vector<32x32xbf16>, vector<2x32xf32> -> vector<2x32xf32>
    %516 = arith.addf %514, %515 : vector<2x32xf32>
    %c0_393 = arith.constant 0 : index
    %c1_394 = arith.constant 1 : index
    %c10_395 = arith.constant 10 : index
    %c0_396 = arith.constant 0 : index
    %517 = vector.load %arg10[%c0_393, %c1_394, %c10_395, %c0_396] : memref<2x4x16x32xf32, #tpu.memory_space<vmem>>, vector<1x1x2x32xf32>
    %518 = vector.shape_cast %517 : vector<1x1x2x32xf32> to vector<2x32xf32>
    %cst_397 = arith.constant dense<0.000000e+00> : vector<2x32xf32>
    %519 = tpu.matmul %512, %85, %cst_397 {dimension_numbers = #tpu.dot_dimension_numbers<[1], [0], [0], [1], [0, 0, 1, 1], [], []>} : vector<2x32xbf16>, vector<32x32xbf16>, vector<2x32xf32> -> vector<2x32xf32>
    %520 = arith.addf %518, %519 : vector<2x32xf32>
    %c0_398 = arith.constant 0 : index
    %c2_399 = arith.constant 2 : index
    %c10_400 = arith.constant 10 : index
    %c0_401 = arith.constant 0 : index
    %521 = vector.load %arg10[%c0_398, %c2_399, %c10_400, %c0_401] : memref<2x4x16x32xf32, #tpu.memory_space<vmem>>, vector<1x1x2x32xf32>
    %522 = vector.shape_cast %521 : vector<1x1x2x32xf32> to vector<2x32xf32>
    %cst_402 = arith.constant dense<0.000000e+00> : vector<2x32xf32>
    %523 = tpu.matmul %512, %87, %cst_402 {dimension_numbers = #tpu.dot_dimension_numbers<[1], [0], [0], [1], [0, 0, 1, 1], [], []>} : vector<2x32xbf16>, vector<32x32xbf16>, vector<2x32xf32> -> vector<2x32xf32>
    %524 = arith.addf %522, %523 : vector<2x32xf32>
    %c0_403 = arith.constant 0 : index
    %c3_404 = arith.constant 3 : index
    %c10_405 = arith.constant 10 : index
    %c0_406 = arith.constant 0 : index
    %525 = vector.load %arg10[%c0_403, %c3_404, %c10_405, %c0_406] : memref<2x4x16x32xf32, #tpu.memory_space<vmem>>, vector<1x1x2x32xf32>
    %526 = vector.shape_cast %525 : vector<1x1x2x32xf32> to vector<2x32xf32>
    %cst_407 = arith.constant dense<0.000000e+00> : vector<2x32xf32>
    %527 = tpu.matmul %512, %89, %cst_407 {dimension_numbers = #tpu.dot_dimension_numbers<[1], [0], [0], [1], [0, 0, 1, 1], [], []>} : vector<2x32xbf16>, vector<32x32xbf16>, vector<2x32xf32> -> vector<2x32xf32>
    %528 = arith.addf %526, %527 : vector<2x32xf32>
    %529 = arith.negf %516 : vector<2x32xf32>
    %530 = math.exp %529 : vector<2x32xf32>
    %cst_408 = arith.constant 1.000000e+00 : f32
    %531 = vector.broadcast %cst_408 : f32 to vector<2x32xf32>
    %532 = arith.addf %531, %530 : vector<2x32xf32>
    %533 = arith.divf %531, %532 : vector<2x32xf32>
    %534 = arith.negf %520 : vector<2x32xf32>
    %535 = math.exp %534 : vector<2x32xf32>
    %cst_409 = arith.constant 1.000000e+00 : f32
    %536 = vector.broadcast %cst_409 : f32 to vector<2x32xf32>
    %537 = arith.addf %536, %535 : vector<2x32xf32>
    %538 = arith.divf %536, %537 : vector<2x32xf32>
    %539 = math.tanh %524 : vector<2x32xf32>
    %540 = arith.negf %528 : vector<2x32xf32>
    %541 = math.exp %540 : vector<2x32xf32>
    %cst_410 = arith.constant 1.000000e+00 : f32
    %542 = vector.broadcast %cst_410 : f32 to vector<2x32xf32>
    %543 = arith.addf %542, %541 : vector<2x32xf32>
    %544 = arith.divf %542, %543 : vector<2x32xf32>
    %545 = arith.mulf %538, %465 : vector<2x32xf32>
    %546 = arith.mulf %533, %539 : vector<2x32xf32>
    %547 = arith.addf %545, %546 : vector<2x32xf32>
    %548 = math.tanh %547 : vector<2x32xf32>
    %549 = arith.mulf %544, %548 : vector<2x32xf32>
    %c0_411 = arith.constant 0 : index
    %c5_412 = arith.constant 5 : index
    %c0_413 = arith.constant 0 : index
    %550 = vector.load %arg11[%c0_411, %c5_412, %c0_413] : memref<2x8x64xf32, #tpu.memory_space<vmem>>, vector<2x1x32xf32>
    %551 = vector.shape_cast %550 : vector<2x1x32xf32> to vector<2x32xf32>
    %552 = vector.shape_cast %549 : vector<2x32xf32> to vector<2x1x32xf32>
    tpu.vector_store %arg11[%c0_411, %c5_412, %c0_413], %552 {strides = array<i32>} : memref<2x8x64xf32, #tpu.memory_space<vmem>>, vector<2x1x32xf32>,
    %553 = arith.truncf %508 : vector<2x32xf32> to vector<2x32xbf16>
    %c1_414 = arith.constant 1 : index
    %c0_415 = arith.constant 0 : index
    %c4_416 = arith.constant 4 : index
    %c0_417 = arith.constant 0 : index
    %554 = vector.load %arg10[%c1_414, %c0_415, %c4_416, %c0_417] : memref<2x4x16x32xf32, #tpu.memory_space<vmem>>, vector<1x1x2x32xf32>
    %555 = vector.shape_cast %554 : vector<1x1x2x32xf32> to vector<2x32xf32>
    %cst_418 = arith.constant dense<0.000000e+00> : vector<2x32xf32>
    %556 = tpu.matmul %553, %91, %cst_418 {dimension_numbers = #tpu.dot_dimension_numbers<[1], [0], [0], [1], [0, 0, 1, 1], [], []>} : vector<2x32xbf16>, vector<32x32xbf16>, vector<2x32xf32> -> vector<2x32xf32>
    %557 = arith.addf %555, %556 : vector<2x32xf32>
    %c1_419 = arith.constant 1 : index
    %c1_420 = arith.constant 1 : index
    %c4_421 = arith.constant 4 : index
    %c0_422 = arith.constant 0 : index
    %558 = vector.load %arg10[%c1_419, %c1_420, %c4_421, %c0_422] : memref<2x4x16x32xf32, #tpu.memory_space<vmem>>, vector<1x1x2x32xf32>
    %559 = vector.shape_cast %558 : vector<1x1x2x32xf32> to vector<2x32xf32>
    %cst_423 = arith.constant dense<0.000000e+00> : vector<2x32xf32>
    %560 = tpu.matmul %553, %93, %cst_423 {dimension_numbers = #tpu.dot_dimension_numbers<[1], [0], [0], [1], [0, 0, 1, 1], [], []>} : vector<2x32xbf16>, vector<32x32xbf16>, vector<2x32xf32> -> vector<2x32xf32>
    %561 = arith.addf %559, %560 : vector<2x32xf32>
    %c1_424 = arith.constant 1 : index
    %c2_425 = arith.constant 2 : index
    %c4_426 = arith.constant 4 : index
    %c0_427 = arith.constant 0 : index
    %562 = vector.load %arg10[%c1_424, %c2_425, %c4_426, %c0_427] : memref<2x4x16x32xf32, #tpu.memory_space<vmem>>, vector<1x1x2x32xf32>
    %563 = vector.shape_cast %562 : vector<1x1x2x32xf32> to vector<2x32xf32>
    %cst_428 = arith.constant dense<0.000000e+00> : vector<2x32xf32>
    %564 = tpu.matmul %553, %95, %cst_428 {dimension_numbers = #tpu.dot_dimension_numbers<[1], [0], [0], [1], [0, 0, 1, 1], [], []>} : vector<2x32xbf16>, vector<32x32xbf16>, vector<2x32xf32> -> vector<2x32xf32>
    %565 = arith.addf %563, %564 : vector<2x32xf32>
    %c1_429 = arith.constant 1 : index
    %c3_430 = arith.constant 3 : index
    %c4_431 = arith.constant 4 : index
    %c0_432 = arith.constant 0 : index
    %566 = vector.load %arg10[%c1_429, %c3_430, %c4_431, %c0_432] : memref<2x4x16x32xf32, #tpu.memory_space<vmem>>, vector<1x1x2x32xf32>
    %567 = vector.shape_cast %566 : vector<1x1x2x32xf32> to vector<2x32xf32>
    %cst_433 = arith.constant dense<0.000000e+00> : vector<2x32xf32>
    %568 = tpu.matmul %553, %97, %cst_433 {dimension_numbers = #tpu.dot_dimension_numbers<[1], [0], [0], [1], [0, 0, 1, 1], [], []>} : vector<2x32xbf16>, vector<32x32xbf16>, vector<2x32xf32> -> vector<2x32xf32>
    %569 = arith.addf %567, %568 : vector<2x32xf32>
    %570 = arith.negf %557 : vector<2x32xf32>
    %571 = math.exp %570 : vector<2x32xf32>
    %cst_434 = arith.constant 1.000000e+00 : f32
    %572 = vector.broadcast %cst_434 : f32 to vector<2x32xf32>
    %573 = arith.addf %572, %571 : vector<2x32xf32>
    %574 = arith.divf %572, %573 : vector<2x32xf32>
    %575 = arith.negf %561 : vector<2x32xf32>
    %576 = math.exp %575 : vector<2x32xf32>
    %cst_435 = arith.constant 1.000000e+00 : f32
    %577 = vector.broadcast %cst_435 : f32 to vector<2x32xf32>
    %578 = arith.addf %577, %576 : vector<2x32xf32>
    %579 = arith.divf %577, %578 : vector<2x32xf32>
    %580 = math.tanh %565 : vector<2x32xf32>
    %581 = arith.negf %569 : vector<2x32xf32>
    %582 = math.exp %581 : vector<2x32xf32>
    %cst_436 = arith.constant 1.000000e+00 : f32
    %583 = vector.broadcast %cst_436 : f32 to vector<2x32xf32>
    %584 = arith.addf %583, %582 : vector<2x32xf32>
    %585 = arith.divf %583, %584 : vector<2x32xf32>
    %586 = arith.mulf %579, %506 : vector<2x32xf32>
    %587 = arith.mulf %574, %580 : vector<2x32xf32>
    %588 = arith.addf %586, %587 : vector<2x32xf32>
    %589 = math.tanh %588 : vector<2x32xf32>
    %590 = arith.mulf %585, %589 : vector<2x32xf32>
    %c0_437 = arith.constant 0 : index
    %c2_438 = arith.constant 2 : index
    %c32_439 = arith.constant 32 : index
    %591 = vector.load %arg11[%c0_437, %c2_438, %c32_439] : memref<2x8x64xf32, #tpu.memory_space<vmem>>, vector<2x1x32xf32>
    %592 = vector.shape_cast %591 : vector<2x1x32xf32> to vector<2x32xf32>
    %593 = vector.shape_cast %590 : vector<2x32xf32> to vector<2x1x32xf32>
    tpu.vector_store %arg11[%c0_437, %c2_438, %c32_439], %593 {strides = array<i32>} : memref<2x8x64xf32, #tpu.memory_space<vmem>>, vector<2x1x32xf32>,
    %594 = arith.truncf %549 : vector<2x32xf32> to vector<2x32xbf16>
    %c0_440 = arith.constant 0 : index
    %c0_441 = arith.constant 0 : index
    %c12_442 = arith.constant 12 : index
    %c0_443 = arith.constant 0 : index
    %595 = vector.load %arg10[%c0_440, %c0_441, %c12_442, %c0_443] : memref<2x4x16x32xf32, #tpu.memory_space<vmem>>, vector<1x1x2x32xf32>
    %596 = vector.shape_cast %595 : vector<1x1x2x32xf32> to vector<2x32xf32>
    %cst_444 = arith.constant dense<0.000000e+00> : vector<2x32xf32>
    %597 = tpu.matmul %594, %83, %cst_444 {dimension_numbers = #tpu.dot_dimension_numbers<[1], [0], [0], [1], [0, 0, 1, 1], [], []>} : vector<2x32xbf16>, vector<32x32xbf16>, vector<2x32xf32> -> vector<2x32xf32>
    %598 = arith.addf %596, %597 : vector<2x32xf32>
    %c0_445 = arith.constant 0 : index
    %c1_446 = arith.constant 1 : index
    %c12_447 = arith.constant 12 : index
    %c0_448 = arith.constant 0 : index
    %599 = vector.load %arg10[%c0_445, %c1_446, %c12_447, %c0_448] : memref<2x4x16x32xf32, #tpu.memory_space<vmem>>, vector<1x1x2x32xf32>
    %600 = vector.shape_cast %599 : vector<1x1x2x32xf32> to vector<2x32xf32>
    %cst_449 = arith.constant dense<0.000000e+00> : vector<2x32xf32>
    %601 = tpu.matmul %594, %85, %cst_449 {dimension_numbers = #tpu.dot_dimension_numbers<[1], [0], [0], [1], [0, 0, 1, 1], [], []>} : vector<2x32xbf16>, vector<32x32xbf16>, vector<2x32xf32> -> vector<2x32xf32>
    %602 = arith.addf %600, %601 : vector<2x32xf32>
    %c0_450 = arith.constant 0 : index
    %c2_451 = arith.constant 2 : index
    %c12_452 = arith.constant 12 : index
    %c0_453 = arith.constant 0 : index
    %603 = vector.load %arg10[%c0_450, %c2_451, %c12_452, %c0_453] : memref<2x4x16x32xf32, #tpu.memory_space<vmem>>, vector<1x1x2x32xf32>
    %604 = vector.shape_cast %603 : vector<1x1x2x32xf32> to vector<2x32xf32>
    %cst_454 = arith.constant dense<0.000000e+00> : vector<2x32xf32>
    %605 = tpu.matmul %594, %87, %cst_454 {dimension_numbers = #tpu.dot_dimension_numbers<[1], [0], [0], [1], [0, 0, 1, 1], [], []>} : vector<2x32xbf16>, vector<32x32xbf16>, vector<2x32xf32> -> vector<2x32xf32>
    %606 = arith.addf %604, %605 : vector<2x32xf32>
    %c0_455 = arith.constant 0 : index
    %c3_456 = arith.constant 3 : index
    %c12_457 = arith.constant 12 : index
    %c0_458 = arith.constant 0 : index
    %607 = vector.load %arg10[%c0_455, %c3_456, %c12_457, %c0_458] : memref<2x4x16x32xf32, #tpu.memory_space<vmem>>, vector<1x1x2x32xf32>
    %608 = vector.shape_cast %607 : vector<1x1x2x32xf32> to vector<2x32xf32>
    %cst_459 = arith.constant dense<0.000000e+00> : vector<2x32xf32>
    %609 = tpu.matmul %594, %89, %cst_459 {dimension_numbers = #tpu.dot_dimension_numbers<[1], [0], [0], [1], [0, 0, 1, 1], [], []>} : vector<2x32xbf16>, vector<32x32xbf16>, vector<2x32xf32> -> vector<2x32xf32>
    %610 = arith.addf %608, %609 : vector<2x32xf32>
    %611 = arith.negf %598 : vector<2x32xf32>
    %612 = math.exp %611 : vector<2x32xf32>
    %cst_460 = arith.constant 1.000000e+00 : f32
    %613 = vector.broadcast %cst_460 : f32 to vector<2x32xf32>
    %614 = arith.addf %613, %612 : vector<2x32xf32>
    %615 = arith.divf %613, %614 : vector<2x32xf32>
    %616 = arith.negf %602 : vector<2x32xf32>
    %617 = math.exp %616 : vector<2x32xf32>
    %cst_461 = arith.constant 1.000000e+00 : f32
    %618 = vector.broadcast %cst_461 : f32 to vector<2x32xf32>
    %619 = arith.addf %618, %617 : vector<2x32xf32>
    %620 = arith.divf %618, %619 : vector<2x32xf32>
    %621 = math.tanh %606 : vector<2x32xf32>
    %622 = arith.negf %610 : vector<2x32xf32>
    %623 = math.exp %622 : vector<2x32xf32>
    %cst_462 = arith.constant 1.000000e+00 : f32
    %624 = vector.broadcast %cst_462 : f32 to vector<2x32xf32>
    %625 = arith.addf %624, %623 : vector<2x32xf32>
    %626 = arith.divf %624, %625 : vector<2x32xf32>
    %627 = arith.mulf %620, %547 : vector<2x32xf32>
    %628 = arith.mulf %615, %621 : vector<2x32xf32>
    %629 = arith.addf %627, %628 : vector<2x32xf32>
    %630 = math.tanh %629 : vector<2x32xf32>
    %631 = arith.mulf %626, %630 : vector<2x32xf32>
    %c0_463 = arith.constant 0 : index
    %c6_464 = arith.constant 6 : index
    %c0_465 = arith.constant 0 : index
    %632 = vector.load %arg11[%c0_463, %c6_464, %c0_465] : memref<2x8x64xf32, #tpu.memory_space<vmem>>, vector<2x1x32xf32>
    %633 = vector.shape_cast %632 : vector<2x1x32xf32> to vector<2x32xf32>
    %634 = vector.shape_cast %631 : vector<2x32xf32> to vector<2x1x32xf32>
    tpu.vector_store %arg11[%c0_463, %c6_464, %c0_465], %634 {strides = array<i32>} : memref<2x8x64xf32, #tpu.memory_space<vmem>>, vector<2x1x32xf32>,
    %635 = arith.truncf %590 : vector<2x32xf32> to vector<2x32xbf16>
    %c1_466 = arith.constant 1 : index
    %c0_467 = arith.constant 0 : index
    %c2_468 = arith.constant 2 : index
    %c0_469 = arith.constant 0 : index
    %636 = vector.load %arg10[%c1_466, %c0_467, %c2_468, %c0_469] : memref<2x4x16x32xf32, #tpu.memory_space<vmem>>, vector<1x1x2x32xf32>
    %637 = vector.shape_cast %636 : vector<1x1x2x32xf32> to vector<2x32xf32>
    %cst_470 = arith.constant dense<0.000000e+00> : vector<2x32xf32>
    %638 = tpu.matmul %635, %91, %cst_470 {dimension_numbers = #tpu.dot_dimension_numbers<[1], [0], [0], [1], [0, 0, 1, 1], [], []>} : vector<2x32xbf16>, vector<32x32xbf16>, vector<2x32xf32> -> vector<2x32xf32>
    %639 = arith.addf %637, %638 : vector<2x32xf32>
    %c1_471 = arith.constant 1 : index
    %c1_472 = arith.constant 1 : index
    %c2_473 = arith.constant 2 : index
    %c0_474 = arith.constant 0 : index
    %640 = vector.load %arg10[%c1_471, %c1_472, %c2_473, %c0_474] : memref<2x4x16x32xf32, #tpu.memory_space<vmem>>, vector<1x1x2x32xf32>
    %641 = vector.shape_cast %640 : vector<1x1x2x32xf32> to vector<2x32xf32>
    %cst_475 = arith.constant dense<0.000000e+00> : vector<2x32xf32>
    %642 = tpu.matmul %635, %93, %cst_475 {dimension_numbers = #tpu.dot_dimension_numbers<[1], [0], [0], [1], [0, 0, 1, 1], [], []>} : vector<2x32xbf16>, vector<32x32xbf16>, vector<2x32xf32> -> vector<2x32xf32>
    %643 = arith.addf %641, %642 : vector<2x32xf32>
    %c1_476 = arith.constant 1 : index
    %c2_477 = arith.constant 2 : index
    %c2_478 = arith.constant 2 : index
    %c0_479 = arith.constant 0 : index
    %644 = vector.load %arg10[%c1_476, %c2_477, %c2_478, %c0_479] : memref<2x4x16x32xf32, #tpu.memory_space<vmem>>, vector<1x1x2x32xf32>
    %645 = vector.shape_cast %644 : vector<1x1x2x32xf32> to vector<2x32xf32>
    %cst_480 = arith.constant dense<0.000000e+00> : vector<2x32xf32>
    %646 = tpu.matmul %635, %95, %cst_480 {dimension_numbers = #tpu.dot_dimension_numbers<[1], [0], [0], [1], [0, 0, 1, 1], [], []>} : vector<2x32xbf16>, vector<32x32xbf16>, vector<2x32xf32> -> vector<2x32xf32>
    %647 = arith.addf %645, %646 : vector<2x32xf32>
    %c1_481 = arith.constant 1 : index
    %c3_482 = arith.constant 3 : index
    %c2_483 = arith.constant 2 : index
    %c0_484 = arith.constant 0 : index
    %648 = vector.load %arg10[%c1_481, %c3_482, %c2_483, %c0_484] : memref<2x4x16x32xf32, #tpu.memory_space<vmem>>, vector<1x1x2x32xf32>
    %649 = vector.shape_cast %648 : vector<1x1x2x32xf32> to vector<2x32xf32>
    %cst_485 = arith.constant dense<0.000000e+00> : vector<2x32xf32>
    %650 = tpu.matmul %635, %97, %cst_485 {dimension_numbers = #tpu.dot_dimension_numbers<[1], [0], [0], [1], [0, 0, 1, 1], [], []>} : vector<2x32xbf16>, vector<32x32xbf16>, vector<2x32xf32> -> vector<2x32xf32>
    %651 = arith.addf %649, %650 : vector<2x32xf32>
    %652 = arith.negf %639 : vector<2x32xf32>
    %653 = math.exp %652 : vector<2x32xf32>
    %cst_486 = arith.constant 1.000000e+00 : f32
    %654 = vector.broadcast %cst_486 : f32 to vector<2x32xf32>
    %655 = arith.addf %654, %653 : vector<2x32xf32>
    %656 = arith.divf %654, %655 : vector<2x32xf32>
    %657 = arith.negf %643 : vector<2x32xf32>
    %658 = math.exp %657 : vector<2x32xf32>
    %cst_487 = arith.constant 1.000000e+00 : f32
    %659 = vector.broadcast %cst_487 : f32 to vector<2x32xf32>
    %660 = arith.addf %659, %658 : vector<2x32xf32>
    %661 = arith.divf %659, %660 : vector<2x32xf32>
    %662 = math.tanh %647 : vector<2x32xf32>
    %663 = arith.negf %651 : vector<2x32xf32>
    %664 = math.exp %663 : vector<2x32xf32>
    %cst_488 = arith.constant 1.000000e+00 : f32
    %665 = vector.broadcast %cst_488 : f32 to vector<2x32xf32>
    %666 = arith.addf %665, %664 : vector<2x32xf32>
    %667 = arith.divf %665, %666 : vector<2x32xf32>
    %668 = arith.mulf %661, %588 : vector<2x32xf32>
    %669 = arith.mulf %656, %662 : vector<2x32xf32>
    %670 = arith.addf %668, %669 : vector<2x32xf32>
    %671 = math.tanh %670 : vector<2x32xf32>
    %672 = arith.mulf %667, %671 : vector<2x32xf32>
    %c0_489 = arith.constant 0 : index
    %c1_490 = arith.constant 1 : index
    %c32_491 = arith.constant 32 : index
    %673 = vector.load %arg11[%c0_489, %c1_490, %c32_491] : memref<2x8x64xf32, #tpu.memory_space<vmem>>, vector<2x1x32xf32>
    %674 = vector.shape_cast %673 : vector<2x1x32xf32> to vector<2x32xf32>
    %675 = vector.shape_cast %672 : vector<2x32xf32> to vector<2x1x32xf32>
    tpu.vector_store %arg11[%c0_489, %c1_490, %c32_491], %675 {strides = array<i32>} : memref<2x8x64xf32, #tpu.memory_space<vmem>>, vector<2x1x32xf32>,
    %676 = arith.truncf %631 : vector<2x32xf32> to vector<2x32xbf16>
    %c0_492 = arith.constant 0 : index
    %c0_493 = arith.constant 0 : index
    %c14_494 = arith.constant 14 : index
    %c0_495 = arith.constant 0 : index
    %677 = vector.load %arg10[%c0_492, %c0_493, %c14_494, %c0_495] : memref<2x4x16x32xf32, #tpu.memory_space<vmem>>, vector<1x1x2x32xf32>
    %678 = vector.shape_cast %677 : vector<1x1x2x32xf32> to vector<2x32xf32>
    %cst_496 = arith.constant dense<0.000000e+00> : vector<2x32xf32>
    %679 = tpu.matmul %676, %83, %cst_496 {dimension_numbers = #tpu.dot_dimension_numbers<[1], [0], [0], [1], [0, 0, 1, 1], [], []>} : vector<2x32xbf16>, vector<32x32xbf16>, vector<2x32xf32> -> vector<2x32xf32>
    %680 = arith.addf %678, %679 : vector<2x32xf32>
    %c0_497 = arith.constant 0 : index
    %c1_498 = arith.constant 1 : index
    %c14_499 = arith.constant 14 : index
    %c0_500 = arith.constant 0 : index
    %681 = vector.load %arg10[%c0_497, %c1_498, %c14_499, %c0_500] : memref<2x4x16x32xf32, #tpu.memory_space<vmem>>, vector<1x1x2x32xf32>
    %682 = vector.shape_cast %681 : vector<1x1x2x32xf32> to vector<2x32xf32>
    %cst_501 = arith.constant dense<0.000000e+00> : vector<2x32xf32>
    %683 = tpu.matmul %676, %85, %cst_501 {dimension_numbers = #tpu.dot_dimension_numbers<[1], [0], [0], [1], [0, 0, 1, 1], [], []>} : vector<2x32xbf16>, vector<32x32xbf16>, vector<2x32xf32> -> vector<2x32xf32>
    %684 = arith.addf %682, %683 : vector<2x32xf32>
    %c0_502 = arith.constant 0 : index
    %c2_503 = arith.constant 2 : index
    %c14_504 = arith.constant 14 : index
    %c0_505 = arith.constant 0 : index
    %685 = vector.load %arg10[%c0_502, %c2_503, %c14_504, %c0_505] : memref<2x4x16x32xf32, #tpu.memory_space<vmem>>, vector<1x1x2x32xf32>
    %686 = vector.shape_cast %685 : vector<1x1x2x32xf32> to vector<2x32xf32>
    %cst_506 = arith.constant dense<0.000000e+00> : vector<2x32xf32>
    %687 = tpu.matmul %676, %87, %cst_506 {dimension_numbers = #tpu.dot_dimension_numbers<[1], [0], [0], [1], [0, 0, 1, 1], [], []>} : vector<2x32xbf16>, vector<32x32xbf16>, vector<2x32xf32> -> vector<2x32xf32>
    %688 = arith.addf %686, %687 : vector<2x32xf32>
    %c0_507 = arith.constant 0 : index
    %c3_508 = arith.constant 3 : index
    %c14_509 = arith.constant 14 : index
    %c0_510 = arith.constant 0 : index
    %689 = vector.load %arg10[%c0_507, %c3_508, %c14_509, %c0_510] : memref<2x4x16x32xf32, #tpu.memory_space<vmem>>, vector<1x1x2x32xf32>
    %690 = vector.shape_cast %689 : vector<1x1x2x32xf32> to vector<2x32xf32>
    %cst_511 = arith.constant dense<0.000000e+00> : vector<2x32xf32>
    %691 = tpu.matmul %676, %89, %cst_511 {dimension_numbers = #tpu.dot_dimension_numbers<[1], [0], [0], [1], [0, 0, 1, 1], [], []>} : vector<2x32xbf16>, vector<32x32xbf16>, vector<2x32xf32> -> vector<2x32xf32>
    %692 = arith.addf %690, %691 : vector<2x32xf32>
    %693 = arith.negf %680 : vector<2x32xf32>
    %694 = math.exp %693 : vector<2x32xf32>
    %cst_512 = arith.constant 1.000000e+00 : f32
    %695 = vector.broadcast %cst_512 : f32 to vector<2x32xf32>
    %696 = arith.addf %695, %694 : vector<2x32xf32>
    %697 = arith.divf %695, %696 : vector<2x32xf32>
    %698 = arith.negf %684 : vector<2x32xf32>
    %699 = math.exp %698 : vector<2x32xf32>
    %cst_513 = arith.constant 1.000000e+00 : f32
    %700 = vector.broadcast %cst_513 : f32 to vector<2x32xf32>
    %701 = arith.addf %700, %699 : vector<2x32xf32>
    %702 = arith.divf %700, %701 : vector<2x32xf32>
    %703 = math.tanh %688 : vector<2x32xf32>
    %704 = arith.negf %692 : vector<2x32xf32>
    %705 = math.exp %704 : vector<2x32xf32>
    %cst_514 = arith.constant 1.000000e+00 : f32
    %706 = vector.broadcast %cst_514 : f32 to vector<2x32xf32>
    %707 = arith.addf %706, %705 : vector<2x32xf32>
    %708 = arith.divf %706, %707 : vector<2x32xf32>
    %709 = arith.mulf %702, %629 : vector<2x32xf32>
    %710 = arith.mulf %697, %703 : vector<2x32xf32>
    %711 = arith.addf %709, %710 : vector<2x32xf32>
    %712 = math.tanh %711 : vector<2x32xf32>
    %713 = arith.mulf %708, %712 : vector<2x32xf32>
    %c0_515 = arith.constant 0 : index
    %c7_516 = arith.constant 7 : index
    %c0_517 = arith.constant 0 : index
    %714 = vector.load %arg11[%c0_515, %c7_516, %c0_517] : memref<2x8x64xf32, #tpu.memory_space<vmem>>, vector<2x1x32xf32>
    %715 = vector.shape_cast %714 : vector<2x1x32xf32> to vector<2x32xf32>
    %716 = vector.shape_cast %713 : vector<2x32xf32> to vector<2x1x32xf32>
    tpu.vector_store %arg11[%c0_515, %c7_516, %c0_517], %716 {strides = array<i32>} : memref<2x8x64xf32, #tpu.memory_space<vmem>>, vector<2x1x32xf32>,
    %717 = arith.truncf %672 : vector<2x32xf32> to vector<2x32xbf16>
    %c1_518 = arith.constant 1 : index
    %c0_519 = arith.constant 0 : index
    %c0_520 = arith.constant 0 : index
    %c0_521 = arith.constant 0 : index
    %718 = vector.load %arg10[%c1_518, %c0_519, %c0_520, %c0_521] : memref<2x4x16x32xf32, #tpu.memory_space<vmem>>, vector<1x1x2x32xf32>
    %719 = vector.shape_cast %718 : vector<1x1x2x32xf32> to vector<2x32xf32>
    %cst_522 = arith.constant dense<0.000000e+00> : vector<2x32xf32>
    %720 = tpu.matmul %717, %91, %cst_522 {dimension_numbers = #tpu.dot_dimension_numbers<[1], [0], [0], [1], [0, 0, 1, 1], [], []>} : vector<2x32xbf16>, vector<32x32xbf16>, vector<2x32xf32> -> vector<2x32xf32>
    %721 = arith.addf %719, %720 : vector<2x32xf32>
    %c1_523 = arith.constant 1 : index
    %c1_524 = arith.constant 1 : index
    %c0_525 = arith.constant 0 : index
    %c0_526 = arith.constant 0 : index
    %722 = vector.load %arg10[%c1_523, %c1_524, %c0_525, %c0_526] : memref<2x4x16x32xf32, #tpu.memory_space<vmem>>, vector<1x1x2x32xf32>
    %723 = vector.shape_cast %722 : vector<1x1x2x32xf32> to vector<2x32xf32>
    %cst_527 = arith.constant dense<0.000000e+00> : vector<2x32xf32>
    %724 = tpu.matmul %717, %93, %cst_527 {dimension_numbers = #tpu.dot_dimension_numbers<[1], [0], [0], [1], [0, 0, 1, 1], [], []>} : vector<2x32xbf16>, vector<32x32xbf16>, vector<2x32xf32> -> vector<2x32xf32>
    %725 = arith.addf %723, %724 : vector<2x32xf32>
    %c1_528 = arith.constant 1 : index
    %c2_529 = arith.constant 2 : index
    %c0_530 = arith.constant 0 : index
    %c0_531 = arith.constant 0 : index
    %726 = vector.load %arg10[%c1_528, %c2_529, %c0_530, %c0_531] : memref<2x4x16x32xf32, #tpu.memory_space<vmem>>, vector<1x1x2x32xf32>
    %727 = vector.shape_cast %726 : vector<1x1x2x32xf32> to vector<2x32xf32>
    %cst_532 = arith.constant dense<0.000000e+00> : vector<2x32xf32>
    %728 = tpu.matmul %717, %95, %cst_532 {dimension_numbers = #tpu.dot_dimension_numbers<[1], [0], [0], [1], [0, 0, 1, 1], [], []>} : vector<2x32xbf16>, vector<32x32xbf16>, vector<2x32xf32> -> vector<2x32xf32>
    %729 = arith.addf %727, %728 : vector<2x32xf32>
    %c1_533 = arith.constant 1 : index
    %c3_534 = arith.constant 3 : index
    %c0_535 = arith.constant 0 : index
    %c0_536 = arith.constant 0 : index
    %730 = vector.load %arg10[%c1_533, %c3_534, %c0_535, %c0_536] : memref<2x4x16x32xf32, #tpu.memory_space<vmem>>, vector<1x1x2x32xf32>
    %731 = vector.shape_cast %730 : vector<1x1x2x32xf32> to vector<2x32xf32>
    %cst_537 = arith.constant dense<0.000000e+00> : vector<2x32xf32>
    %732 = tpu.matmul %717, %97, %cst_537 {dimension_numbers = #tpu.dot_dimension_numbers<[1], [0], [0], [1], [0, 0, 1, 1], [], []>} : vector<2x32xbf16>, vector<32x32xbf16>, vector<2x32xf32> -> vector<2x32xf32>
    %733 = arith.addf %731, %732 : vector<2x32xf32>
    %734 = arith.negf %721 : vector<2x32xf32>
    %735 = math.exp %734 : vector<2x32xf32>
    %cst_538 = arith.constant 1.000000e+00 : f32
    %736 = vector.broadcast %cst_538 : f32 to vector<2x32xf32>
    %737 = arith.addf %736, %735 : vector<2x32xf32>
    %738 = arith.divf %736, %737 : vector<2x32xf32>
    %739 = arith.negf %725 : vector<2x32xf32>
    %740 = math.exp %739 : vector<2x32xf32>
    %cst_539 = arith.constant 1.000000e+00 : f32
    %741 = vector.broadcast %cst_539 : f32 to vector<2x32xf32>
    %742 = arith.addf %741, %740 : vector<2x32xf32>
    %743 = arith.divf %741, %742 : vector<2x32xf32>
    %744 = math.tanh %729 : vector<2x32xf32>
    %745 = arith.negf %733 : vector<2x32xf32>
    %746 = math.exp %745 : vector<2x32xf32>
    %cst_540 = arith.constant 1.000000e+00 : f32
    %747 = vector.broadcast %cst_540 : f32 to vector<2x32xf32>
    %748 = arith.addf %747, %746 : vector<2x32xf32>
    %749 = arith.divf %747, %748 : vector<2x32xf32>
    %750 = arith.mulf %743, %670 : vector<2x32xf32>
    %751 = arith.mulf %738, %744 : vector<2x32xf32>
    %752 = arith.addf %750, %751 : vector<2x32xf32>
    %753 = math.tanh %752 : vector<2x32xf32>
    %754 = arith.mulf %749, %753 : vector<2x32xf32>
    %c0_541 = arith.constant 0 : index
    %c0_542 = arith.constant 0 : index
    %c32_543 = arith.constant 32 : index
    %755 = vector.load %arg11[%c0_541, %c0_542, %c32_543] : memref<2x8x64xf32, #tpu.memory_space<vmem>>, vector<2x1x32xf32>
    %756 = vector.shape_cast %755 : vector<2x1x32xf32> to vector<2x32xf32>
    %757 = vector.shape_cast %754 : vector<2x32xf32> to vector<2x1x32xf32>
    tpu.vector_store %arg11[%c0_541, %c0_542, %c32_543], %757 {strides = array<i32>} : memref<2x8x64xf32, #tpu.memory_space<vmem>>, vector<2x1x32xf32>,
    %c0_544 = arith.constant 0 : index
    %c0_545 = arith.constant 0 : index
    %c0_546 = arith.constant 0 : index
    %758 = vector.load %arg11[%c0_544, %c0_545, %c0_546] : memref<2x8x64xf32, #tpu.memory_space<vmem>>, vector<2x8x64xf32>
    %c0_547 = arith.constant 0 : index
    %c0_548 = arith.constant 0 : index
    %c0_549 = arith.constant 0 : index
    %759 = vector.load %arg5[%c0_547, %c0_548, %c0_549] : memref<1x1x64xf32, #tpu.memory_space<vmem>>, vector<1x1x64xf32>
    %760 = vector.broadcast %759 : vector<1x1x64xf32> to vector<2x8x64xf32>
    %761 = arith.mulf %758, %760 : vector<2x8x64xf32>
    %cst_550 = arith.constant dense<0.000000e+00> : vector<2x8xf32>
    %762 = vector.multi_reduction <add>, %761, %cst_550 [2] : vector<2x8x64xf32> to vector<2x8xf32>
    %763 = vector.shape_cast %762 : vector<2x8xf32> to vector<2x8x1xf32>
    %c0_551 = arith.constant 0 : index
    %c0_552 = arith.constant 0 : index
    %764 = vector.load %arg6[%c0_551, %c0_552] : memref<1x1xf32, #tpu.memory_space<vmem>>, vector<1x1xf32>
    %765 = vector.shape_cast %764 : vector<1x1xf32> to vector<1x1x1xf32>
    %766 = vector.broadcast %765 : vector<1x1x1xf32> to vector<2x8x1xf32>
    %767 = arith.addf %763, %766 : vector<2x8x1xf32>
    %768 = arith.negf %767 : vector<2x8x1xf32>
    %769 = math.exp %768 : vector<2x8x1xf32>
    %cst_553 = arith.constant 1.000000e+00 : f32
    %770 = vector.broadcast %cst_553 : f32 to vector<2x8x1xf32>
    %771 = arith.addf %770, %769 : vector<2x8x1xf32>
    %772 = arith.divf %770, %771 : vector<2x8x1xf32>
    %c0_554 = arith.constant 0 : index
    %c0_555 = arith.constant 0 : index
    %c0_556 = arith.constant 0 : index
    %773 = vector.load %arg8[%c0_554, %c0_555, %c0_556] : memref<2x8x1xf32, #tpu.memory_space<vmem>>, vector<2x8x1xf32>
    tpu.vector_store %arg8[%c0_554, %c0_555, %c0_556], %772 {strides = array<i32>} : memref<2x8x1xf32, #tpu.memory_space<vmem>>, vector<2x8x1xf32>,
    %c0_557 = arith.constant 0 : index
    %c0_558 = arith.constant 0 : index
    %c0_559 = arith.constant 0 : index
    %774 = vector.load %arg7[%c0_557, %c0_558, %c0_559] : memref<2x8x1xf32, #tpu.memory_space<vmem>>, vector<2x8x1xf32>
    %775 = math.log %772 : vector<2x8x1xf32>
    %cst_560 = arith.constant -1.000000e+02 : f32
    %776 = vector.broadcast %cst_560 : f32 to vector<2x8x1xf32>
    %777 = arith.maximumf %775, %776 : vector<2x8x1xf32>
    %cst_561 = arith.constant 1.000000e+00 : f32
    %778 = vector.broadcast %cst_561 : f32 to vector<2x8x1xf32>
    %779 = arith.subf %778, %772 : vector<2x8x1xf32>
    %780 = math.log %779 : vector<2x8x1xf32>
    %cst_562 = arith.constant -1.000000e+02 : f32
    %781 = vector.broadcast %cst_562 : f32 to vector<2x8x1xf32>
    %782 = arith.maximumf %780, %781 : vector<2x8x1xf32>
    %783 = arith.mulf %774, %777 : vector<2x8x1xf32>
    %cst_563 = arith.constant 1.000000e+00 : f32
    %784 = vector.broadcast %cst_563 : f32 to vector<2x8x1xf32>
    %785 = arith.subf %784, %774 : vector<2x8x1xf32>
    %786 = arith.mulf %785, %782 : vector<2x8x1xf32>
    %787 = arith.addf %783, %786 : vector<2x8x1xf32>
    %cst_564 = arith.constant 0.000000e+00 : f32
    %788 = vector.broadcast %cst_564 : f32 to vector<2x8x1xf32>
    %789 = arith.subf %788, %787 : vector<2x8x1xf32>
    %790 = vector.shape_cast %789 : vector<2x8x1xf32> to vector<1x2x8x1xf32>
    %cst_565 = arith.constant dense<0.000000e+00> : vector<1xf32>
    %791 = vector.multi_reduction <add>, %790, %cst_565 [1, 2, 3] : vector<1x2x8x1xf32> to vector<1xf32>
    %792 = vector.shape_cast %791 : vector<1xf32> to vector<1x1x1x1xf32>
    %793 = vector.extract %792[0, 0, 0, 0] : f32 from vector<1x1x1x1xf32>
    %cst_566 = arith.constant 1.600000e+01 : f32
    %794 = arith.divf %793, %cst_566 : f32
    %cst_567 = arith.constant 1.000000e+00 : f32
    %795 = vector.broadcast %cst_567 : f32 to vector<1x1xf32>
    %796 = vector.broadcast %794 : f32 to vector<1x1xf32>
    %797 = arith.mulf %796, %795 : vector<1x1xf32>
    %c0_568 = arith.constant 0 : index
    %c0_569 = arith.constant 0 : index
    %798 = vector.load %arg9[%c0_568, %c0_569] : memref<1x1xf32, #tpu.memory_space<vmem>>, vector<1x1xf32>
    tpu.vector_store %arg9[%c0_568, %c0_569], %797 {strides = array<i32>} : memref<1x1xf32, #tpu.memory_space<vmem>>, vector<1x1xf32>,
    return
  }
  func.func @transform_0(%arg0: i32) -> (i32, i32) {
    %c0_i32 = arith.constant 0 : i32
    %c0_i32_0 = arith.constant 0 : i32
    %c0_i32_1 = arith.constant 0 : i32
    return %c0_i32, %c0_i32_0 : i32, i32
  }
  func.func @transform_1(%arg0: i32) -> (i32, i32, i32, i32) {
    %c0_i32 = arith.constant 0 : i32
    %c0_i32_0 = arith.constant 0 : i32
    %c0_i32_1 = arith.constant 0 : i32
    %c0_i32_2 = arith.constant 0 : i32
    %c0_i32_3 = arith.constant 0 : i32
    return %c0_i32, %c0_i32_0, %c0_i32_1, %c0_i32_2 : i32, i32, i32, i32
  }
  func.func @transform_2(%arg0: i32) -> (i32, i32, i32, i32) {
    %c0_i32 = arith.constant 0 : i32
    %c0_i32_0 = arith.constant 0 : i32
    %c0_i32_1 = arith.constant 0 : i32
    %c0_i32_2 = arith.constant 0 : i32
    %c0_i32_3 = arith.constant 0 : i32
    return %c0_i32, %c0_i32_0, %c0_i32_1, %c0_i32_2 : i32, i32, i32, i32
  }
  func.func @transform_3(%arg0: i32) -> (i32, i32, i32, i32) {
    %c0_i32 = arith.constant 0 : i32
    %c0_i32_0 = arith.constant 0 : i32
    %c0_i32_1 = arith.constant 0 : i32
    %c0_i32_2 = arith.constant 0 : i32
    %c0_i32_3 = arith.constant 0 : i32
    return %c0_i32, %c0_i32_0, %c0_i32_1, %c0_i32_2 : i32, i32, i32, i32
  }
  func.func @transform_4(%arg0: i32) -> (i32, i32, i32) {
    %c0_i32 = arith.constant 0 : i32
    %c0_i32_0 = arith.constant 0 : i32
    %c0_i32_1 = arith.constant 0 : i32
    %c0_i32_2 = arith.constant 0 : i32
    return %c0_i32, %c0_i32_0, %c0_i32_1 : i32, i32, i32
  }
  func.func @transform_5(%arg0: i32) -> (i32, i32) {
    %c0_i32 = arith.constant 0 : i32
    %c0_i32_0 = arith.constant 0 : i32
    %c0_i32_1 = arith.constant 0 : i32
    return %c0_i32, %c0_i32_0 : i32, i32
  }
  func.func @transform_6(%arg0: i32) -> (i32, i32, i32) {
    %c0_i32 = arith.constant 0 : i32
    %c0_i32_0 = arith.constant 0 : i32
    %c0_i32_1 = arith.constant 0 : i32
    %c0_i32_2 = arith.constant 0 : i32
    return %c0_i32, %c0_i32_0, %c0_i32_1 : i32, i32, i32
  }
  func.func @transform_7(%arg0: i32) -> (i32, i32, i32) {
    %c0_i32 = arith.constant 0 : i32
    %c0_i32_0 = arith.constant 0 : i32
    %c0_i32_1 = arith.constant 0 : i32
    %c0_i32_2 = arith.constant 0 : i32
    return %c0_i32, %c0_i32_0, %c0_i32_1 : i32, i32, i32
  }
  func.func @transform_8(%arg0: i32) -> (i32, i32) {
    %c0_i32 = arith.constant 0 : i32
    %c0_i32_0 = arith.constant 0 : i32
    %c0_i32_1 = arith.constant 0 : i32
    return %c0_i32, %c0_i32_0 : i32, i32
  }
}

</mosaic_0001>

<bundles_post_ra>
// kernel: _forward.2
= control target key start
LH: loop header
LB: loop body
LE: loop exit
PB: predicated region body
PF: predicated region fallthrough
CT: control target
= control target key end

     0   :  { %s2922_s21 = smov 0   ;;  %s3222_s0 = inlined_call_operand.vmem [shape: f32[16,32], index: 0, kind: input, shape index: {}]   ;;  %s3223_s1 = inlined_call_operand.vmem [shape: f32[2,1,32], index: 1, kind: input, shape index: {}]   ;;  %s3224_s2 = inlined_call_operand.vmem [shape: bf16[2,32,96], index: 2, kind: input, shape index: {}]   ;;  %s3225_s3 = inlined_call_operand.vmem [shape: f32[2,1,96], index: 3, kind: input, shape index: {}]   ;;  %s3226_s4 = inlined_call_operand.vmem [shape: bf16[2,32,32], index: 4, kind: input, shape index: {}]   ;;  %s3227_s5 = inlined_call_operand.vmem [shape: f32[2,1,32], index: 5, kind: input, shape index: {}]   ;;  %s3228_s6 = inlined_call_operand.vmem [shape: f32[2,2,1,32], index: 6, kind: input, shape index: {}]   ;;  %s3229_s7 = inlined_call_operand.vmem [shape: bf16[2,32,64], index: 7, kind: input, shape index: {}]   ;;  %s3230_s8 = inlined_call_operand.vmem [shape: f32[2,1,64], index: 8, kind: input, shape index: {}]   ;;  %s3231_s9 = inlined_call_operand.vmem [shape: bf16[2,64,32], index: 9, kind: input, shape index: {}]   ;;  %s3232_s10 = inlined_call_operand.vmem [shape: f32[2,1,32], index: 10, kind: input, shape index: {}]   ;;  %s3233_s11 = inlined_call_operand.vmem [shape: f32[2,2,1,32], index: 11, kind: input, shape index: {}]   ;;  %s3234_s12 = inlined_call_operand.vmem [shape: f32[16,32], index: 12, kind: output, shape index: {}]  }
   0x1   :  { %3237 = sst [smem:[#allocation4_spill]] %s3224_s2 }
   0x2   :  { %3238 = sst [smem:[#allocation5_spill]] %s3226_s4 }
   0x3   :  { %3239 = sst [smem:[#allocation6_spill]] %s3228_s6 }
   0x4   :  { %3240 = sst [smem:[#allocation7_spill]] %s3234_s12 }
   0x5 LB: > { %3241 = sst [smem:[#allocation3_spill]] %s2839_s21  ;;  %s2928_s22 = sadd.s32 4294967295, %s2839_s21   ;;  %s2839_s21 = sphi %s2922_s21, %s22_s21  }
   0x6   : > { %p2504_p0 = scmp.ge.s32.totalorder %s2839_s21, 1  ;;  %p437_p1 = scmp.lt.s32.totalorder %s2839_s21, 3 }
   0x8   : > { %p438_p2 = pnand %p2504_p0, %p437_p1 }
   0x9   : > { %p509_p3 = scmp.lt.s32.totalorder (!%p438_p2), %s2928_s22, 1  ;;  %s3242_s2 = sld [smem:[#allocation4_spill]] (!%p438_p2) }
   0xa   : > { %441 = sbr.rel (%p438_p2) target bundleno = 4450 (0x1162), region = 68  ;;  %s3243_s4 = sld [smem:[#allocation5_spill]] (!%p438_p2) }
   0xb   : > { %s3244_s6 = sld [smem:[#allocation6_spill]] (!%p438_p2)  ;;  %p2515_p4 = scmp.ne.s32.totalorder (!%p438_p2), %s2928_s22, 0 }
  0x11   : > { %s2934_s23 = scalar_select %p509_p3, %s2928_s22, 1 }
  0x12   : > { %553 = sbr.rel (%p2515_p4) target bundleno = 337 (0x151), region = 72  ;;  %v554_v0 = vld [vmem:[%s3222_s0] sm:$0xff] (!%p2515_p4)  ;;  %vm559_vm0 = vcmask (!%p2515_p4), 261120   ;;  %v555_v1 = vld [vmem:[%s3222_s0 + $0x8] sm:$0xff] (!%p2515_p4) }
  0x13   : > { %s2570_s24 = sshll.u32 %s2934_s23, 4  ;;  %s2509_s19 = sshll.u32 %s2934_s23, 1  ;;  %v560_v2 = vsel (!%p2515_p4), %vm559_vm0, %v554_v0, 0.0  ;;  %v563_v3 = vsel (!%p2515_p4), %vm559_vm0, %v555_v1, 0.0  ;;  %v2517_v21 = vld [vmem:[%s3223_s1] ss:$0 sm:$0xff] (!%p2515_p4) }
  0x14   : > { %s2944_s30 = scalar_lea.vmem %s3242_s2, %s2570_s24  ;;  %s2949_s15 = scalar_lea.vmem %s3243_s4, %s2570_s24  ;;  %561 = vadd.xlane.f32.xlu0 (!%p2515_p4), %v560_v2  ;;  %v2518_v23 = vld [vmem:[%s3223_s1 + $0x1] ss:$0 sm:$0xff] (!%p2515_p4) }
  0x15   : > { %s2959_s25 = scalar_lea.vmem %s3244_s6, %s2509_s19  ;;  %s2964_s28 = scalar_lea.vmem %s3229_s7, %s2570_s24 }
  0x16   : > { %s536_s13 = scalar_lea.vmem %s3230_s8, %s2934_s23  ;;  %s2573_s14 = sshll.u32 %s2934_s23, 5 }
  0x17   : > { %s2974_s16 = scalar_lea.vmem %s3231_s9, %s2573_s14  ;;  %s544_s21 = scalar_lea.vmem %s3232_s10, %s2934_s23 }
  0x18   : > { %s2983_s27 = scalar_lea.vmem %s3233_s11, %s2509_s19  ;;  %564 = vadd.xlane.f32.xlu0 (!%p2515_p4), %v563_v3 }
  0xa1   : > { %v562_v4 = vpop.xlane.xlu0 %561 }
  0xa2   : > { %v567_v5 = vmul.f32 0.03125, %v562_v4 }
  0xa4   : > { %v569_v6 = vsub.f32 %v554_v0, %v567_v5 }
  0xa5   : > { %v565_v7 = vpop.xlane.xlu0 %564 }
  0xa6   : > { %v568_v8 = vmul.f32 0.03125, %v565_v7  ;;  %v571_v9 = vmul.f32 %v569_v6, %v569_v6 }
  0xa8   : > { %v570_v10 = vsub.f32 %v555_v1, %v568_v8  ;;  %v573_v11 = vsel %vm559_vm0, %v571_v9, 0.0 }
  0xa9   : > { %574 = vadd.xlane.f32.xlu1 %v573_v11 }
  0xaa   : > { %v572_v12 = vmul.f32 %v570_v10, %v570_v10 }
  0xac   : > { %v576_v13 = vsel %vm559_vm0, %v572_v12, 0.0 }
  0xad   : > { %577 = vadd.xlane.f32.xlu1 %v576_v13 }
 0x136   : > { %v575_v14 = vpop.xlane.xlu1 %574 }
 0x137   : > { %v579_v15 = vmul.f32 0.03125, %v575_v14 }
 0x139   : > { %v581_v16 = vadd.f32 1e-12, %v579_v15 }
 0x13a   : > { %v578_v17 = vpop.xlane.xlu1 %577 }
 0x13b   : > { %2760 = vrsqrt.f32 %v581_v16  ;;  %v580_v18 = vmul.f32 0.03125, %v578_v17 }
 0x13d   : > { %v582_v19 = vadd.f32 1e-12, %v580_v18 }
 0x13f   : > { %2762 = vrsqrt.f32 %v582_v19 }
 0x145   : > { %v2761_v20 = vpop.eup %2760 }
 0x146   : > { %v585_v22 = vmul.f32 %v2761_v20, %v569_v6 }
 0x148   : > { %v593_v24 = vmul.f32 %v2517_v21, %v585_v22 }
 0x149   : > { %v2763_v25 = vpop.eup %2762 }
 0x14a   : > { %v601_v26 = vadd.f32 %v2518_v23, %v593_v24  ;;  %v586_v27 = vmul.f32 %v2763_v25, %v570_v10 }
 0x14c   : > { %603 = vst.msk [vmem:[#allocation2] sm:$0xff] %vm559_vm0, %v601_v26  ;;  %v594_v28 = vmul.f32 %v2517_v21, %v586_v27 }
 0x14e   : > { %v602_v29 = vadd.f32 %v2518_v23, %v594_v28 }
 0x150   : > { %604 = vst.msk [vmem:[#allocation2 + $0x8] sm:$0xff] %vm559_vm0, %v602_v29 }
 0x151 PF: > { %v2779_v30 = vld [vmem:[%s2944_s30] sm:$0xff]   ;;  %v2841_v31 = vmov 0.0   ;;  %v2780_v32 = vld [vmem:[%s2944_s30 + $0x8] sm:$0xff]   ;;  %vm2842_vm1 = vmmov 0   ;;  %vm631_vm2 = vcmask 261120   ;;  %s3245_s14 = scalar_lea.vmem %s3225_s3, %s2934_s23  ;;  %s2843_s17 = smov 96  }
 0x152   : > { %2620 = vmatprep.subr.bf16.mxu0 %v2841_v31  ;;  %2633 = vmatprep.subr.mxu1 %v2841_v31  ;;  %v2519_v36 = vld [vmem:[%s3245_s14] ss:$0 sm:$0xff]  ;;  %vm679_vm3 = vcmask 64512   ;;  %s2844_s20 = smov 64   ;;  %s2845_s2 = smov 88   ;;  %vm2029_vm4 = vcmask 130048  }
 0x153   : > { %2621 = vmatpush3.bf16.msra.mxu0 %v2779_v30  ;;  %2624 = vmatprep.mubr.msk.bf16.mxu0 %vm2842_vm1, %v2841_v31  ;;  %v3010_v33 = vld [vmem:[#allocation2] sm:$0xff]  ;;  %s2846_s24 = smov 120   ;;  %s2847_s4 = smov 56   ;;  %vm2032_vm5 = vcmask 195584   ;;  %vm2277_vm6 = vcmask 523264  }
 0x154   : > { %2622 = vmatprep.subr.bf16.mxu0 %v2841_v31  ;;  %2635 = vmatprep.mubr.msk.f32.mxu1 %vm2842_vm1, %v2841_v31  ;;  %s2848_s12 = smov 80   ;;  %s2849_s6 = smov 112  }
 0x155   : > { %s2850_s18 = smov 48   ;;  %s2851_s19 = smov 72  }
 0x156   : > { %s2852_s26 = smov 104   ;;  %s2853_s30 = smov 40  }
 0x157   : > { %v3012_v34 = vld [vmem:[#allocation2 + $0x8] sm:$0xff]  ;;  %2623 = vmatpush3.bf16.msra.mxu0 %v2780_v32  ;;  %s2854_s29 = smov 8   ;;  %s2855_s14 = smov 16  }
 0x158   : > { %v607_v35 = vpack.c.bf16 %v3012_v34, %v3010_v33  ;;  %2628 = vmatprep.subr.mxu0 %v2841_v31  ;;  %p2567_p5 = scmp.ne.s32.totalorder %s2928_s22, 1 }
 0x15a   : > { %2625 = vmatmul.mubr.msk.bf16.vlgmr.msra.gmra.mrb[0].mxu0 %vm631_vm2, %v607_v35 }
 0x15b   : > { %2630 = vmatprep.mubr.msk.f32.mxu0 %vm2842_vm1, %v2841_v31 }
 0x22d   : > { %v669_v37 = vpop.f32.mrb[0].mxu0 }
 0x22e   : > { %v3028_v38 = vadd.f32 %v2519_v36, %v669_v37  ;;  %v2626_v39 = vpop.f32.mrb[1].mxu0 }
 0x22f   : > { %v672_v40 = vpop.f32.mrb[2].mxu0 }
 0x230   : > { %677 = vrot.lane.b32.xlu0 %v3028_v38, %s2843_s17  ;;  %v2627_v41 = vpop.f32.mrb[3].mxu0  ;;  %v3031_v42 = vadd.f32 %v2519_v36, %v672_v40 }
 0x234   : > { %755 = vrot.lane.b32.xlu0 %v3031_v42, %s2843_s17  ;;  %s2856_s17 = smov 24  }
 0x2a2   : > { %v678_v43 = vpop.permute.xlu0 %677 }
 0x2a3   : > { %2629 = vmatpush3.xpose.msk.msra.mxu0 %vm679_vm3, %v678_v43 }
 0x2a4   : > { %2643 = vmatprep.subr.mxu0 %v2841_v31 }
 0x2a6   : > { %2631 = vmatmul.mubr.msk.f32.vlgmr.msra.gmra.mrb[4].mxu0 %vm679_vm3, %v3028_v38  ;;  %v756_v44 = vpop.permute.xlu0 %755 }
 0x2a7   : > { %2634 = vmatpush3.xpose.msk.msra.mxu1 %vm679_vm3, %v756_v44  ;;  %2645 = vmatprep.mubr.msk.f32.mxu0 %vm2842_vm1, %v2841_v31 }
 0x2a8   : > { %2638 = vmatprep.subr.mxu1 %v2841_v31 }
 0x2aa   : > { %2636 = vmatmul.mubr.msk.f32.vlgmr.msra.gmra.mrb[0].mxu1 %vm679_vm3, %v3031_v42 }
 0x2ab   : > { %2640 = vmatprep.mubr.msk.f32.mxu1 %vm2842_vm1, %v2841_v31 }
 0x379   : > { %v750_v45 = vpop.f32.mrb[4].mxu0 }
 0x37a   : > { %v831_v46 = vmul.f32 0.35355338, %v750_v45  ;;  %v2632_v47 = vpop.f32.mrb[5].mxu0 }
 0x37c   : > { %v833_v48 = vsel %vm679_vm3, %v831_v46, -inf }
 0x37d   : > { %v827_v49 = vpop.f32.mrb[0].mxu1  ;;  %834 = vmax.xlane.f32.xlu1 %v833_v48 }
 0x37e   : > { %v832_v50 = vmul.f32 0.35355338, %v827_v49  ;;  %v2637_v51 = vpop.f32.mrb[1].mxu1 }
 0x380   : > { %v836_v52 = vsel %vm679_vm3, %v832_v50, -inf }
 0x381   : > { %837 = vmax.xlane.f32.xlu1 %v836_v52 }
 0x392   : > { %855 = vrot.lane.b32.xlu1 %v3028_v38, %s2844_s20 }
 0x396   : > { %931 = vrot.lane.b32.xlu1 %v3031_v42, %s2844_s20 }
 0x39a   : > { %1009 = vrot.lane.b32.xlu1 %v3028_v38, %s2845_s2 }
 0x39e   : > { %1087 = vrot.lane.b32.xlu1 %v3031_v42, %s2845_s2  ;;  %s3246_s2 = scalar_lea.vmem %s3227_s5, %s2934_s23 }
 0x40a   : > { %v835_v53 = vpop.xlane.xlu1 %834 }
 0x40b   : > { %v839_v54 = vsub.f32 %v831_v46, %v835_v53 }
 0x40d   : > { %v841_v55 = vmul.f32 1.442695, %v839_v54 }
 0x40e   : > { %v838_v56 = vpop.xlane.xlu1 %837 }
 0x40f   : > { %2789 = vpow2.f32 %v841_v55  ;;  %v840_v57 = vsub.f32 %v832_v50, %v838_v56 }
 0x411   : > { %v843_v58 = vmul.f32 1.442695, %v840_v57 }
 0x412   : > { %v856_v59 = vpop.permute.xlu1 %855 }
 0x413   : > { %2791 = vpow2.f32 %v843_v58  ;;  %2639 = vmatpush3.msra.mxu1 %v856_v59 }
 0x414   : > { %2648 = vmatprep.subr.mxu1 %v2841_v31 }
 0x416   : > { %v932_v60 = vpop.permute.xlu1 %931 }
 0x417   : > { %2644 = vmatpush3.msra.mxu0 %v932_v60 }
 0x418   : > { %2653 = vmatprep.subr.mxu0 %v2841_v31 }
 0x419   : > { %v2790_v61 = vpop.eup %2789 }
 0x41a   : > { %v845_v62 = vsel %vm679_vm3, %v2790_v61, 0.0  ;;  %v1010_v1 = vpop.permute.xlu1 %1009 }
 0x41b   : > { %846 = vadd.xlane.f32.xlu0 %v845_v62 }
 0x41d   : > { %v2792_v63 = vpop.eup %2791 }
 0x41e   : > { %v848_v0 = vsel %vm679_vm3, %v2792_v63, 0.0  ;;  %v1088_v2 = vpop.permute.xlu1 %1087 }
 0x41f   : > { %849 = vadd.xlane.f32.xlu1 %v848_v0 }
 0x430   : > { %1085 = vrot.lane.b32.xlu1 %v3031_v42, %s2846_s24 }
 0x431   : > { %1007 = vrot.lane.b32.xlu0 %v3028_v38, %s2846_s24  ;;  %s3247_s24 = sld [smem:[#allocation7_spill]] (!%p2567_p5) }
 0x4a8   : > { %v847_v3 = vpop.xlane.xlu0 %846 }
 0x4a9   : > { %2793 = vrcp.f32 %v847_v3 }
 0x4ac   : > { %v850_v4 = vpop.xlane.xlu1 %849  ;;  %v1008_v9 = vpop.permute.xlu0 %1007 }
 0x4ad   : > { %2795 = vrcp.f32 %v850_v4 }
 0x4b0   : > { %v1086_v10 = vpop.permute.xlu1 %1085 }
 0x4b3   : > { %v2794_v5 = vpop.eup %2793 }
 0x4b4   : > { %v853_v6 = vmul.f32 %v2794_v5, %v2790_v61 }
 0x4b6   : > { %2641 = vmatmul.mubr.msk.f32.vlgmr.msra.gmra.mrb[2].mxu1 %vm679_vm3, %v853_v6 }
 0x4b7   : > { %v2796_v7 = vpop.eup %2795  ;;  %2649 = vmatpush3.xpose.msk.msra.mxu1 %vm679_vm3, %v1010_v1  ;;  %2650 = vmatprep.mubr.msk.f32.mxu1 %vm2842_vm1, %v2841_v31 }
 0x4b8   : > { %v854_v8 = vmul.f32 %v2796_v7, %v2792_v63  ;;  %2658 = vmatprep.subr.mxu1 %v2841_v31 }
 0x4ba   : > { %2646 = vmatmul.mubr.msk.f32.vlgmr.msra.gmra.mrb[6].mxu0 %vm679_vm3, %v854_v8  ;;  %2651 = vmatmul.mubr.msk.f32.vlgmr.msra.gmra.mrb[4].mxu1 %vm679_vm3, %v1008_v9 }
 0x4bb   : > { %2654 = vmatpush3.xpose.msk.msra.mxu0 %vm679_vm3, %v1088_v2  ;;  %2655 = vmatprep.mubr.msk.f32.mxu0 %vm2842_vm1, %v2841_v31 }
 0x4bc   : > { %2663 = vmatprep.subr.mxu0 %v2841_v31  ;;  %2660 = vmatprep.mubr.msk.f32.mxu1 %vm2842_vm1, %v2841_v31 }
 0x4be   : > { %2656 = vmatmul.mubr.msk.f32.vlgmr.msra.gmra.mrb[8].mxu0 %vm679_vm3, %v1086_v10 }
 0x4bf   : > { %2665 = vmatprep.mubr.msk.f32.mxu0 %vm2842_vm1, %v2841_v31 }
 0x589   : > { %v3074_v11 = vpop.f32.mrb[2].mxu1 }
 0x58a   : > { %v2642_v12 = vpop.f32.mrb[3].mxu1 }
 0x58d   : > { %v3076_v13 = vpop.f32.mrb[6].mxu0  ;;  %v1081_v14 = vpop.f32.mrb[4].mxu1 }
 0x58e   : > { %v1163_v15 = vmul.f32 0.35355338, %v1081_v14  ;;  %v2647_v16 = vpop.f32.mrb[7].mxu0  ;;  %v2652_v17 = vpop.f32.mrb[5].mxu1 }
 0x590   : > { %v1165_v18 = vsel %vm679_vm3, %v1163_v15, -inf }
 0x591   : > { %1166 = vmax.xlane.f32.xlu1 %v1165_v18  ;;  %v1159_v19 = vpop.f32.mrb[8].mxu0 }
 0x592   : > { %v1164_v20 = vmul.f32 0.35355338, %v1159_v19  ;;  %v2657_v21 = vpop.f32.mrb[9].mxu0 }
 0x594   : > { %v1168_v22 = vsel %vm679_vm3, %v1164_v20, -inf }
 0x595   : > { %1169 = vmax.xlane.f32.xlu0 %v1168_v22 }
 0x5a2   : > { %1187 = vrot.lane.b32.xlu1 %v3028_v38, %s2847_s4 }
 0x5a6   : > { %1341 = vrot.lane.b32.xlu1 %v3028_v38, %s2848_s12 }
 0x5aa   : > { %1419 = vrot.lane.b32.xlu1 %v3031_v42, %s2848_s12 }
 0x5ab   : > { %1263 = vrot.lane.b32.xlu0 %v3031_v42, %s2847_s4 }
 0x5af   : > { %1339 = vrot.lane.b32.xlu0 %v3028_v38, %s2849_s6 }
 0x61e   : > { %v1167_v23 = vpop.xlane.xlu1 %1166 }
 0x61f   : > { %v1171_v24 = vsub.f32 %v1163_v15, %v1167_v23 }
 0x621   : > { %v1173_v25 = vmul.f32 1.442695, %v1171_v24 }
 0x622   : > { %v1188_v26 = vpop.permute.xlu1 %1187  ;;  %v1170_v27 = vpop.xlane.xlu0 %1169 }
 0x623   : > { %2797 = vpow2.f32 %v1173_v25  ;;  %v1172_v28 = vsub.f32 %v1164_v20, %v1170_v27  ;;  %2659 = vmatpush3.msra.mxu1 %v1188_v26 }
 0x624   : > { %2668 = vmatprep.subr.mxu1 %v2841_v31 }
 0x625   : > { %v1175_v29 = vmul.f32 1.442695, %v1172_v28 }
 0x626   : > { %v1264_v30 = vpop.permute.xlu0 %1263  ;;  %v1342_v39 = vpop.permute.xlu1 %1341 }
 0x627   : > { %2799 = vpow2.f32 %v1175_v29  ;;  %2664 = vmatpush3.msra.mxu0 %v1264_v30 }
 0x628   : > { %2673 = vmatprep.subr.mxu0 %v2841_v31 }
 0x62a   : > { %v1420_v40 = vpop.permute.xlu1 %1419  ;;  %v1340_v48 = vpop.permute.xlu0 %1339 }
 0x62d   : > { %v2798_v32 = vpop.eup %2797 }
 0x62e   : > { %v1177_v35 = vsel %vm679_vm3, %v2798_v32, 0.0 }
 0x62f   : > { %1178 = vadd.xlane.f32.xlu1 %v1177_v35 }
 0x631   : > { %v2800_v36 = vpop.eup %2799 }
 0x632   : > { %v1180_v37 = vsel %vm679_vm3, %v2800_v36, 0.0 }
 0x633   : > { %1181 = vadd.xlane.f32.xlu1 %v1180_v37 }
 0x644   : > { %1417 = vrot.lane.b32.xlu1 %v3031_v42, %s2849_s6 }
 0x6bc   : > { %v1179_v41 = vpop.xlane.xlu1 %1178 }
 0x6bd   : > { %2801 = vrcp.f32 %v1179_v41 }
 0x6c0   : > { %v1182_v43 = vpop.xlane.xlu1 %1181 }
 0x6c1   : > { %2803 = vrcp.f32 %v1182_v43 }
 0x6c4   : > { %v1418_v49 = vpop.permute.xlu1 %1417 }
 0x6c7   : > { %v2802_v44 = vpop.eup %2801 }
 0x6c8   : > { %v1185_v45 = vmul.f32 %v2802_v44, %v2798_v32 }
 0x6ca   : > { %2661 = vmatmul.mubr.msk.f32.vlgmr.msra.gmra.mrb[6].mxu1 %vm679_vm3, %v1185_v45 }
 0x6cb   : > { %v2804_v46 = vpop.eup %2803  ;;  %2669 = vmatpush3.xpose.msk.msra.mxu1 %vm679_vm3, %v1342_v39  ;;  %2670 = vmatprep.mubr.msk.f32.mxu1 %vm2842_vm1, %v2841_v31 }
 0x6cc   : > { %v1186_v47 = vmul.f32 %v2804_v46, %v2800_v36  ;;  %2678 = vmatprep.subr.mxu1 %v2841_v31 }
 0x6ce   : > { %2666 = vmatmul.mubr.msk.f32.vlgmr.msra.gmra.mrb[10].mxu0 %vm679_vm3, %v1186_v47  ;;  %2671 = vmatmul.mubr.msk.f32.vlgmr.msra.gmra.mrb[8].mxu1 %vm679_vm3, %v1340_v48 }
 0x6cf   : > { %2674 = vmatpush3.xpose.msk.msra.mxu0 %vm679_vm3, %v1420_v40  ;;  %2675 = vmatprep.mubr.msk.f32.mxu0 %vm2842_vm1, %v2841_v31 }
 0x6d0   : > { %2683 = vmatprep.subr.mxu0 %v2841_v31  ;;  %2680 = vmatprep.mubr.msk.f32.mxu1 %vm2842_vm1, %v2841_v31 }
 0x6d2   : > { %2676 = vmatmul.mubr.msk.f32.vlgmr.msra.gmra.mrb[12].mxu0 %vm679_vm3, %v1418_v49 }
 0x6d3   : > { %2685 = vmatprep.mubr.msk.f32.mxu0 %vm2842_vm1, %v2841_v31 }
 0x79d   : > { %v3106_v50 = vpop.f32.mrb[6].mxu1 }
 0x79e   : > { %v2662_v51 = vpop.f32.mrb[7].mxu1 }
 0x7a1   : > { %v3108_v52 = vpop.f32.mrb[10].mxu0  ;;  %v1413_v53 = vpop.f32.mrb[8].mxu1 }
 0x7a2   : > { %v2764_v54 = vpack.i.bf16 %v3108_v52, %v3106_v50  ;;  %v1495_v55 = vmul.f32 0.35355338, %v1413_v53  ;;  %v2667_v56 = vpop.f32.mrb[11].mxu0  ;;  %v2672_v57 = vpop.f32.mrb[9].mxu1 }
 0x7a4   : > { %v1497_v58 = vsel %vm679_vm3, %v1495_v55, -inf }
 0x7a5   : > { %1498 = vmax.xlane.f32.xlu0 %v1497_v58  ;;  %v1491_v59 = vpop.f32.mrb[12].mxu0  ;;  %v2782_v58 = vld [vmem:[%s2949_s15 + $0x8] sm:$0xff]  }
 0x7a6   : > { %v1496_v60 = vmul.f32 0.35355338, %v1491_v59  ;;  %v2677_v61 = vpop.f32.mrb[13].mxu0 }
 0x7a8   : > { %v1500_v62 = vsel %vm679_vm3, %v1496_v60, -inf }
 0x7a9   : > { %1501 = vmax.xlane.f32.xlu1 %v1500_v62 }
 0x7ba   : > { %1519 = vrot.lane.b32.xlu1 %v3028_v38, %s2850_s18 }
 0x7bb   : > { %1595 = vrot.lane.b32.xlu0 %v3031_v42, %s2850_s18 }
 0x7be   : > { %1673 = vrot.lane.b32.xlu1 %v3028_v38, %s2851_s19 }
 0x7c2   : > { %1751 = vrot.lane.b32.xlu1 %v3031_v42, %s2851_s19 }
 0x7c6   : > { %1749 = vrot.lane.b32.xlu1 %v3031_v42, %s2852_s26 }
 0x832   : > { %v1499_v63 = vpop.xlane.xlu0 %1498 }
 0x833   : > { %v1503_v0 = vsub.f32 %v1495_v55, %v1499_v63 }
 0x835   : > { %v1505_v1 = vmul.f32 1.442695, %v1503_v0 }
 0x836   : > { %v1596_v2 = vpop.permute.xlu0 %1595  ;;  %v1502_v3 = vpop.xlane.xlu1 %1501 }
 0x837   : > { %2805 = vpow2.f32 %v1505_v1  ;;  %v1504_v4 = vsub.f32 %v1496_v60, %v1502_v3  ;;  %2684 = vmatpush3.msra.mxu0 %v1596_v2 }
 0x838   : > { %2693 = vmatprep.subr.mxu0 %v2841_v31 }
 0x839   : > { %v1507_v5 = vmul.f32 1.442695, %v1504_v4 }
 0x83a   : > { %v1520_v6 = vpop.permute.xlu1 %1519 }
 0x83b   : > { %2807 = vpow2.f32 %v1507_v5  ;;  %2679 = vmatpush3.msra.mxu1 %v1520_v6 }
 0x83c   : > { %2688 = vmatprep.subr.mxu1 %v2841_v31 }
 0x83e   : > { %v1674_v15 = vpop.permute.xlu1 %1673 }
 0x841   : > { %v2806_v7 = vpop.eup %2805 }
 0x842   : > { %v1509_v8 = vsel %vm679_vm3, %v2806_v7, 0.0  ;;  %v1752_v19 = vpop.permute.xlu1 %1751 }
 0x843   : > { %1510 = vadd.xlane.f32.xlu0 %v1509_v8 }
 0x845   : > { %v2808_v9 = vpop.eup %2807 }
 0x846   : > { %v1512_v10 = vsel %vm679_vm3, %v2808_v9, 0.0  ;;  %v1750_v22 = vpop.permute.xlu1 %1749 }
 0x847   : > { %1513 = vadd.xlane.f32.xlu0 %v1512_v10 }
 0x85d   : > { %1671 = vrot.lane.b32.xlu0 %v3028_v38, %s2852_s26 }
 0x8d0   : > { %v1511_v12 = vpop.xlane.xlu0 %1510 }
 0x8d1   : > { %2809 = vrcp.f32 %v1511_v12 }
 0x8d4   : > { %v1514_v14 = vpop.xlane.xlu0 %1513 }
 0x8d5   : > { %2811 = vrcp.f32 %v1514_v14 }
 0x8d8   : > { %v1672_v21 = vpop.permute.xlu0 %1671 }
 0x8db   : > { %v2810_v16 = vpop.eup %2809 }
 0x8dc   : > { %v1517_v17 = vmul.f32 %v2810_v16, %v2806_v7 }
 0x8de   : > { %2681 = vmatmul.mubr.msk.f32.vlgmr.msra.gmra.mrb[10].mxu1 %vm679_vm3, %v1517_v17 }
 0x8df   : > { %v2812_v18 = vpop.eup %2811  ;;  %2689 = vmatpush3.xpose.msk.msra.mxu1 %vm679_vm3, %v1674_v15  ;;  %2690 = vmatprep.mubr.msk.f32.mxu1 %vm2842_vm1, %v2841_v31 }
 0x8e0   : > { %v1518_v20 = vmul.f32 %v2812_v18, %v2808_v9  ;;  %2698 = vmatprep.subr.mxu1 %v2841_v31 }
 0x8e2   : > { %2686 = vmatmul.mubr.msk.f32.vlgmr.msra.gmra.mrb[14].mxu0 %vm679_vm3, %v1518_v20  ;;  %2691 = vmatmul.mubr.msk.f32.vlgmr.msra.gmra.mrb[12].mxu1 %vm679_vm3, %v1672_v21 }
 0x8e3   : > { %2694 = vmatpush3.xpose.msk.msra.mxu0 %vm679_vm3, %v1752_v19  ;;  %2695 = vmatprep.mubr.msk.f32.mxu0 %vm2842_vm1, %v2841_v31 }
 0x8e4   : > { %2703 = vmatprep.subr.mxu0 %v2841_v31  ;;  %2700 = vmatprep.mubr.msk.f32.mxu1 %vm2842_vm1, %v2841_v31 }
 0x8e6   : > { %2696 = vmatmul.mubr.msk.f32.vlgmr.msra.gmra.mrb[16].mxu0 %vm679_vm3, %v1750_v22 }
 0x8e7   : > { %2705 = vmatprep.mubr.msk.f32.mxu0 %vm2842_vm1, %v2841_v31 }
 0x9b1   : > { %v1591_v23 = vpop.f32.mrb[10].mxu1 }
 0x9b2   : > { %v2682_v24 = vpop.f32.mrb[11].mxu1 }
 0x9b5   : > { %v1667_v25 = vpop.f32.mrb[14].mxu0  ;;  %v1745_v26 = vpop.f32.mrb[12].mxu1 }
 0x9b6   : > { %v2769_v27 = vpack.i.bf16 %v1667_v25, %v1591_v23  ;;  %v1827_v28 = vmul.f32 0.35355338, %v1745_v26  ;;  %v2687_v29 = vpop.f32.mrb[15].mxu0  ;;  %v2692_v30 = vpop.f32.mrb[13].mxu1 }
 0x9b8   : > { %v1829_v32 = vsel %vm679_vm3, %v1827_v28, -inf }
 0x9b9   : > { %1830 = vmax.xlane.f32.xlu0 %v1829_v32  ;;  %v1823_v35 = vpop.f32.mrb[16].mxu0 }
 0x9ba   : > { %v1828_v36 = vmul.f32 0.35355338, %v1823_v35  ;;  %v2697_v37 = vpop.f32.mrb[17].mxu0 }
 0x9bc   : > { %v1832_v39 = vsel %vm679_vm3, %v1828_v36, -inf }
 0x9bd   : > { %1833 = vmax.xlane.f32.xlu1 %v1832_v39 }
 0x9ce   : > { %1851 = vrot.lane.b32.xlu1 %v3028_v38, %s2853_s30 }
 0x9d2   : > { %2765 = vrot.lane.b32.xlu1 %v2764_v54, %s2854_s29 }
 0x9d6   : > { %2770 = vrot.lane.b32.xlu1 %v2769_v27, %s2855_s14 }
 0xa46   : > { %v1831_v40 = vpop.xlane.xlu0 %1830 }
 0xa47   : > { %v1835_v41 = vsub.f32 %v1827_v28, %v1831_v40  ;;  %v2784_v40 = vld [vmem:[%s2964_s28 + $0x8] sm:$0xff]  }
 0xa49   : > { %v1837_v43 = vmul.f32 1.442695, %v1835_v41 }
 0xa4a   : > { %v1834_v44 = vpop.xlane.xlu1 %1833 }
 0xa4b   : > { %2813 = vpow2.f32 %v1837_v43  ;;  %v1836_v45 = vsub.f32 %v1828_v36, %v1834_v44 }
 0xa4d   : > { %v1839_v46 = vmul.f32 1.442695, %v1836_v45 }
 0xa4e   : > { %v1852_v47 = vpop.permute.xlu1 %1851 }
 0xa4f   : > { %2815 = vpow2.f32 %v1839_v46  ;;  %2699 = vmatpush3.msra.mxu1 %v1852_v47 }
 0xa50   : > { %2708 = vmatprep.subr.bf16.mxu1 %v2841_v31 }
 0xa52   : > { %v2766_v0 = vpop.permute.xlu1 %2765 }
 0xa53   : > { %v2768_v2 = vunpack.i.h.bf16 %v2766_v0  ;;  %v2767_v3 = vunpack.i.l.bf16 %v2766_v0 }
 0xa55   : > { %v2814_v38 = vpop.eup %2813  ;;  %v2028_v7 = vsel %vm679_vm3, %v3076_v13, %v2768_v2  ;;  %v2027_v8 = vsel %vm679_vm3, %v3074_v11, %v2767_v3  ;;  %v2547_v13 = vld [vmem:[%s3246_s2] ss:$0 sm:$0xff] }
 0xa56   : > { %v1841_v48 = vsel %vm679_vm3, %v2814_v38, 0.0  ;;  %v2771_v1 = vpop.permute.xlu1 %2770 }
 0xa57   : > { %1842 = vadd.xlane.f32.xlu0 %v1841_v48  ;;  %v2773_v4 = vunpack.i.h.bf16 %v2771_v1  ;;  %v2772_v5 = vunpack.i.l.bf16 %v2771_v1  ;;  %v2552_v48 = vld [vmem:[%s2959_s25] ss:$0 sm:$0xff] }
 0xa59   : > { %v2816_v49 = vpop.eup %2815  ;;  %v2030_v12 = vsel %vm2029_vm4, %v2027_v8, %v2772_v5  ;;  %v2031_v14 = vsel %vm2029_vm4, %v2028_v7, %v2773_v4 }
 0xa5a   : > { %v1844_v50 = vsel %vm679_vm3, %v2816_v49, 0.0 }
 0xa5b   : > { %1845 = vadd.xlane.f32.xlu0 %v1844_v50 }
 0xa71   : > { %1927 = vrot.lane.b32.xlu0 %v3031_v42, %s2853_s30  ;;  %v2781_v42 = vld [vmem:[%s2949_s15] sm:$0xff]  }
 0xae4   : > { %v1843_v51 = vpop.xlane.xlu0 %1842 }
 0xae5   : > { %2817 = vrcp.f32 %v1843_v51 }
 0xae8   : > { %v1846_v52 = vpop.xlane.xlu0 %1845 }
 0xae9   : > { %2819 = vrcp.f32 %v1846_v52 }
 0xaec   : > { %v1928_v53 = vpop.permute.xlu0 %1927 }
 0xaed   : > { %2704 = vmatpush3.msra.mxu0 %v1928_v53  ;;  %v2553_v53 = vld [vmem:[%s2959_s25 + $0x1] ss:$0 sm:$0xff] }
 0xaee   : > { %2716 = vmatprep.subr.bf16.mxu0 %v2841_v31 }
 0xaef   : > { %v2818_v54 = vpop.eup %2817 }
 0xaf0   : > { %v1849_v55 = vmul.f32 %v2818_v54, %v2814_v38 }
 0xaf2   : > { %2701 = vmatmul.mubr.msk.f32.vlgmr.msra.gmra.mrb[14].mxu1 %vm679_vm3, %v1849_v55 }
 0xaf3   : > { %v2820_v56 = vpop.eup %2819  ;;  %2712 = vmatprep.mubr.msk.bf16.mxu1 %vm2842_vm1, %v2841_v31  ;;  %2709 = vmatpush3.bf16.msra.mxu1 %v2781_v42  ;;  %v2785_v42 = vld [vmem:[%s2974_s16] sm:$0xff]  }
 0xaf4   : > { %v1850_v57 = vmul.f32 %v2820_v56, %v2816_v49  ;;  %2710 = vmatprep.subr.bf16.mxu1 %v2841_v31 }
 0xaf6   : > { %2706 = vmatmul.mubr.msk.f32.vlgmr.msra.gmra.mrb[18].mxu0 %vm679_vm3, %v1850_v57 }
 0xaf7   : > { %2720 = vmatprep.mubr.msk.bf16.mxu0 %vm2842_vm1, %v2841_v31  ;;  %2711 = vmatpush3.bf16.msra.mxu1 %v2782_v58  ;;  %v2786_v58 = vld [vmem:[%s2974_s16 + $0x8] sm:$0xff]  }
 0xaf8   : > { %2724 = vmatprep.subr.bf16.mxu1 %v2841_v31 }
 0xbc5   : > { %v1923_v59 = vpop.f32.mrb[14].mxu1 }
 0xbc6   : > { %v2702_v60 = vpop.f32.mrb[15].mxu1 }
 0xbc7   : > { %v2788_v60 = vld [vmem:[%s2974_s16 + $0x18] sm:$0xff]  }
 0xbc9   : > { %v1999_v61 = vpop.f32.mrb[18].mxu0 }
 0xbca   : > { %v2774_v62 = vpack.i.bf16 %v1999_v61, %v1923_v59  ;;  %v2707_v63 = vpop.f32.mrb[19].mxu0  ;;  %v2787_v59 = vld [vmem:[%s2974_s16 + $0x10] sm:$0xff]   ;;  %v2554_v61 = vld [vmem:[%s536_s13] ss:$0 sm:$0xff] }
 0xbcc   : > { %2775 = vrot.lane.b32.xlu0 %v2774_v62, %s2856_s17 }
 0xc3e   : > { %v2776_v6 = vpop.permute.xlu0 %2775 }
 0xc3f   : > { %v2778_v9 = vunpack.i.h.bf16 %v2776_v6  ;;  %v2777_v10 = vunpack.i.l.bf16 %v2776_v6 }
 0xc41   : > { %v2034_v15 = vsel %vm2032_vm5, %v2031_v14, %v2778_v9  ;;  %v2033_v16 = vsel %vm2032_vm5, %v2030_v12, %v2777_v10 }
 0xc42   : > { %v2035_v17 = vpack.c.bf16 %v2034_v15, %v2033_v16 }
 0xc44   : > { %2713 = vmatmul.mubr.msk.bf16.vlgmr.msra.gmra.mrb[16].mxu1 %vm631_vm2, %v2035_v17 }
 0xc45   : > { %2732 = vmatprep.mubr.msk.bf16.mxu1 %vm2842_vm1, %v2841_v31  ;;  %2725 = vmatpush3.bf16.msra.mxu1 %v2785_v42 }
 0xc46   : > { %2726 = vmatprep.subr.bf16.mxu1 %v2841_v31 }
 0xc49   : > { %2727 = vmatpush3.bf16.msra.mxu1 %v2786_v58 }
 0xc4a   : > { %2728 = vmatprep.subr.bf16.mxu1 %v2841_v31 }
 0xc4d   : > { %2729 = vmatpush3.bf16.msra.mxu1 %v2787_v59 }
 0xc4e   : > { %2730 = vmatprep.subr.bf16.mxu1 %v2841_v31 }
 0xc51   : > { %2731 = vmatpush3.bf16.msra.mxu1 %v2788_v60 }
 0xd17   : > { %v2096_v18 = vpop.f32.mrb[16].mxu1 }
 0xd18   : > { %v2097_v19 = vadd.f32 %v2547_v13, %v2096_v18  ;;  %v2714_v11 = vpop.f32.mrb[17].mxu1 }
 0xd19   : > { %v2099_v20 = vpop.f32.mrb[18].mxu1 }
 0xd1a   : > { %v2100_v21 = vadd.f32 %v2547_v13, %v2099_v20  ;;  %v2715_v22 = vpop.f32.mrb[19].mxu1  ;;  %v2103_v23 = vadd.f32 %v2097_v19, %v3010_v33 }
 0xd1b   : > { %v2558_v22 = vld [vmem:[%s544_s21] ss:$0 sm:$0xff] }
 0xd1c   : > { %v2108_v24 = vsel %vm631_vm2, %v2103_v23, 0.0  ;;  %v2104_v25 = vadd.f32 %v2100_v21, %v3012_v34  ;;  %v2783_v34 = vld [vmem:[%s2964_s28] sm:$0xff]  }
 0xd1d   : > { %2109 = vadd.xlane.f32.xlu1 %v2108_v24  ;;  %2717 = vmatpush3.bf16.msra.mxu0 %v2783_v34 }
 0xd1e   : > { %v2111_v26 = vsel %vm631_vm2, %v2104_v25, 0.0  ;;  %2718 = vmatprep.subr.bf16.mxu0 %v2841_v31 }
 0xd1f   : > { %2112 = vadd.xlane.f32.xlu0 %v2111_v26 }
 0xd21   : > { %2719 = vmatpush3.bf16.msra.mxu0 %v2784_v40 }
 0xdaa   : > { %v2110_v27 = vpop.xlane.xlu1 %2109 }
 0xdab   : > { %v2115_v28 = vmul.f32 0.03125, %v2110_v27 }
 0xdac   : > { %v2113_v29 = vpop.xlane.xlu0 %2112 }
 0xdad   : > { %v2117_v30 = vsub.f32 %v2103_v23, %v2115_v28  ;;  %v2116_v32 = vmul.f32 0.03125, %v2113_v29 }
 0xdaf   : > { %v2118_v35 = vsub.f32 %v2104_v25, %v2116_v32  ;;  %v2119_v36 = vmul.f32 %v2117_v30, %v2117_v30 }
 0xdb1   : > { %v2121_v37 = vsel %vm631_vm2, %v2119_v36, 0.0  ;;  %v2120_v33 = vmul.f32 %v2118_v35, %v2118_v35 }
 0xdb2   : > { %2122 = vadd.xlane.f32.xlu0 %v2121_v37 }
 0xdb3   : > { %v2124_v39 = vsel %vm631_vm2, %v2120_v33, 0.0 }
 0xdb4   : > { %2125 = vadd.xlane.f32.xlu1 %v2124_v39 }
 0xe3f   : > { %v2123_v41 = vpop.xlane.xlu0 %2122 }
 0xe40   : > { %v2127_v43 = vmul.f32 0.03125, %v2123_v41 }
 0xe41   : > { %v2126_v44 = vpop.xlane.xlu1 %2125 }
 0xe42   : > { %v2129_v45 = vadd.f32 1e-12, %v2127_v43  ;;  %v2128_v46 = vmul.f32 0.03125, %v2126_v44 }
 0xe44   : > { %2821 = vrsqrt.f32 %v2129_v45  ;;  %v2130_v47 = vadd.f32 1e-12, %v2128_v46 }
 0xe46   : > { %2823 = vrsqrt.f32 %v2130_v47 }
 0xe4e   : > { %v2822_v38 = vpop.eup %2821 }
 0xe4f   : > { %v2133_v49 = vmul.f32 %v2822_v38, %v2117_v30 }
 0xe50   : > { %v2824_v50 = vpop.eup %2823 }
 0xe51   : > { %v2141_v51 = vmul.f32 %v2552_v48, %v2133_v49  ;;  %v2134_v52 = vmul.f32 %v2824_v50, %v2118_v35 }
 0xe53   : > { %v2142_v54 = vmul.f32 %v2552_v48, %v2134_v52  ;;  %v2149_v55 = vadd.f32 %v2553_v53, %v2141_v51  ;;  %v2565_v52 = vld [vmem:[%s2983_s27] ss:$0 sm:$0xff] }
 0xe55   : > { %v2150_v56 = vadd.f32 %v2553_v53, %v2142_v54 }
 0xe57   : > { %v2151_v57 = vpack.c.bf16 %v2150_v56, %v2149_v55 }
 0xe59   : > { %2721 = vmatmul.mubr.msk.bf16.vlgmr.msra.gmra.mrb[20].mxu0 %vm631_vm2, %v2151_v57 }
 0xf2c   : > { %v2212_v62 = vpop.f32.mrb[20].mxu0 }
 0xf2d   : > { %v2213_v63 = vadd.f32 %v2554_v61, %v2212_v62  ;;  %v2722_v0 = vpop.f32.mrb[21].mxu0 }
 0xf2e   : > { %v2215_v1 = vpop.f32.mrb[22].mxu0 }
 0xf2f   : > { %v2219_v2 = vmul.f32 %v2213_v63, %v2213_v63  ;;  %v2216_v3 = vadd.f32 %v2554_v61, %v2215_v1  ;;  %v2723_v4 = vpop.f32.mrb[23].mxu0 }
 0xf31   : > { %v2221_v5 = vmul.f32 %v2219_v2, %v2213_v63  ;;  %v2220_v6 = vmul.f32 %v2216_v3, %v2216_v3 }
 0xf33   : > { %v2223_v7 = vmul.f32 0.044715, %v2221_v5  ;;  %v2222_v8 = vmul.f32 %v2220_v6, %v2216_v3 }
 0xf35   : > { %v2225_v9 = vadd.f32 %v2223_v7, %v2213_v63  ;;  %v2224_v31 = vmul.f32 0.044715, %v2222_v8 }
 0xf37   : > { %v2227_v10 = vmul.f32 0.7978846, %v2225_v9  ;;  %v2226_v12 = vadd.f32 %v2224_v31, %v2216_v3 }
 0xf39   : > { %2825 = vtanh.f32 %v2227_v10  ;;  %v2228_v14 = vmul.f32 0.7978846, %v2226_v12 }
 0xf3b   : > { %2827 = vtanh.f32 %v2228_v14 }
 0xf43   : > { %v2826_v15 = vpop.eup %2825 }
 0xf44   : > { %v2231_v16 = vadd.f32 1.0, %v2826_v15 }
 0xf45   : > { %v2828_v17 = vpop.eup %2827 }
 0xf46   : > { %v2233_v13 = vmul.f32 0.5, %v2231_v16  ;;  %v2232_v18 = vadd.f32 1.0, %v2828_v17 }
 0xf48   : > { %v2234_v19 = vmul.f32 0.5, %v2232_v18  ;;  %v2235_v11 = vmul.f32 %v2233_v13, %v2213_v63 }
 0xf4a   : > { %v2236_v20 = vmul.f32 %v2234_v19, %v2216_v3 }
 0xf4c   : > { %v2237_v21 = vpack.c.bf16 %v2236_v20, %v2235_v11 }
 0xf4e   : > { %2733 = vmatmul.mubr.msk.bf16.vlgmr.msra.gmra.mrb[20].mxu1 %vm2277_vm6, %v2237_v21 }
0x1021   : > { %v2315_v23 = vpop.f32.mrb[20].mxu1 }
0x1022   : > { %v2316_v24 = vadd.f32 %v2558_v22, %v2315_v23  ;;  %v2734_v25 = vpop.f32.mrb[21].mxu1 }
0x1023   : > { %v2318_v26 = vpop.f32.mrb[22].mxu1 }
0x1024   : > { %v2319_v27 = vadd.f32 %v2558_v22, %v2318_v26  ;;  %v2735_v28 = vpop.f32.mrb[23].mxu1  ;;  %v2322_v29 = vadd.f32 %v2316_v24, %v2149_v55  ;;  %v2566_v55 = vld [vmem:[%s2983_s27 + $0x1] ss:$0 sm:$0xff] }
0x1026   : > { %v2327_v30 = vsel %vm631_vm2, %v2322_v29, 0.0  ;;  %v2323_v32 = vadd.f32 %v2319_v27, %v2150_v56 }
0x1027   : > { %2328 = vadd.xlane.f32.xlu0 %v2327_v30 }
0x1028   : > { %v2330_v35 = vsel %vm631_vm2, %v2323_v32, 0.0 }
0x1029   : > { %2331 = vadd.xlane.f32.xlu1 %v2330_v35 }
0x10b4   : > { %v2329_v36 = vpop.xlane.xlu0 %2328 }
0x10b5   : > { %v2333_v37 = vmul.f32 0.03125, %v2329_v36 }
0x10b6   : > { %v2332_v33 = vpop.xlane.xlu1 %2331 }
0x10b7   : > { %v2335_v39 = vsub.f32 %v2322_v29, %v2333_v37  ;;  %v2334_v34 = vmul.f32 0.03125, %v2332_v33 }
0x10b9   : > { %v2336_v40 = vsub.f32 %v2323_v32, %v2334_v34  ;;  %v2337_v41 = vmul.f32 %v2335_v39, %v2335_v39 }
0x10bb   : > { %v2339_v43 = vsel %vm631_vm2, %v2337_v41, 0.0  ;;  %v2338_v44 = vmul.f32 %v2336_v40, %v2336_v40 }
0x10bc   : > { %2340 = vadd.xlane.f32.xlu0 %v2339_v43 }
0x10bd   : > { %v2342_v45 = vsel %vm631_vm2, %v2338_v44, 0.0 }
0x10be   : > { %2343 = vadd.xlane.f32.xlu1 %v2342_v45 }
0x1149   : > { %v2341_v46 = vpop.xlane.xlu0 %2340 }
0x114a   : > { %v2345_v47 = vmul.f32 0.03125, %v2341_v46 }
0x114b   : > { %v2344_v38 = vpop.xlane.xlu1 %2343 }
0x114c   : > { %v2347_v48 = vadd.f32 1e-12, %v2345_v47  ;;  %v2346_v49 = vmul.f32 0.03125, %v2344_v38 }
0x114e   : > { %2829 = vrsqrt.f32 %v2347_v48  ;;  %v2348_v50 = vadd.f32 1e-12, %v2346_v49 }
0x1150   : > { %2831 = vrsqrt.f32 %v2348_v50 }
0x1158   : > { %v2830_v51 = vpop.eup %2829 }
0x1159   : > { %v2351_v53 = vmul.f32 %v2830_v51, %v2335_v39 }
0x115a   : > { %v2832_v54 = vpop.eup %2831 }
0x115b   : > { %v2359_v56 = vmul.f32 %v2565_v52, %v2351_v53  ;;  %v2352_v57 = vmul.f32 %v2832_v54, %v2336_v40  ;;  %2374 = sbr.rel (%p2567_p5) target bundleno = 4450 (0x1162), region = 76 }
0x115d   : > { %v2367_v42 = vadd.f32 %v2566_v55, %v2359_v56  ;;  %v2360_v58 = vmul.f32 %v2565_v52, %v2352_v57 }
0x115f   : > { %2369 = vst.msk [vmem:[#allocation2] sm:$0xff] %vm631_vm2, %v2367_v42  ;;  %v2368_v59 = vadd.f32 %v2566_v55, %v2360_v58  ;;  %2375 = vst.msk [vmem:[%s3247_s24] sm:$0xff] (!%p2567_p5), %vm631_vm2, %v2367_v42 }
0x1161   : > { %2370 = vst.msk [vmem:[#allocation2 + $0x8] sm:$0xff] %vm631_vm2, %v2368_v59  ;;  %2376 = vst.msk [vmem:[%s3247_s24 + $0x8] sm:$0xff] (!%p2567_p5), %vm631_vm2, %v2368_v59 }
0x1162 PF: > { %s3248_s12 = sld [smem:[#allocation3_spill]] }
0x1168   : > { %s22_s21 = sadd.s32 1, %s3248_s12  }
0x1169   : > { %p19_p6 = scmp.ge.s32.totalorder %s22_s21, 4  }
0x116b   :  { %21 = sbr.rel (!%p19_p6) target bundleno = 5 (0x5), region = 132 }

// kernel: _forward.3
= control target key start
LH: loop header
LB: loop body
LE: loop exit
PB: predicated region body
PF: predicated region fallthrough
CT: control target
= control target key end

     0   :  { %s6878_s0 = inlined_call_operand.vmem [shape: f32[16,32], index: 0, kind: input, shape index: {}]   ;;  %s6879_s1 = inlined_call_operand.vmem [shape: bf16[2,4,32,32], index: 1, kind: input, shape index: {}]   ;;  %s6880_s2 = inlined_call_operand.vmem [shape: f32[2,4,1,32], index: 2, kind: input, shape index: {}]   ;;  %s6881_s3 = inlined_call_operand.vmem [shape: bf16[2,4,32,32], index: 3, kind: input, shape index: {}]   ;;  %s6882_s4 = inlined_call_operand.vmem [shape: f32[1,1,64], index: 4, kind: input, shape index: {}]   ;;  %s6883_s5 = inlined_call_operand.<no memory space> [shape: f32[1,1], index: 5, kind: input, shape index: {}]   ;;  %s6884_s6 = inlined_call_operand.vmem [shape: f32[2,8,1], index: 6, kind: input, shape index: {}]   ;;  %s6885_s7 = inlined_call_operand.vmem [shape: f32[2,8,1], index: 7, kind: output, shape index: {0}]   ;;  %s6886_s8 = inlined_call_operand.hbm [shape: f32[1,1], index: 8, kind: output, shape index: {1}]  }
   0x1   :  { %v14_v0 = vstv %s6883_s5 }
   0x2   :  { %15 = vst [vmem:[#allocation4] sm:$0x1] %v14_v0 }
   0x3   :  { %v5507_v1 = vld [vmem:[%s6879_s1] sm:$0xff]   ;;  %v5863_v2 = vmov 0.0   ;;  %v5508_v3 = vld [vmem:[%s6879_s1 + $0x10] sm:$0xff]   ;;  %v5509_v4 = vld [vmem:[%s6879_s1 + $0x8] sm:$0xff]   ;;  %vm5864_vm0 = vmmov 0   ;;  %vm58_vm1 = vcmask 261120  }
   0x4   :  { %4923 = vmatprep.subr.bf16.mxu0 %v5863_v2  ;;  %4931 = vmatprep.subr.bf16.mxu1 %v5863_v2  ;;  %v5510_v5 = vld [vmem:[%s6879_s1 + $0x18] sm:$0xff]   ;;  %v32_v6 = vld [vmem:[%s6878_s0] sm:$0xff]  ;;  %v33_v7 = vld [vmem:[%s6878_s0 + $0x8] sm:$0xff] }
   0x5   :  { %4924 = vmatpush3.bf16.msra.mxu0 %v5507_v1  ;;  %4927 = vmatprep.mubr.msk.bf16.mxu0 %vm5864_vm0, %v5863_v2  ;;  %v34_v8 = vpack.c.bf16 %v33_v7, %v32_v6  ;;  %v5511_v9 = vld [vmem:[%s6879_s1 + $0x20] sm:$0xff]   ;;  %v5512_v10 = vld [vmem:[%s6879_s1 + $0x30] sm:$0xff]   ;;  %v5513_v11 = vld [vmem:[%s6879_s1 + $0x28] sm:$0xff]  }
   0x6   :  { %4932 = vmatpush3.bf16.msra.mxu1 %v5508_v3  ;;  %4925 = vmatprep.subr.bf16.mxu0 %v5863_v2  ;;  %v5514_v12 = vld [vmem:[%s6879_s1 + $0x38] sm:$0xff]   ;;  %v5515_v13 = vld [vmem:[%s6879_s1 + $0x40] sm:$0xff]   ;;  %v5516_v14 = vld [vmem:[%s6879_s1 + $0x50] sm:$0xff]  }
   0x7   :  { %4933 = vmatprep.subr.bf16.mxu1 %v5863_v2  ;;  %4935 = vmatprep.mubr.msk.bf16.mxu1 %vm5864_vm0, %v5863_v2  ;;  %v5517_v15 = vld [vmem:[%s6879_s1 + $0x48] sm:$0xff]   ;;  %v5518_v16 = vld [vmem:[%s6879_s1 + $0x58] sm:$0xff]   ;;  %v5519_v17 = vld [vmem:[%s6879_s1 + $0x60] sm:$0xff]  }
   0x8   :  { %v5520_v18 = vld [vmem:[%s6879_s1 + $0x70] sm:$0xff]   ;;  %v5521_v19 = vld [vmem:[%s6879_s1 + $0x68] sm:$0xff]   ;;  %v5522_v20 = vld [vmem:[%s6879_s1 + $0x78] sm:$0xff]  }
   0x9   :  { %4926 = vmatpush3.bf16.msra.mxu0 %v5509_v4  ;;  %v6012_v21 = vld [vmem:[%s6881_s3] sm:$0xff]   ;;  %v6018_v22 = vld [vmem:[%s6881_s3 + $0x10] sm:$0xff]  }
   0xa   :  { %4934 = vmatpush3.bf16.msra.mxu1 %v5510_v5  ;;  %4939 = vmatprep.subr.bf16.mxu0 %v5863_v2 }
   0xb   :  { %4947 = vmatprep.subr.bf16.mxu1 %v5863_v2 }
   0xc   :  { %4928 = vmatmul.mubr.msk.bf16.vlgmr.msra.gmra.mrb[0].mxu0 %vm58_vm1, %v34_v8 }
   0xd   :  { %4936 = vmatmul.mubr.msk.bf16.vlgmr.msra.gmra.mrb[0].mxu1 %vm58_vm1, %v34_v8  ;;  %4940 = vmatpush3.bf16.msra.mxu0 %v5511_v9 }
   0xe   :  { %4948 = vmatpush3.bf16.msra.mxu1 %v5512_v10  ;;  %4941 = vmatprep.subr.bf16.mxu0 %v5863_v2 }
   0xf   :  { %4949 = vmatprep.subr.bf16.mxu1 %v5863_v2  ;;  %4943 = vmatprep.mubr.msk.bf16.mxu0 %vm5864_vm0, %v5863_v2 }
  0x10   :  { %4951 = vmatprep.mubr.msk.bf16.mxu1 %vm5864_vm0, %v5863_v2 }
  0x11   :  { %4942 = vmatpush3.bf16.msra.mxu0 %v5513_v11 }
  0x12   :  { %4950 = vmatpush3.bf16.msra.mxu1 %v5514_v12  ;;  %4955 = vmatprep.subr.bf16.mxu0 %v5863_v2 }
  0x13   :  { %4963 = vmatprep.subr.bf16.mxu1 %v5863_v2 }
  0x14   :  { %4944 = vmatmul.mubr.msk.bf16.vlgmr.msra.gmra.mrb[4].mxu0 %vm58_vm1, %v34_v8 }
  0x15   :  { %4952 = vmatmul.mubr.msk.bf16.vlgmr.msra.gmra.mrb[4].mxu1 %vm58_vm1, %v34_v8  ;;  %4956 = vmatpush3.bf16.msra.mxu0 %v5515_v13 }
  0x16   :  { %4964 = vmatpush3.bf16.msra.mxu1 %v5516_v14  ;;  %4957 = vmatprep.subr.bf16.mxu0 %v5863_v2 }
  0x17   :  { %4965 = vmatprep.subr.bf16.mxu1 %v5863_v2  ;;  %4959 = vmatprep.mubr.msk.bf16.mxu0 %vm5864_vm0, %v5863_v2 }
  0x18   :  { %4967 = vmatprep.mubr.msk.bf16.mxu1 %vm5864_vm0, %v5863_v2 }
  0x19   :  { %4958 = vmatpush3.bf16.msra.mxu0 %v5517_v15 }
  0x1a   :  { %4966 = vmatpush3.bf16.msra.mxu1 %v5518_v16  ;;  %4971 = vmatprep.subr.bf16.mxu0 %v5863_v2 }
  0x1b   :  { %4979 = vmatprep.subr.bf16.mxu1 %v5863_v2 }
  0x1c   :  { %4960 = vmatmul.mubr.msk.bf16.vlgmr.msra.gmra.mrb[8].mxu0 %vm58_vm1, %v34_v8 }
  0x1d   :  { %4968 = vmatmul.mubr.msk.bf16.vlgmr.msra.gmra.mrb[8].mxu1 %vm58_vm1, %v34_v8  ;;  %4972 = vmatpush3.bf16.msra.mxu0 %v5519_v17 }
  0x1e   :  { %4980 = vmatpush3.bf16.msra.mxu1 %v5520_v18  ;;  %4973 = vmatprep.subr.bf16.mxu0 %v5863_v2 }
  0x1f   :  { %4981 = vmatprep.subr.bf16.mxu1 %v5863_v2  ;;  %4975 = vmatprep.mubr.msk.bf16.mxu0 %vm5864_vm0, %v5863_v2 }
  0x20   :  { %4983 = vmatprep.mubr.msk.bf16.mxu1 %vm5864_vm0, %v5863_v2 }
  0x21   :  { %4974 = vmatpush3.bf16.msra.mxu0 %v5521_v19 }
  0x22   :  { %4982 = vmatpush3.bf16.msra.mxu1 %v5522_v20  ;;  %4987 = vmatprep.subr.bf16.mxu0 %v5863_v2 }
  0x23   :  { %4995 = vmatprep.subr.bf16.mxu1 %v5863_v2 }
  0x24   :  { %4976 = vmatmul.mubr.msk.bf16.vlgmr.msra.gmra.mrb[12].mxu0 %vm58_vm1, %v34_v8 }
  0x25   :  { %16 = vsyncpa [#allocation6], 0  ;;  %4984 = vmatmul.mubr.msk.bf16.vlgmr.msra.gmra.mrb[12].mxu1 %vm58_vm1, %v34_v8  ;;  %4988 = vmatpush3.bf16.msra.mxu0 %v6012_v21  ;;  %v6027_v23 = vld [vmem:[%s6881_s3 + $0x8] sm:$0xff]   ;;  %v6034_v24 = vld [vmem:[%s6881_s3 + $0x18] sm:$0xff]   ;;  %v5865_v27 = vmov 0   ;;  %vm895_vm2 = vcmask 253952  }
  0x26   :  { %4996 = vmatpush3.bf16.msra.mxu1 %v6018_v22  ;;  %4989 = vmatprep.subr.bf16.mxu0 %v5863_v2  ;;  %v6045_v25 = vld [vmem:[%s6881_s3 + $0x20] sm:$0xff]   ;;  %v6052_v26 = vld [vmem:[%s6881_s3 + $0x30] sm:$0xff]   ;;  %v6059_v28 = vld [vmem:[%s6881_s3 + $0x28] sm:$0xff]   ;;  %vm1175_vm3 = vcmask 516352   ;;  %vm4395_vm4 = vcmask 523264   ;;  %vm4423_vm5 = vcmask 7168  }
  0x27   :  { %4997 = vmatprep.subr.bf16.mxu1 %v5863_v2  ;;  %4991 = vmatprep.mubr.msk.bf16.mxu0 %vm5864_vm0, %v5863_v2  ;;  %v6066_v29 = vld [vmem:[%s6881_s3 + $0x38] sm:$0xff]   ;;  %v6077_v30 = vld [vmem:[%s6881_s3 + $0x40] sm:$0xff]   ;;  %v6084_v31 = vld [vmem:[%s6881_s3 + $0x50] sm:$0xff]   ;;  %vm4468_vm6 = vcmask 0  }
  0x28   :  { %4999 = vmatprep.mubr.msk.bf16.mxu1 %vm5864_vm0, %v5863_v2  ;;  %v6091_v32 = vld [vmem:[%s6881_s3 + $0x48] sm:$0xff]   ;;  %v6098_v33 = vld [vmem:[%s6881_s3 + $0x58] sm:$0xff]   ;;  %v6109_v34 = vld [vmem:[%s6881_s3 + $0x60] sm:$0xff]  }
  0x29   :  { %4990 = vmatpush3.bf16.msra.mxu0 %v6027_v23  ;;  %v6116_v35 = vld [vmem:[%s6881_s3 + $0x70] sm:$0xff]   ;;  %v6123_v36 = vld [vmem:[%s6881_s3 + $0x68] sm:$0xff]   ;;  %v6130_v37 = vld [vmem:[%s6881_s3 + $0x78] sm:$0xff]  }
  0x2a   :  { %4998 = vmatpush3.bf16.msra.mxu1 %v6034_v24  ;;  %5003 = vmatprep.subr.bf16.mxu0 %v5863_v2  ;;  %v4488_v38 = vld [vmem:[%s6880_s2] ss:$0 sm:$0xff]  ;;  %v4497_v39 = vld [vmem:[%s6880_s2 + $0x1] ss:$0 sm:$0xff]  ;;  %v4506_v52 = vld [vmem:[%s6880_s2 + $0x2] ss:$0 sm:$0xff] }
  0x2b   :  { %5011 = vmatprep.subr.bf16.mxu1 %v5863_v2  ;;  %v4515_v53 = vld [vmem:[%s6880_s2 + $0x3] ss:$0 sm:$0xff]  ;;  %v4524_v3 = vld [vmem:[%s6880_s2 + $0x4] ss:$0 sm:$0xff]  ;;  %v4533_v4 = vld [vmem:[%s6880_s2 + $0x5] ss:$0 sm:$0xff] }
  0x2c   :  { %4992 = vmatmul.mubr.bf16.vlgmr.msra.gmra.mrb[16].mxu0 %v5865_v27  ;;  %v4542_v17 = vld [vmem:[%s6880_s2 + $0x6] ss:$0 sm:$0xff]  ;;  %v4551_v18 = vld [vmem:[%s6880_s2 + $0x7] ss:$0 sm:$0xff]  ;;  %s5867_s2 = smov 32  }
  0x2d   :  { %5000 = vmatmul.mubr.bf16.vlgmr.msra.gmra.mrb[16].mxu1 %v5865_v27  ;;  %5004 = vmatpush3.bf16.msra.mxu0 %v6045_v25 }
  0x2e   :  { %5012 = vmatpush3.bf16.msra.mxu1 %v6052_v26  ;;  %5005 = vmatprep.subr.bf16.mxu0 %v5863_v2 }
  0x2f   :  { %5013 = vmatprep.subr.bf16.mxu1 %v5863_v2  ;;  %5007 = vmatprep.mubr.msk.bf16.mxu0 %vm5864_vm0, %v5863_v2 }
  0x30   :  { %5015 = vmatprep.mubr.msk.bf16.mxu1 %vm5864_vm0, %v5863_v2 }
  0x31   :  { %5006 = vmatpush3.bf16.msra.mxu0 %v6059_v28 }
  0x32   :  { %5014 = vmatpush3.bf16.msra.mxu1 %v6066_v29  ;;  %5019 = vmatprep.subr.bf16.mxu0 %v5863_v2 }
  0x33   :  { %5027 = vmatprep.subr.bf16.mxu1 %v5863_v2 }
  0x34   :  { %5008 = vmatmul.mubr.bf16.vlgmr.msra.gmra.mrb[20].mxu0 %v5865_v27 }
  0x35   :  { %5016 = vmatmul.mubr.bf16.vlgmr.msra.gmra.mrb[20].mxu1 %v5865_v27  ;;  %5020 = vmatpush3.bf16.msra.mxu0 %v6077_v30 }
  0x36   :  { %5028 = vmatpush3.bf16.msra.mxu1 %v6084_v31  ;;  %5021 = vmatprep.subr.bf16.mxu0 %v5863_v2 }
  0x37   :  { %5029 = vmatprep.subr.bf16.mxu1 %v5863_v2  ;;  %5023 = vmatprep.mubr.msk.bf16.mxu0 %vm5864_vm0, %v5863_v2 }
  0x38   :  { %5031 = vmatprep.mubr.msk.bf16.mxu1 %vm5864_vm0, %v5863_v2 }
  0x39   :  { %5022 = vmatpush3.bf16.msra.mxu0 %v6091_v32 }
  0x3a   :  { %5030 = vmatpush3.bf16.msra.mxu1 %v6098_v33  ;;  %5035 = vmatprep.subr.bf16.mxu0 %v5863_v2 }
  0x3b   :  { %5043 = vmatprep.subr.bf16.mxu1 %v5863_v2 }
  0x3c   :  { %5024 = vmatmul.mubr.bf16.vlgmr.msra.gmra.mrb[24].mxu0 %v5865_v27 }
  0x3d   :  { %5032 = vmatmul.mubr.bf16.vlgmr.msra.gmra.mrb[24].mxu1 %v5865_v27  ;;  %5036 = vmatpush3.bf16.msra.mxu0 %v6109_v34 }
  0x3e   :  { %5044 = vmatpush3.bf16.msra.mxu1 %v6116_v35  ;;  %5037 = vmatprep.subr.bf16.mxu0 %v5863_v2 }
  0x3f   :  { %5045 = vmatprep.subr.bf16.mxu1 %v5863_v2  ;;  %5039 = vmatprep.mubr.msk.bf16.mxu0 %vm5864_vm0, %v5863_v2 }
  0x40   :  { %5047 = vmatprep.mubr.msk.bf16.mxu1 %vm5864_vm0, %v5863_v2 }
  0x41   :  { %5038 = vmatpush3.bf16.msra.mxu0 %v6123_v36 }
  0x42   :  { %5046 = vmatpush3.bf16.msra.mxu1 %v6130_v37  ;;  %5051 = vmatprep.subr.bf16.mxu0 %v5863_v2 }
  0x43   :  { %5059 = vmatprep.subr.bf16.mxu1 %v5863_v2 }
  0x44   :  { %5040 = vmatmul.mubr.bf16.vlgmr.msra.gmra.mrb[28].mxu0 %v5865_v27 }
  0x45   :  { %5048 = vmatmul.mubr.bf16.vlgmr.msra.gmra.mrb[28].mxu1 %v5865_v27  ;;  %5052 = vmatpush3.bf16.msra.mxu0 %v6012_v21 }
  0x46   :  { %5060 = vmatpush3.bf16.msra.mxu1 %v6018_v22  ;;  %5053 = vmatprep.subr.bf16.mxu0 %v5863_v2 }
  0x47   :  { %5061 = vmatprep.subr.bf16.mxu1 %v5863_v2  ;;  %5055 = vmatprep.mubr.msk.bf16.mxu0 %vm5864_vm0, %v5863_v2 }
  0x48   :  { %5063 = vmatprep.mubr.msk.bf16.mxu1 %vm5864_vm0, %v5863_v2 }
  0x49   :  { %5054 = vmatpush3.bf16.msra.mxu0 %v6027_v23 }
  0x4a   :  { %5062 = vmatpush3.bf16.msra.mxu1 %v6034_v24  ;;  %5067 = vmatprep.subr.bf16.mxu0 %v5863_v2 }
  0x4b   :  { %5075 = vmatprep.subr.bf16.mxu1 %v5863_v2 }
  0xdf   :  { %v96_v40 = vpop.f32.mrb[0].mxu0 }
  0xe0   :  { %v97_v41 = vadd.f32 %v4488_v38, %v96_v40  ;;  %v164_v42 = vpop.f32.mrb[0].mxu1  ;;  %v4929_v43 = vpop.f32.mrb[1].mxu0 }
  0xe1   :  { %v165_v44 = vadd.f32 %v4497_v39, %v164_v42  ;;  %v4937_v45 = vpop.f32.mrb[1].mxu1  ;;  %v99_v46 = vpop.f32.mrb[2].mxu0 }
  0xe2   :  { %103 = vst.msk [vmem:[#allocation2] sm:$0xff] %vm58_vm1, %v97_v41  ;;  %v100_v47 = vadd.f32 %v4488_v38, %v99_v46  ;;  %v167_v48 = vpop.f32.mrb[2].mxu1  ;;  %v4930_v49 = vpop.f32.mrb[3].mxu0 }
  0xe3   :  { %172 = vst.msk [vmem:[#allocation2 + $0x10] sm:$0xff] %vm58_vm1, %v165_v44  ;;  %v168_v50 = vadd.f32 %v4497_v39, %v167_v48  ;;  %v4938_v51 = vpop.f32.mrb[3].mxu1 }
  0xe4   :  { %104 = vst.msk [vmem:[#allocation2 + $0x8] sm:$0xff] %vm58_vm1, %v100_v47 }
  0xe5   :  { %173 = vst.msk [vmem:[#allocation2 + $0x18] sm:$0xff] %vm58_vm1, %v168_v50 }
  0xe7   :  { %v233_v54 = vpop.f32.mrb[4].mxu0 }
  0xe8   :  { %v234_v55 = vadd.f32 %v4506_v52, %v233_v54  ;;  %v302_v56 = vpop.f32.mrb[4].mxu1  ;;  %v4945_v57 = vpop.f32.mrb[5].mxu0 }
  0xe9   :  { %v303_v58 = vadd.f32 %v4515_v53, %v302_v56  ;;  %v4953_v59 = vpop.f32.mrb[5].mxu1  ;;  %v236_v60 = vpop.f32.mrb[6].mxu0  ;;  %v627_v47 = vld [vmem:[#allocation2] sm:$0x3] }
  0xea   :  { %241 = vst.msk [vmem:[#allocation2 + $0x20] sm:$0xff] %vm58_vm1, %v234_v55  ;;  %v237_v61 = vadd.f32 %v4506_v52, %v236_v60  ;;  %v305_v62 = vpop.f32.mrb[6].mxu1  ;;  %v4946_v63 = vpop.f32.mrb[7].mxu0  ;;  %v684_v50 = vld [vmem:[#allocation2 + $0x10] sm:$0x3] }
  0xeb   :  { %310 = vst.msk [vmem:[#allocation2 + $0x30] sm:$0xff] %vm58_vm1, %v303_v58  ;;  %v306_v0 = vadd.f32 %v4515_v53, %v305_v62  ;;  %v4954_v1 = vpop.f32.mrb[7].mxu1 }
  0xec   :  { %242 = vst.msk [vmem:[#allocation2 + $0x28] sm:$0xff] %vm58_vm1, %v237_v61 }
  0xed   :  { %311 = vst.msk [vmem:[#allocation2 + $0x38] sm:$0xff] %vm58_vm1, %v306_v0 }
  0xef   :  { %v371_v5 = vpop.f32.mrb[8].mxu0 }
  0xf0   :  { %v372_v6 = vadd.f32 %v4524_v3, %v371_v5  ;;  %v440_v7 = vpop.f32.mrb[8].mxu1  ;;  %v4961_v8 = vpop.f32.mrb[9].mxu0 }
  0xf1   :  { %v441_v9 = vadd.f32 %v4533_v4, %v440_v7  ;;  %v4969_v10 = vpop.f32.mrb[9].mxu1  ;;  %v374_v11 = vpop.f32.mrb[10].mxu0  ;;  %v738_v7 = vld [vmem:[#allocation2 + $0x20] sm:$0x3] }
  0xf2   :  { %379 = vst.msk [vmem:[#allocation2 + $0x40] sm:$0xff] %vm58_vm1, %v372_v6  ;;  %v375_v12 = vadd.f32 %v4524_v3, %v374_v11  ;;  %v443_v13 = vpop.f32.mrb[10].mxu1  ;;  %v4962_v14 = vpop.f32.mrb[11].mxu0  ;;  %v792_v62 = vld [vmem:[#allocation2 + $0x30] sm:$0x3] }
  0xf3   :  { %448 = vst.msk [vmem:[#allocation2 + $0x50] sm:$0xff] %vm58_vm1, %v441_v9  ;;  %v444_v15 = vadd.f32 %v4533_v4, %v443_v13  ;;  %v4970_v16 = vpop.f32.mrb[11].mxu1 }
  0xf4   :  { %380 = vst.msk [vmem:[#allocation2 + $0x48] sm:$0xff] %vm58_vm1, %v375_v12 }
  0xf5   :  { %449 = vst.msk [vmem:[#allocation2 + $0x58] sm:$0xff] %vm58_vm1, %v444_v15 }
  0xf7   :  { %v509_v19 = vpop.f32.mrb[12].mxu0 }
  0xf8   :  { %v510_v20 = vadd.f32 %v4542_v17, %v509_v19  ;;  %v578_v27 = vpop.f32.mrb[12].mxu1  ;;  %v4977_v38 = vpop.f32.mrb[13].mxu0 }
  0xf9   :  { %v579_v39 = vadd.f32 %v4551_v18, %v578_v27  ;;  %v4985_v40 = vpop.f32.mrb[13].mxu1  ;;  %v512_v41 = vpop.f32.mrb[14].mxu0 }
  0xfa   :  { %517 = vst.msk [vmem:[#allocation2 + $0x60] sm:$0xff] %vm58_vm1, %v510_v20  ;;  %v513_v42 = vadd.f32 %v4542_v17, %v512_v41  ;;  %v581_v43 = vpop.f32.mrb[14].mxu1  ;;  %v4978_v44 = vpop.f32.mrb[15].mxu0 }
  0xfb   :  { %586 = vst.msk [vmem:[#allocation2 + $0x70] sm:$0xff] %vm58_vm1, %v579_v39  ;;  %v582_v45 = vadd.f32 %v4551_v18, %v581_v43  ;;  %v4986_v46 = vpop.f32.mrb[15].mxu1  ;;  %v898_v14 = vld [vmem:[#allocation2 + $0x4e] sm:$0x3] }
  0xfc   :  { %518 = vst.msk [vmem:[#allocation2 + $0x68] sm:$0xff] %vm58_vm1, %v513_v42  ;;  %v952_v18 = vld [vmem:[#allocation2 + $0x5e] sm:$0x3] }
  0xfd   :  { %587 = vst.msk [vmem:[#allocation2 + $0x78] sm:$0xff] %vm58_vm1, %v582_v45 }
  0xff   :  { %v677_v48 = vpop.f32.mrb[16].mxu0 }
 0x100   :  { %v683_v49 = vadd.f32 %v677_v48, %v627_v47  ;;  %v731_v51 = vpop.f32.mrb[16].mxu1  ;;  %v4993_v52 = vpop.f32.mrb[17].mxu0 }
 0x101   :  { %v737_v53 = vadd.f32 %v731_v51, %v684_v50  ;;  %v5001_v54 = vpop.f32.mrb[17].mxu1  ;;  %v680_v55 = vpop.f32.mrb[18].mxu0 }
 0x102   :  { %v4591_v56 = vmul.f32 -1.442695, %v683_v49  ;;  %v734_v57 = vpop.f32.mrb[18].mxu1  ;;  %v4994_v58 = vpop.f32.mrb[19].mxu0 }
 0x103   :  { %v4592_v59 = vmul.f32 -1.442695, %v737_v53  ;;  %v5002_v60 = vpop.f32.mrb[19].mxu1  ;;  %v1006_v55 = vld [vmem:[#allocation2 + $0x6e] sm:$0x3] }
 0x104   :  { %5539 = vpow2.f32 %v4591_v56  ;;  %v1060_v47 = vld [vmem:[#allocation2 + $0x7e] sm:$0x3] }
 0x105   :  { %5541 = vpow2.f32 %v4592_v59 }
 0x107   :  { %v785_v61 = vpop.f32.mrb[20].mxu0 }
 0x108   :  { %v839_v63 = vpop.f32.mrb[20].mxu1  ;;  %v5009_v0 = vpop.f32.mrb[21].mxu0  ;;  %v791_v10 = vadd.f32 %v785_v61, %v738_v7  ;;  %v5866_v7 = vmov 1966171168  }
 0x109   :  { %v845_v1 = vadd.f32 %v839_v63, %v792_v62  ;;  %v5017_v3 = vpop.f32.mrb[21].mxu1  ;;  %v788_v4 = vpop.f32.mrb[22].mxu0 }
 0x10a   :  { %v842_v5 = vpop.f32.mrb[22].mxu1  ;;  %v5010_v6 = vpop.f32.mrb[23].mxu0 }
 0x10b   :  { %v4593_v8 = vmul.f32 -1.442695, %v845_v1  ;;  %v5018_v9 = vpop.f32.mrb[23].mxu1 }
 0x10c   :  { %v874_v9 = vlaneseq }
 0x10d   :  { %5543 = vpow2.f32 %v4593_v8  ;;  %v872_v8 = vunpack.c.l.s4 %v5866_v7 }
 0x10e   :  { %v5540_v11 = vpop.eup %5539  ;;  %5545 = vtanh.f32 %v791_v10 }
 0x10f   :  { %v5542_v12 = vpop.eup %5541  ;;  %v849_v13 = vadd.f32 1.0, %v5540_v11  ;;  %v945_v15 = vpop.f32.mrb[24].mxu0  ;;  %v873_v10 = vunpack.c.0.s8 %v872_v8  ;;  %v875_v11 = vshrl.u32 %v874_v9, 7 }
 0x110   :  { %v855_v16 = vadd.f32 1.0, %v5542_v12  ;;  %v951_v17 = vadd.f32 %v945_v15, %v898_v14  ;;  %v999_v19 = vpop.f32.mrb[24].mxu1  ;;  %v5025_v20 = vpop.f32.mrb[25].mxu0 }
 0x111   :  { %5547 = vrcp.f32 %v849_v13  ;;  %v1005_v27 = vadd.f32 %v999_v19, %v952_v18  ;;  %v5033_v38 = vpop.f32.mrb[25].mxu1  ;;  %v948_v39 = vpop.f32.mrb[26].mxu0  ;;  %v6196_v15 = vsub.s32 %v873_v10, %v875_v11 }
 0x112   :  { %5549 = vrcp.f32 %v855_v16  ;;  %v4602_v40 = vmul.f32 -1.442695, %v951_v17  ;;  %v1002_v41 = vpop.f32.mrb[26].mxu1  ;;  %v5026_v42 = vpop.f32.mrb[27].mxu0 }
 0x113   :  { %v4603_v43 = vmul.f32 -1.442695, %v1005_v27  ;;  %v5034_v44 = vpop.f32.mrb[27].mxu1 }
 0x114   :  { %5551 = vpow2.f32 %v4602_v40 }
 0x115   :  { %5553 = vpow2.f32 %v4603_v43 }
 0x117   :  { %v5544_v45 = vpop.eup %5543  ;;  %v1053_v46 = vpop.f32.mrb[28].mxu0 }
 0x118   :  { %v1107_v48 = vpop.f32.mrb[28].mxu1  ;;  %v5041_v49 = vpop.f32.mrb[29].mxu0  ;;  %v862_v54 = vadd.f32 1.0, %v5544_v45  ;;  %v1059_v59 = vadd.f32 %v1053_v46, %v1006_v55 }
 0x119   :  { %v1113_v50 = vadd.f32 %v1107_v48, %v1060_v47  ;;  %v5049_v51 = vpop.f32.mrb[29].mxu1  ;;  %v1056_v52 = vpop.f32.mrb[30].mxu0 }
 0x11a   :  { %v5546_v53 = vpop.eup %5545  ;;  %v1110_v56 = vpop.f32.mrb[30].mxu1  ;;  %5555 = vrcp.f32 %v862_v54 }
 0x11b   :  { %v5042_v57 = vpop.f32.mrb[31].mxu0  ;;  %v5548_v58 = vpop.eup %5547  ;;  %v4604_v63 = vmul.f32 -1.442695, %v1113_v50  ;;  %5557 = vtanh.f32 %v1059_v59  ;;  %v6235_v50 = vsub.s32 0, %v875_v11  ;;  %v1308_v11 = vld [vmem:[#allocation2 + $0x32] sm:$0x3] }
 0x11c   :  { %v5050_v60 = vpop.f32.mrb[31].mxu1  ;;  %v5550_v61 = vpop.eup %5549  ;;  %v866_v62 = vmul.f32 %v5548_v58, %v5546_v53  ;;  %v1179_v58 = vld [vmem:[#allocation2 + $0x2] sm:$0x3] }
 0x11d   :  { %v865_v0 = vmul.f32 0.0, %v5550_v61  ;;  %5559 = vpow2.f32 %v4604_v63  ;;  %v1224_v60 = vld [vmem:[#allocation2 + $0x12] sm:$0x3] }
 0x11e   :  { %v5552_v1 = vpop.eup %5551 }
 0x11f   :  { %v5554_v3 = vpop.eup %5553  ;;  %v6193_v4 = vadd.f32 %v866_v62, %v865_v0  ;;  %v1117_v5 = vadd.f32 1.0, %v5552_v1 }
 0x120   :  { %v1123_v6 = vadd.f32 1.0, %v5554_v3 }
 0x121   :  { %5561 = vtanh.f32 %v6193_v4 }
 0x122   :  { %5563 = vrcp.f32 %v1117_v5 }
 0x123   :  { %5565 = vrcp.f32 %v1123_v6 }
 0x124   :  { %v5556_v12 = vpop.eup %5555 }
 0x125   :  { %v5558_v13 = vpop.eup %5557 }
 0x127   :  { %v5560_v14 = vpop.eup %5559 }
 0x128   :  { %v1130_v27 = vadd.f32 1.0, %v5560_v14 }
 0x12a   :  { %5567 = vrcp.f32 %v1130_v27 }
 0x12b   :  { %v5562_v16 = vpop.eup %5561 }
 0x12c   :  { %v5564_v17 = vpop.eup %5563  ;;  %v869_v18 = vmul.f32 %v5562_v16, %v5556_v12 }
 0x12d   :  { %v5566_v19 = vpop.eup %5565  ;;  %v1134_v20 = vmul.f32 %v5564_v17, %v5558_v13 }
 0x12e   :  { %v1133_v38 = vmul.f32 0.0, %v5566_v19  ;;  %v1178_v39 = vpack.c.bf16 %v869_v18, %v869_v18  ;;  %v877_v40 = vrot.slane %v869_v18, %v6196_v15 }
 0x130   :  { %v6199_v41 = vadd.f32 %v1134_v20, %v1133_v38  ;;  %5056 = vmatmul.mubr.msk.bf16.vlgmr.msra.gmra.mrb[32].mxu0 %vm58_vm1, %v1178_v39  ;;  %5064 = vmatmul.mubr.msk.bf16.vlgmr.msra.gmra.mrb[32].mxu1 %vm58_vm1, %v1178_v39  ;;  %v885_v42 = vrot.slane %v877_v40, %v6196_v15  ;;  %v878_v43 = vcombine.high %v877_v40, %v877_v40  ;;  %v1266_v38 = vld [vmem:[#allocation2 + $0x22] sm:$0x3] }
 0x131   :  { %5068 = vmatpush3.bf16.msra.mxu0 %v6045_v25  ;;  %5076 = vmatpush3.bf16.msra.mxu1 %v6052_v26 }
 0x132   :  { %5569 = vtanh.f32 %v6199_v41  ;;  %5069 = vmatprep.subr.bf16.mxu0 %v5863_v2  ;;  %5077 = vmatprep.subr.bf16.mxu1 %v5863_v2  ;;  %896 = vst.msk [vmem:[#allocation3] sm:$0x1] %vm895_vm2, %v885_v42  ;;  %v892_v44 = vrot.slane %v878_v43, %v6196_v15 }
 0x133   :  { %5071 = vmatprep.mubr.msk.bf16.mxu0 %vm5864_vm0, %v5863_v2  ;;  %5079 = vmatprep.mubr.msk.bf16.mxu1 %vm5864_vm0, %v5863_v2 }
 0x134   :  { %897 = vst.msk [vmem:[#allocation3 + $0x8] sm:$0x1] %vm895_vm2, %v892_v44  ;;  %v5568_v45 = vpop.eup %5567  ;;  %v1402_v44 = vld [vmem:[#allocation2 + $0x4c] sm:$0x3] }
 0x135   :  { %5070 = vmatpush3.bf16.msra.mxu0 %v6059_v28  ;;  %5078 = vmatpush3.bf16.msra.mxu1 %v6066_v29 }
 0x136   :  { %5083 = vmatprep.subr.bf16.mxu0 %v5863_v2  ;;  %5091 = vmatprep.subr.bf16.mxu1 %v5863_v2 }
 0x138   :  { %5072 = vmatmul.mubr.msk.bf16.vlgmr.msra.gmra.mrb[36].mxu0 %vm58_vm1, %v1178_v39  ;;  %5080 = vmatmul.mubr.msk.bf16.vlgmr.msra.gmra.mrb[36].mxu1 %vm58_vm1, %v1178_v39 }
 0x139   :  { %5084 = vmatpush3.bf16.msra.mxu0 %v6077_v30  ;;  %5092 = vmatpush3.bf16.msra.mxu1 %v6084_v31 }
 0x13a   :  { %5085 = vmatprep.subr.bf16.mxu0 %v5863_v2  ;;  %5093 = vmatprep.subr.bf16.mxu1 %v5863_v2 }
 0x13b   :  { %5087 = vmatprep.mubr.msk.bf16.mxu0 %vm5864_vm0, %v5863_v2  ;;  %5095 = vmatprep.mubr.msk.bf16.mxu1 %vm5864_vm0, %v5863_v2 }
 0x13c   :  { %v5570_v46 = vpop.eup %5569 }
 0x13d   :  { %5086 = vmatpush3.bf16.msra.mxu0 %v6091_v32  ;;  %5094 = vmatpush3.bf16.msra.mxu1 %v6098_v33  ;;  %v1137_v47 = vmul.f32 %v5570_v46, %v5568_v45 }
 0x13e   :  { %5099 = vmatprep.subr.bf16.mxu0 %v5863_v2  ;;  %5107 = vmatprep.subr.bf16.mxu1 %v5863_v2 }
 0x13f   :  { %v1401_v48 = vpack.c.bf16 %v1137_v47, %v1137_v47  ;;  %v1145_v49 = vrot.slane %v1137_v47, %v6196_v15  ;;  %v1447_v47 = vld [vmem:[#allocation2 + $0x5c] sm:$0x3] }
 0x141   :  { %5088 = vmatmul.mubr.msk.bf16.vlgmr.msra.gmra.mrb[40].mxu0 %vm58_vm1, %v1401_v48  ;;  %5096 = vmatmul.mubr.msk.bf16.vlgmr.msra.gmra.mrb[40].mxu1 %vm58_vm1, %v1401_v48  ;;  %v1153_v51 = vrot.slane %v1145_v49, %v6196_v15  ;;  %v1146_v52 = vcombine.high %v1145_v49, %v1145_v49 }
 0x142   :  { %5100 = vmatpush3.bf16.msra.mxu0 %v6109_v34  ;;  %5108 = vmatpush3.bf16.msra.mxu1 %v6116_v35 }
 0x143   :  { %5101 = vmatprep.subr.bf16.mxu0 %v5863_v2  ;;  %5109 = vmatprep.subr.bf16.mxu1 %v5863_v2  ;;  %v1164_v53 = vrot.slane %v1153_v51, %v6235_v50  ;;  %v1160_v54 = vrot.slane %v1146_v52, %v6196_v15 }
 0x144   :  { %5103 = vmatprep.mubr.msk.bf16.mxu0 %vm5864_vm0, %v5863_v2  ;;  %5111 = vmatprep.mubr.msk.bf16.mxu1 %vm5864_vm0, %v5863_v2 }
 0x145   :  { %1169 = vrot.lane.b32.xlu0 %v1164_v53, %s5867_s2  ;;  %v1168_v55 = vrot.slane %v1160_v54, %v6235_v50 }
 0x146   :  { %5102 = vmatpush3.bf16.msra.mxu0 %v6123_v36  ;;  %5110 = vmatpush3.bf16.msra.mxu1 %v6130_v37 }
 0x147   :  { %5115 = vmatprep.subr.bf16.mxu0 %v5863_v2  ;;  %5123 = vmatprep.subr.bf16.mxu1 %v5863_v2 }
 0x149   :  { %5104 = vmatmul.mubr.msk.bf16.vlgmr.msra.gmra.mrb[44].mxu0 %vm58_vm1, %v1401_v48  ;;  %5112 = vmatmul.mubr.msk.bf16.vlgmr.msra.gmra.mrb[44].mxu1 %vm58_vm1, %v1401_v48 }
 0x14a   :  { %1171 = vrot.lane.b32.xlu0 %v1168_v55, %s5867_s2  ;;  %5116 = vmatpush3.bf16.msra.mxu0 %v6012_v21 }
 0x14b   :  { %5124 = vmatpush3.bf16.msra.mxu1 %v6018_v22  ;;  %5117 = vmatprep.subr.bf16.mxu0 %v5863_v2 }
 0x14c   :  { %5125 = vmatprep.subr.bf16.mxu1 %v5863_v2  ;;  %5119 = vmatprep.mubr.msk.bf16.mxu0 %vm5864_vm0, %v5863_v2 }
 0x14d   :  { %5127 = vmatprep.mubr.msk.bf16.mxu1 %vm5864_vm0, %v5863_v2 }
 0x14e   :  { %5118 = vmatpush3.bf16.msra.mxu0 %v6027_v23 }
 0x14f   :  { %5126 = vmatpush3.bf16.msra.mxu1 %v6034_v24  ;;  %5131 = vmatprep.subr.bf16.mxu0 %v5863_v2 }
 0x150   :  { %5139 = vmatprep.subr.bf16.mxu1 %v5863_v2 }
 0x1b7   :  { %v1170_v56 = vpop.permute.xlu0 %1169 }
 0x1b8   :  { %1176 = vst.msk [vmem:[#allocation3 + $0x7] sm:$0x1] %vm1175_vm3, %v1170_v56 }
 0x1bc   :  { %v1172_v57 = vpop.permute.xlu0 %1171 }
 0x1bd   :  { %1177 = vst.msk [vmem:[#allocation3 + $0xf] sm:$0x1] %vm1175_vm3, %v1172_v57 }
 0x203   :  { %v1217_v59 = vpop.f32.mrb[32].mxu0  ;;  %v1259_v61 = vpop.f32.mrb[32].mxu1 }
 0x204   :  { %v1223_v62 = vadd.f32 %v1217_v59, %v1179_v58  ;;  %v1265_v63 = vadd.f32 %v1259_v61, %v1224_v60  ;;  %v5057_v0 = vpop.f32.mrb[33].mxu0  ;;  %v5065_v1 = vpop.f32.mrb[33].mxu1 }
 0x205   :  { %v1220_v3 = vpop.f32.mrb[34].mxu0  ;;  %v1262_v5 = vpop.f32.mrb[34].mxu1 }
 0x206   :  { %v4609_v6 = vmul.f32 -1.442695, %v1223_v62  ;;  %v4610_v7 = vmul.f32 -1.442695, %v1265_v63  ;;  %v5058_v8 = vpop.f32.mrb[35].mxu0  ;;  %v5066_v9 = vpop.f32.mrb[35].mxu1 }
 0x207   :  { %v1531_v62 = vld [vmem:[#allocation2 + $0x7c] sm:$0x3] }
 0x208   :  { %5571 = vpow2.f32 %v4609_v6 }
 0x209   :  { %5573 = vpow2.f32 %v4610_v7  ;;  %v1489_v7 = vld [vmem:[#allocation2 + $0x6c] sm:$0x3] }
 0x20b   :  { %v1301_v10 = vpop.f32.mrb[36].mxu0  ;;  %v1343_v12 = vpop.f32.mrb[36].mxu1 }
 0x20c   :  { %v1349_v13 = vadd.f32 %v1343_v12, %v1308_v11  ;;  %v5073_v14 = vpop.f32.mrb[37].mxu0  ;;  %v5081_v16 = vpop.f32.mrb[37].mxu1  ;;  %v1307_v39 = vadd.f32 %v1301_v10, %v1266_v38 }
 0x20d   :  { %v1304_v17 = vpop.f32.mrb[38].mxu0  ;;  %v1346_v18 = vpop.f32.mrb[38].mxu1 }
 0x20e   :  { %v4611_v19 = vmul.f32 -1.442695, %v1349_v13  ;;  %v5074_v20 = vpop.f32.mrb[39].mxu0  ;;  %v5082_v27 = vpop.f32.mrb[39].mxu1 }
 0x210   :  { %5575 = vpow2.f32 %v4611_v19 }
 0x211   :  { %5577 = vtanh.f32 %v1307_v39 }
 0x212   :  { %v5572_v40 = vpop.eup %5571 }
 0x213   :  { %v5574_v42 = vpop.eup %5573  ;;  %v1353_v43 = vadd.f32 1.0, %v5572_v40 }
 0x214   :  { %v1359_v45 = vadd.f32 1.0, %v5574_v42  ;;  %v1440_v46 = vpop.f32.mrb[40].mxu0  ;;  %v1482_v48 = vpop.f32.mrb[40].mxu1 }
 0x215   :  { %5579 = vrcp.f32 %v1353_v43  ;;  %v1446_v49 = vadd.f32 %v1440_v46, %v1402_v44  ;;  %v1488_v51 = vadd.f32 %v1482_v48, %v1447_v47  ;;  %v5089_v52 = vpop.f32.mrb[41].mxu0  ;;  %v5097_v53 = vpop.f32.mrb[41].mxu1 }
 0x216   :  { %5581 = vrcp.f32 %v1359_v45  ;;  %v1443_v54 = vpop.f32.mrb[42].mxu0  ;;  %v1485_v55 = vpop.f32.mrb[42].mxu1 }
 0x217   :  { %v4616_v56 = vmul.f32 -1.442695, %v1446_v49  ;;  %v4617_v57 = vmul.f32 -1.442695, %v1488_v51  ;;  %v5090_v58 = vpop.f32.mrb[43].mxu0  ;;  %v5098_v59 = vpop.f32.mrb[43].mxu1 }
 0x219   :  { %5583 = vpow2.f32 %v4616_v56 }
 0x21a   :  { %5585 = vpow2.f32 %v4617_v57  ;;  %v5576_v60 = vpop.eup %5575 }
 0x21b   :  { %v5578_v5 = vpop.eup %5577  ;;  %v1366_v6 = vadd.f32 1.0, %v5576_v60 }
 0x21c   :  { %v1524_v61 = vpop.f32.mrb[44].mxu0  ;;  %v1566_v63 = vpop.f32.mrb[44].mxu1 }
 0x21d   :  { %v1572_v0 = vadd.f32 %v1566_v63, %v1531_v62  ;;  %v5105_v1 = vpop.f32.mrb[45].mxu0  ;;  %v5113_v3 = vpop.f32.mrb[45].mxu1  ;;  %v1530_v11 = vadd.f32 %v1524_v61, %v1489_v7  ;;  %5587 = vrcp.f32 %v1366_v6 }
 0x21e   :  { %v1527_v8 = vpop.f32.mrb[46].mxu0  ;;  %v1569_v9 = vpop.f32.mrb[46].mxu1 }
 0x21f   :  { %v5580_v10 = vpop.eup %5579  ;;  %v5106_v12 = vpop.f32.mrb[47].mxu0  ;;  %v4618_v17 = vmul.f32 -1.442695, %v1572_v0  ;;  %5589 = vtanh.f32 %v1530_v11 }
 0x220   :  { %v5114_v13 = vpop.f32.mrb[47].mxu1  ;;  %v5582_v14 = vpop.eup %5581  ;;  %v1370_v16 = vmul.f32 %v5580_v10, %v5578_v5  ;;  %v1766_v5 = vld [vmem:[#allocation2 + $0x34] sm:$0x3] }
 0x221   :  { %v1369_v18 = vmul.f32 %v5582_v14, %v6193_v4  ;;  %5591 = vpow2.f32 %v4618_v17 }
 0x223   :  { %v5584_v19 = vpop.eup %5583  ;;  %v6274_v20 = vadd.f32 %v1370_v16, %v1369_v18  ;;  %v1724_v16 = vld [vmem:[#allocation2 + $0x24] sm:$0x3] }
 0x224   :  { %v5586_v27 = vpop.eup %5585  ;;  %v1576_v38 = vadd.f32 1.0, %v5584_v19 }
 0x225   :  { %5593 = vtanh.f32 %v6274_v20  ;;  %v1582_v39 = vadd.f32 1.0, %v5586_v27 }
 0x226   :  { %5595 = vrcp.f32 %v1576_v38  ;;  %v1860_v38 = vld [vmem:[#allocation2 + $0x4a] sm:$0x3] }
 0x227   :  { %5597 = vrcp.f32 %v1582_v39  ;;  %v5588_v40 = vpop.eup %5587 }
 0x229   :  { %v5590_v42 = vpop.eup %5589 }
 0x22b   :  { %v5592_v43 = vpop.eup %5591 }
 0x22c   :  { %v1589_v48 = vadd.f32 1.0, %v5592_v43 }
 0x22e   :  { %5599 = vrcp.f32 %v1589_v48 }
 0x22f   :  { %v5594_v44 = vpop.eup %5593 }
 0x230   :  { %v5596_v45 = vpop.eup %5595  ;;  %v1373_v46 = vmul.f32 %v5594_v44, %v5588_v40 }
 0x231   :  { %v5598_v4 = vpop.eup %5597  ;;  %v1593_v47 = vmul.f32 %v5596_v45, %v5590_v42  ;;  %v1905_v42 = vld [vmem:[#allocation2 + $0x5a] sm:$0x3] }
 0x232   :  { %v1592_v49 = vmul.f32 %v5598_v4, %v6199_v41  ;;  %v1636_v51 = vpack.c.bf16 %v1373_v46, %v1373_v46  ;;  %v1381_v52 = vrot.slane %v1373_v46, %v6196_v15 }
 0x234   :  { %v6279_v53 = vadd.f32 %v1593_v47, %v1592_v49  ;;  %5120 = vmatmul.mubr.msk.bf16.vlgmr.msra.gmra.mrb[48].mxu0 %vm58_vm1, %v1636_v51  ;;  %5128 = vmatmul.mubr.msk.bf16.vlgmr.msra.gmra.mrb[48].mxu1 %vm58_vm1, %v1636_v51  ;;  %v1389_v54 = vrot.slane %v1381_v52, %v6196_v15  ;;  %v1382_v55 = vcombine.high %v1381_v52, %v1381_v52 }
 0x235   :  { %5132 = vmatpush3.bf16.msra.mxu0 %v6045_v25  ;;  %5140 = vmatpush3.bf16.msra.mxu1 %v6052_v26 }
 0x236   :  { %5601 = vtanh.f32 %v6279_v53  ;;  %5133 = vmatprep.subr.bf16.mxu0 %v5863_v2  ;;  %5141 = vmatprep.subr.bf16.mxu1 %v5863_v2  ;;  %1399 = vst.msk [vmem:[#allocation3 + $0x1] sm:$0x1] %vm895_vm2, %v1389_v54  ;;  %v1396_v41 = vrot.slane %v1382_v55, %v6196_v15 }
 0x237   :  { %5135 = vmatprep.mubr.msk.bf16.mxu0 %vm5864_vm0, %v5863_v2  ;;  %5143 = vmatprep.mubr.msk.bf16.mxu1 %vm5864_vm0, %v5863_v2 }
 0x238   :  { %1400 = vst.msk [vmem:[#allocation3 + $0x9] sm:$0x1] %vm895_vm2, %v1396_v41  ;;  %v5600_v25 = vpop.eup %5599 }
 0x239   :  { %5134 = vmatpush3.bf16.msra.mxu0 %v6059_v28  ;;  %5142 = vmatpush3.bf16.msra.mxu1 %v6066_v29 }
 0x23a   :  { %5147 = vmatprep.subr.bf16.mxu0 %v5863_v2  ;;  %5155 = vmatprep.subr.bf16.mxu1 %v5863_v2 }
 0x23c   :  { %5136 = vmatmul.mubr.msk.bf16.vlgmr.msra.gmra.mrb[52].mxu0 %vm58_vm1, %v1636_v51  ;;  %5144 = vmatmul.mubr.msk.bf16.vlgmr.msra.gmra.mrb[52].mxu1 %vm58_vm1, %v1636_v51 }
 0x23d   :  { %5148 = vmatpush3.bf16.msra.mxu0 %v6077_v30  ;;  %5156 = vmatpush3.bf16.msra.mxu1 %v6084_v31 }
 0x23e   :  { %5149 = vmatprep.subr.bf16.mxu0 %v5863_v2  ;;  %5157 = vmatprep.subr.bf16.mxu1 %v5863_v2 }
 0x23f   :  { %5151 = vmatprep.mubr.msk.bf16.mxu0 %vm5864_vm0, %v5863_v2  ;;  %5159 = vmatprep.mubr.msk.bf16.mxu1 %vm5864_vm0, %v5863_v2 }
 0x240   :  { %v5602_v26 = vpop.eup %5601 }
 0x241   :  { %5150 = vmatpush3.bf16.msra.mxu0 %v6091_v32  ;;  %5158 = vmatpush3.bf16.msra.mxu1 %v6098_v33  ;;  %v1596_v28 = vmul.f32 %v5602_v26, %v5600_v25  ;;  %v1989_v25 = vld [vmem:[#allocation2 + $0x7a] sm:$0x3] }
 0x242   :  { %5163 = vmatprep.subr.bf16.mxu0 %v5863_v2  ;;  %5171 = vmatprep.subr.bf16.mxu1 %v5863_v2 }
 0x243   :  { %v1859_v29 = vpack.c.bf16 %v1596_v28, %v1596_v28  ;;  %v1604_v30 = vrot.slane %v1596_v28, %v6196_v15 }
 0x245   :  { %5152 = vmatmul.mubr.msk.bf16.vlgmr.msra.gmra.mrb[56].mxu0 %vm58_vm1, %v1859_v29  ;;  %5160 = vmatmul.mubr.msk.bf16.vlgmr.msra.gmra.mrb[56].mxu1 %vm58_vm1, %v1859_v29  ;;  %v1612_v31 = vrot.slane %v1604_v30, %v6196_v15  ;;  %v1605_v56 = vcombine.high %v1604_v30, %v1604_v30 }
 0x246   :  { %5164 = vmatpush3.bf16.msra.mxu0 %v6109_v34  ;;  %5172 = vmatpush3.bf16.msra.mxu1 %v6116_v35  ;;  %v1637_v35 = vld [vmem:[#allocation2 + $0x4] sm:$0x3] }
 0x247   :  { %5165 = vmatprep.subr.bf16.mxu0 %v5863_v2  ;;  %5173 = vmatprep.subr.bf16.mxu1 %v5863_v2  ;;  %v1623_v32 = vrot.slane %v1612_v31, %v6235_v50  ;;  %v1619_v33 = vrot.slane %v1605_v56, %v6196_v15 }
 0x248   :  { %5167 = vmatprep.mubr.msk.bf16.mxu0 %vm5864_vm0, %v5863_v2  ;;  %5175 = vmatprep.mubr.msk.bf16.mxu1 %vm5864_vm0, %v5863_v2 }
 0x249   :  { %1628 = vrot.lane.b32.xlu1 %v1623_v32, %s5867_s2  ;;  %v1627_v34 = vrot.slane %v1619_v33, %v6235_v50  ;;  %v1947_v32 = vld [vmem:[#allocation2 + $0x6a] sm:$0x3] }
 0x24a   :  { %5166 = vmatpush3.bf16.msra.mxu0 %v6123_v36  ;;  %5174 = vmatpush3.bf16.msra.mxu1 %v6130_v37  ;;  %v1682_v37 = vld [vmem:[#allocation2 + $0x14] sm:$0x3] }
 0x24b   :  { %5179 = vmatprep.subr.bf16.mxu0 %v5863_v2  ;;  %5187 = vmatprep.subr.bf16.mxu1 %v5863_v2 }
 0x24d   :  { %5168 = vmatmul.mubr.msk.bf16.vlgmr.msra.gmra.mrb[60].mxu0 %vm58_vm1, %v1859_v29  ;;  %5176 = vmatmul.mubr.msk.bf16.vlgmr.msra.gmra.mrb[60].mxu1 %vm58_vm1, %v1859_v29 }
 0x24e   :  { %1630 = vrot.lane.b32.xlu1 %v1627_v34, %s5867_s2  ;;  %5180 = vmatpush3.bf16.msra.mxu0 %v6012_v21 }
 0x24f   :  { %5188 = vmatpush3.bf16.msra.mxu1 %v6018_v22  ;;  %5181 = vmatprep.subr.bf16.mxu0 %v5863_v2 }
 0x250   :  { %5189 = vmatprep.subr.bf16.mxu1 %v5863_v2  ;;  %5183 = vmatprep.mubr.msk.bf16.mxu0 %vm5864_vm0, %v5863_v2 }
 0x251   :  { %5191 = vmatprep.mubr.msk.bf16.mxu1 %vm5864_vm0, %v5863_v2 }
 0x252   :  { %5182 = vmatpush3.bf16.msra.mxu0 %v6027_v23 }
 0x253   :  { %5190 = vmatpush3.bf16.msra.mxu1 %v6034_v24  ;;  %5195 = vmatprep.subr.bf16.mxu0 %v5863_v2 }
 0x254   :  { %5203 = vmatprep.subr.bf16.mxu1 %v5863_v2 }
 0x2bb   :  { %v1629_v21 = vpop.permute.xlu1 %1628 }
 0x2bc   :  { %1634 = vst.msk [vmem:[#allocation3 + $0x6] sm:$0x1] %vm1175_vm3, %v1629_v21 }
 0x2c0   :  { %v1631_v22 = vpop.permute.xlu1 %1630 }
 0x2c1   :  { %1635 = vst.msk [vmem:[#allocation3 + $0xe] sm:$0x1] %vm1175_vm3, %v1631_v22 }
 0x307   :  { %v1675_v36 = vpop.f32.mrb[48].mxu0  ;;  %v1717_v57 = vpop.f32.mrb[48].mxu1 }
 0x308   :  { %v1681_v58 = vadd.f32 %v1675_v36, %v1637_v35  ;;  %v1723_v59 = vadd.f32 %v1717_v57, %v1682_v37  ;;  %v5121_v60 = vpop.f32.mrb[49].mxu0  ;;  %v5129_v23 = vpop.f32.mrb[49].mxu1 }
 0x309   :  { %v1678_v61 = vpop.f32.mrb[50].mxu0  ;;  %v1720_v24 = vpop.f32.mrb[50].mxu1 }
 0x30a   :  { %v4623_v62 = vmul.f32 -1.442695, %v1681_v58  ;;  %v4624_v63 = vmul.f32 -1.442695, %v1723_v59  ;;  %v5122_v0 = vpop.f32.mrb[51].mxu0  ;;  %v5130_v1 = vpop.f32.mrb[51].mxu1 }
 0x30c   :  { %5603 = vpow2.f32 %v4623_v62 }
 0x30d   :  { %5605 = vpow2.f32 %v4624_v63 }
 0x30f   :  { %v1759_v3 = vpop.f32.mrb[52].mxu0  ;;  %v1801_v6 = vpop.f32.mrb[52].mxu1 }
 0x310   :  { %v1807_v7 = vadd.f32 %v1801_v6, %v1766_v5  ;;  %v5137_v8 = vpop.f32.mrb[53].mxu0  ;;  %v5145_v9 = vpop.f32.mrb[53].mxu1  ;;  %v1765_v17 = vadd.f32 %v1759_v3, %v1724_v16  ;;  %v6365_v16 = vld [vmem:[%s6881_s3 + $0x20] sm:$0xff]  }
 0x311   :  { %v1762_v10 = vpop.f32.mrb[54].mxu0  ;;  %v1804_v11 = vpop.f32.mrb[54].mxu1 }
 0x312   :  { %v4625_v12 = vmul.f32 -1.442695, %v1807_v7  ;;  %v5138_v13 = vpop.f32.mrb[55].mxu0  ;;  %v5146_v14 = vpop.f32.mrb[55].mxu1 }
 0x314   :  { %5607 = vpow2.f32 %v4625_v12 }
 0x315   :  { %5609 = vtanh.f32 %v1765_v17 }
 0x316   :  { %v5604_v18 = vpop.eup %5603 }
 0x317   :  { %v5606_v19 = vpop.eup %5605  ;;  %v1811_v27 = vadd.f32 1.0, %v5604_v18  ;;  %v6387_v18 = vld [vmem:[%s6881_s3 + $0x28] sm:$0xff]  }
 0x318   :  { %v1817_v39 = vadd.f32 1.0, %v5606_v19  ;;  %v1898_v40 = vpop.f32.mrb[56].mxu0  ;;  %v1940_v43 = vpop.f32.mrb[56].mxu1  ;;  %v6393_v19 = vld [vmem:[%s6881_s3 + $0x38] sm:$0xff]  }
 0x319   :  { %5611 = vrcp.f32 %v1811_v27  ;;  %v1904_v44 = vadd.f32 %v1898_v40, %v1860_v38  ;;  %v1946_v45 = vadd.f32 %v1940_v43, %v1905_v42  ;;  %v5153_v46 = vpop.f32.mrb[57].mxu0  ;;  %v5161_v4 = vpop.f32.mrb[57].mxu1  ;;  %v6403_v27 = vld [vmem:[%s6881_s3 + $0x40] sm:$0xff]   ;;  %v6409_v38 = vld [vmem:[%s6881_s3 + $0x50] sm:$0xff]   ;;  %v6421_v42 = vld [vmem:[%s6881_s3 + $0x48] sm:$0xff]  }
 0x31a   :  { %5613 = vrcp.f32 %v1817_v39  ;;  %v1901_v47 = vpop.f32.mrb[58].mxu0  ;;  %v1943_v48 = vpop.f32.mrb[58].mxu1  ;;  %v6427_v43 = vld [vmem:[%s6881_s3 + $0x58] sm:$0xff]  }
 0x31b   :  { %v4630_v49 = vmul.f32 -1.442695, %v1904_v44  ;;  %v4631_v51 = vmul.f32 -1.442695, %v1946_v45  ;;  %v5154_v52 = vpop.f32.mrb[59].mxu0  ;;  %v5162_v54 = vpop.f32.mrb[59].mxu1 }
 0x31c   :  { %v6439_v48 = vld [vmem:[%s6881_s3 + $0x60] sm:$0xff]  }
 0x31d   :  { %5615 = vpow2.f32 %v4630_v49  ;;  %v6445_v49 = vld [vmem:[%s6881_s3 + $0x70] sm:$0xff]  }
 0x31e   :  { %5617 = vpow2.f32 %v4631_v51  ;;  %v5608_v55 = vpop.eup %5607 }
 0x31f   :  { %v5610_v31 = vpop.eup %5609  ;;  %v1824_v56 = vadd.f32 1.0, %v5608_v55  ;;  %v6461_v55 = vld [vmem:[%s6881_s3 + $0x68] sm:$0xff]  }
 0x320   :  { %v1982_v41 = vpop.f32.mrb[60].mxu0  ;;  %v2024_v26 = vpop.f32.mrb[60].mxu1 }
 0x321   :  { %v2030_v28 = vadd.f32 %v2024_v26, %v1989_v25  ;;  %v5169_v29 = vpop.f32.mrb[61].mxu0  ;;  %v5177_v30 = vpop.f32.mrb[61].mxu1  ;;  %v1988_v22 = vadd.f32 %v1982_v41, %v1947_v32  ;;  %5619 = vrcp.f32 %v1824_v56  ;;  %v6467_v41 = vld [vmem:[%s6881_s3 + $0x78] sm:$0xff]   ;;  %v6478_v25 = vld [vmem:[%s6881_s3] sm:$0xff]   ;;  %v6484_v26 = vld [vmem:[%s6881_s3 + $0x10] sm:$0xff]  }
 0x322   :  { %v1985_v33 = vpop.f32.mrb[62].mxu0  ;;  %v2027_v34 = vpop.f32.mrb[62].mxu1  ;;  %v6502_v29 = vld [vmem:[%s6881_s3 + $0x18] sm:$0xff]   ;;  %v2095_v56 = vld [vmem:[#allocation2 + $0x6] sm:$0x3] }
 0x323   :  { %v5612_v21 = vpop.eup %5611  ;;  %v5170_v35 = vpop.f32.mrb[63].mxu0  ;;  %v4632_v58 = vmul.f32 -1.442695, %v2030_v28  ;;  %5621 = vtanh.f32 %v1988_v22  ;;  %v6496_v28 = vld [vmem:[%s6881_s3 + $0x8] sm:$0xff]   ;;  %v2140_v33 = vld [vmem:[#allocation2 + $0x16] sm:$0x3] }
 0x324   :  { %v5178_v36 = vpop.f32.mrb[63].mxu1  ;;  %v5614_v37 = vpop.eup %5613  ;;  %v1828_v57 = vmul.f32 %v5612_v21, %v5610_v31 }
 0x325   :  { %v1827_v59 = vmul.f32 %v5614_v37, %v6274_v20  ;;  %5623 = vpow2.f32 %v4632_v58 }
 0x327   :  { %v5616_v60 = vpop.eup %5615  ;;  %v6352_v23 = vadd.f32 %v1828_v57, %v1827_v59 }
 0x328   :  { %v5618_v61 = vpop.eup %5617  ;;  %v2034_v24 = vadd.f32 1.0, %v5616_v60 }
 0x329   :  { %5625 = vtanh.f32 %v6352_v23  ;;  %v2040_v62 = vadd.f32 1.0, %v5618_v61 }
 0x32a   :  { %5627 = vrcp.f32 %v2034_v24 }
 0x32b   :  { %5629 = vrcp.f32 %v2040_v62  ;;  %v5620_v63 = vpop.eup %5619  ;;  %v2224_v62 = vld [vmem:[#allocation2 + $0x36] sm:$0x3] }
 0x32d   :  { %v5622_v0 = vpop.eup %5621 }
 0x32f   :  { %v5624_v1 = vpop.eup %5623 }
 0x330   :  { %v2047_v8 = vadd.f32 1.0, %v5624_v1 }
 0x332   :  { %5631 = vrcp.f32 %v2047_v8 }
 0x333   :  { %v5626_v3 = vpop.eup %5625 }
 0x334   :  { %v5628_v5 = vpop.eup %5627  ;;  %v1831_v6 = vmul.f32 %v5626_v3, %v5620_v63 }
 0x335   :  { %v5630_v20 = vpop.eup %5629  ;;  %v2051_v7 = vmul.f32 %v5628_v5, %v5622_v0 }
 0x336   :  { %v2050_v9 = vmul.f32 %v5630_v20, %v6279_v53  ;;  %v2094_v10 = vpack.c.bf16 %v1831_v6, %v1831_v6  ;;  %v1839_v11 = vrot.slane %v1831_v6, %v6196_v15  ;;  %v6371_v53 = vld [vmem:[%s6881_s3 + $0x30] sm:$0xff]  }
 0x338   :  { %v6357_v12 = vadd.f32 %v2051_v7, %v2050_v9  ;;  %5184 = vmatmul.mubr.msk.bf16.vlgmr.msra.gmra.mrb[64].mxu0 %vm58_vm1, %v2094_v10  ;;  %5192 = vmatmul.mubr.msk.bf16.vlgmr.msra.gmra.mrb[64].mxu1 %vm58_vm1, %v2094_v10  ;;  %v1847_v13 = vrot.slane %v1839_v11, %v6196_v15  ;;  %v1840_v14 = vcombine.high %v1839_v11, %v1839_v11  ;;  %v2182_v9 = vld [vmem:[#allocation2 + $0x26] sm:$0x3] }
 0x339   :  { %5196 = vmatpush3.bf16.msra.mxu0 %v6365_v16  ;;  %5204 = vmatpush3.bf16.msra.mxu1 %v6371_v53 }
 0x33a   :  { %5633 = vtanh.f32 %v6357_v12  ;;  %5197 = vmatprep.subr.bf16.mxu0 %v5863_v2  ;;  %5205 = vmatprep.subr.bf16.mxu1 %v5863_v2  ;;  %1857 = vst.msk [vmem:[#allocation3 + $0x2] sm:$0x1] %vm895_vm2, %v1847_v13  ;;  %v1854_v17 = vrot.slane %v1840_v14, %v6196_v15 }
 0x33b   :  { %5199 = vmatprep.mubr.msk.bf16.mxu0 %vm5864_vm0, %v5863_v2  ;;  %5207 = vmatprep.mubr.msk.bf16.mxu1 %vm5864_vm0, %v5863_v2 }
 0x33c   :  { %1858 = vst.msk [vmem:[#allocation3 + $0xa] sm:$0x1] %vm895_vm2, %v1854_v17  ;;  %v5632_v39 = vpop.eup %5631  ;;  %v2318_v17 = vld [vmem:[#allocation2 + $0x48] sm:$0x3] }
 0x33d   :  { %5198 = vmatpush3.bf16.msra.mxu0 %v6387_v18  ;;  %5206 = vmatpush3.bf16.msra.mxu1 %v6393_v19 }
 0x33e   :  { %5211 = vmatprep.subr.bf16.mxu0 %v5863_v2  ;;  %5219 = vmatprep.subr.bf16.mxu1 %v5863_v2 }
 0x340   :  { %5200 = vmatmul.mubr.msk.bf16.vlgmr.msra.gmra.mrb[68].mxu0 %vm58_vm1, %v2094_v10  ;;  %5208 = vmatmul.mubr.msk.bf16.vlgmr.msra.gmra.mrb[68].mxu1 %vm58_vm1, %v2094_v10 }
 0x341   :  { %5212 = vmatpush3.bf16.msra.mxu0 %v6403_v27  ;;  %5220 = vmatpush3.bf16.msra.mxu1 %v6409_v38 }
 0x342   :  { %5213 = vmatprep.subr.bf16.mxu0 %v5863_v2  ;;  %5221 = vmatprep.subr.bf16.mxu1 %v5863_v2 }
 0x343   :  { %5215 = vmatprep.mubr.msk.bf16.mxu0 %vm5864_vm0, %v5863_v2  ;;  %5223 = vmatprep.mubr.msk.bf16.mxu1 %vm5864_vm0, %v5863_v2 }
 0x344   :  { %v5634_v40 = vpop.eup %5633 }
 0x345   :  { %5214 = vmatpush3.bf16.msra.mxu0 %v6421_v42  ;;  %5222 = vmatpush3.bf16.msra.mxu1 %v6427_v43  ;;  %v2054_v44 = vmul.f32 %v5634_v40, %v5632_v39 }
 0x346   :  { %5227 = vmatprep.subr.bf16.mxu0 %v5863_v2  ;;  %5235 = vmatprep.subr.bf16.mxu1 %v5863_v2 }
 0x347   :  { %v2317_v45 = vpack.c.bf16 %v2054_v44, %v2054_v44  ;;  %v2062_v46 = vrot.slane %v2054_v44, %v6196_v15  ;;  %v2363_v44 = vld [vmem:[#allocation2 + $0x58] sm:$0x3] }
 0x349   :  { %5216 = vmatmul.mubr.msk.bf16.vlgmr.msra.gmra.mrb[72].mxu0 %vm58_vm1, %v2317_v45  ;;  %5224 = vmatmul.mubr.msk.bf16.vlgmr.msra.gmra.mrb[72].mxu1 %vm58_vm1, %v2317_v45  ;;  %v2070_v4 = vrot.slane %v2062_v46, %v6196_v15  ;;  %v2063_v47 = vcombine.high %v2062_v46, %v2062_v46 }
 0x34a   :  { %5228 = vmatpush3.bf16.msra.mxu0 %v6439_v48  ;;  %5236 = vmatpush3.bf16.msra.mxu1 %v6445_v49 }
 0x34b   :  { %5229 = vmatprep.subr.bf16.mxu0 %v5863_v2  ;;  %5237 = vmatprep.subr.bf16.mxu1 %v5863_v2  ;;  %v2081_v51 = vrot.slane %v2070_v4, %v6235_v50  ;;  %v2077_v52 = vrot.slane %v2063_v47, %v6196_v15 }
 0x34c   :  { %5231 = vmatprep.mubr.msk.bf16.mxu0 %vm5864_vm0, %v5863_v2  ;;  %5239 = vmatprep.mubr.msk.bf16.mxu1 %vm5864_vm0, %v5863_v2 }
 0x34d   :  { %2086 = vrot.lane.b32.xlu0 %v2081_v51, %s5867_s2  ;;  %v2085_v54 = vrot.slane %v2077_v52, %v6235_v50 }
 0x34e   :  { %5230 = vmatpush3.bf16.msra.mxu0 %v6461_v55  ;;  %5238 = vmatpush3.bf16.msra.mxu1 %v6467_v41 }
 0x34f   :  { %2088 = vrot.lane.b32.xlu1 %v2085_v54, %s5867_s2  ;;  %5243 = vmatprep.subr.bf16.mxu0 %v5863_v2 }
 0x350   :  { %5251 = vmatprep.subr.bf16.mxu1 %v5863_v2 }
 0x351   :  { %5232 = vmatmul.mubr.msk.bf16.vlgmr.msra.gmra.mrb[76].mxu0 %vm58_vm1, %v2317_v45  ;;  %5240 = vmatmul.mubr.msk.bf16.vlgmr.msra.gmra.mrb[76].mxu1 %vm58_vm1, %v2317_v45 }
 0x352   :  { %5244 = vmatpush3.bf16.msra.mxu0 %v6478_v25  ;;  %5252 = vmatpush3.bf16.msra.mxu1 %v6484_v26 }
 0x353   :  { %5245 = vmatprep.subr.bf16.mxu0 %v5863_v2  ;;  %5253 = vmatprep.subr.bf16.mxu1 %v5863_v2 }
 0x354   :  { %5247 = vmatprep.mubr.msk.bf16.mxu0 %vm5864_vm0, %v5863_v2  ;;  %5255 = vmatprep.mubr.msk.bf16.mxu1 %vm5864_vm0, %v5863_v2 }
 0x356   :  { %5246 = vmatpush3.bf16.msra.mxu0 %v6496_v28  ;;  %5254 = vmatpush3.bf16.msra.mxu1 %v6502_v29 }
 0x357   :  { %5259 = vmatprep.subr.bf16.mxu0 %v5863_v2  ;;  %5267 = vmatprep.subr.bf16.mxu1 %v5863_v2 }
 0x3bf   :  { %v2087_v30 = vpop.permute.xlu0 %2086 }
 0x3c0   :  { %2092 = vst.msk [vmem:[#allocation3 + $0x5] sm:$0x1] %vm1175_vm3, %v2087_v30 }
 0x3c1   :  { %v2089_v31 = vpop.permute.xlu1 %2088 }
 0x3c2   :  { %2093 = vst.msk [vmem:[#allocation3 + $0xd] sm:$0x1] %vm1175_vm3, %v2089_v31 }
 0x40b   :  { %v2133_v32 = vpop.f32.mrb[64].mxu0  ;;  %v2175_v34 = vpop.f32.mrb[64].mxu1 }
 0x40c   :  { %v2139_v21 = vadd.f32 %v2133_v32, %v2095_v56  ;;  %v2181_v22 = vadd.f32 %v2175_v34, %v2140_v33  ;;  %v5185_v35 = vpop.f32.mrb[65].mxu0  ;;  %v5193_v36 = vpop.f32.mrb[65].mxu1 }
 0x40d   :  { %v2136_v37 = vpop.f32.mrb[66].mxu0  ;;  %v2178_v57 = vpop.f32.mrb[66].mxu1 }
 0x40e   :  { %v4637_v58 = vmul.f32 -1.442695, %v2139_v21  ;;  %v4638_v59 = vmul.f32 -1.442695, %v2181_v22  ;;  %v5186_v60 = vpop.f32.mrb[67].mxu0  ;;  %v5194_v61 = vpop.f32.mrb[67].mxu1 }
 0x40f   :  { %v2447_v21 = vld [vmem:[#allocation2 + $0x78] sm:$0x3] }
 0x410   :  { %5635 = vpow2.f32 %v4637_v58 }
 0x411   :  { %5637 = vpow2.f32 %v4638_v59  ;;  %v2405_v59 = vld [vmem:[#allocation2 + $0x68] sm:$0x3] }
 0x413   :  { %v2217_v24 = vpop.f32.mrb[68].mxu0  ;;  %v2259_v63 = vpop.f32.mrb[68].mxu1 }
 0x414   :  { %v2265_v0 = vadd.f32 %v2259_v63, %v2224_v62  ;;  %v5201_v1 = vpop.f32.mrb[69].mxu0  ;;  %v5209_v3 = vpop.f32.mrb[69].mxu1  ;;  %v2223_v10 = vadd.f32 %v2217_v24, %v2182_v9 }
 0x415   :  { %v2220_v5 = vpop.f32.mrb[70].mxu0  ;;  %v2262_v6 = vpop.f32.mrb[70].mxu1 }
 0x416   :  { %v4639_v20 = vmul.f32 -1.442695, %v2265_v0  ;;  %v5202_v7 = vpop.f32.mrb[71].mxu0  ;;  %v5210_v8 = vpop.f32.mrb[71].mxu1 }
 0x418   :  { %5639 = vpow2.f32 %v4639_v20 }
 0x419   :  { %5641 = vtanh.f32 %v2223_v10 }
 0x41a   :  { %v5636_v11 = vpop.eup %5635 }
 0x41b   :  { %v5638_v13 = vpop.eup %5637  ;;  %v2269_v14 = vadd.f32 1.0, %v5636_v11 }
 0x41c   :  { %v2275_v39 = vadd.f32 1.0, %v5638_v13  ;;  %v2356_v40 = vpop.f32.mrb[72].mxu0  ;;  %v2398_v45 = vpop.f32.mrb[72].mxu1 }
 0x41d   :  { %5643 = vrcp.f32 %v2269_v14  ;;  %v2362_v46 = vadd.f32 %v2356_v40, %v2318_v17  ;;  %v2404_v4 = vadd.f32 %v2398_v45, %v2363_v44  ;;  %v5217_v47 = vpop.f32.mrb[73].mxu0  ;;  %v5225_v51 = vpop.f32.mrb[73].mxu1 }
 0x41e   :  { %5645 = vrcp.f32 %v2275_v39  ;;  %v2359_v52 = vpop.f32.mrb[74].mxu0  ;;  %v2401_v54 = vpop.f32.mrb[74].mxu1 }
 0x41f   :  { %v4644_v30 = vmul.f32 -1.442695, %v2362_v46  ;;  %v4645_v31 = vmul.f32 -1.442695, %v2404_v4  ;;  %v5218_v56 = vpop.f32.mrb[75].mxu0  ;;  %v5226_v32 = vpop.f32.mrb[75].mxu1 }
 0x421   :  { %5647 = vpow2.f32 %v4644_v30 }
 0x422   :  { %5649 = vpow2.f32 %v4645_v31  ;;  %v5640_v33 = vpop.eup %5639 }
 0x423   :  { %v5642_v57 = vpop.eup %5641  ;;  %v2282_v58 = vadd.f32 1.0, %v5640_v33 }
 0x424   :  { %v2440_v34 = vpop.f32.mrb[76].mxu0  ;;  %v2482_v22 = vpop.f32.mrb[76].mxu1 }
 0x425   :  { %v2488_v35 = vadd.f32 %v2482_v22, %v2447_v21  ;;  %v5233_v36 = vpop.f32.mrb[77].mxu0  ;;  %v5241_v37 = vpop.f32.mrb[77].mxu1  ;;  %v2446_v62 = vadd.f32 %v2440_v34, %v2405_v59  ;;  %5651 = vrcp.f32 %v2282_v58  ;;  %v2553_v58 = vld [vmem:[#allocation2 + $0x8] sm:$0x3] }
 0x426   :  { %v2443_v60 = vpop.f32.mrb[78].mxu0  ;;  %v2485_v61 = vpop.f32.mrb[78].mxu1 }
 0x427   :  { %v5644_v24 = vpop.eup %5643  ;;  %v5234_v63 = vpop.f32.mrb[79].mxu0  ;;  %v4646_v5 = vmul.f32 -1.442695, %v2488_v35  ;;  %5653 = vtanh.f32 %v2446_v62  ;;  %v2598_v60 = vld [vmem:[#allocation2 + $0x18] sm:$0x3] }
 0x428   :  { %v5242_v0 = vpop.f32.mrb[79].mxu1  ;;  %v5646_v1 = vpop.eup %5645  ;;  %v2286_v3 = vmul.f32 %v5644_v24, %v5642_v57 }
 0x429   :  { %v2285_v6 = vmul.f32 %v5646_v1, %v6352_v23  ;;  %5655 = vpow2.f32 %v4646_v5 }
 0x42b   :  { %v5648_v20 = vpop.eup %5647  ;;  %v6510_v7 = vadd.f32 %v2286_v3, %v2285_v6 }
 0x42c   :  { %v5650_v8 = vpop.eup %5649  ;;  %v2492_v9 = vadd.f32 1.0, %v5648_v20 }
 0x42d   :  { %5657 = vtanh.f32 %v6510_v7  ;;  %v2498_v10 = vadd.f32 1.0, %v5650_v8 }
 0x42e   :  { %5659 = vrcp.f32 %v2492_v9 }
 0x42f   :  { %5661 = vrcp.f32 %v2498_v10  ;;  %v5652_v11 = vpop.eup %5651  ;;  %v2682_v10 = vld [vmem:[#allocation2 + $0x38] sm:$0x3] }
 0x431   :  { %v5654_v13 = vpop.eup %5653 }
 0x433   :  { %v5656_v14 = vpop.eup %5655 }
 0x434   :  { %v2505_v45 = vadd.f32 1.0, %v5656_v14 }
 0x436   :  { %5663 = vrcp.f32 %v2505_v45 }
 0x437   :  { %v5658_v17 = vpop.eup %5657 }
 0x438   :  { %v5660_v39 = vpop.eup %5659  ;;  %v2289_v40 = vmul.f32 %v5658_v17, %v5652_v11 }
 0x439   :  { %v5662_v23 = vpop.eup %5661  ;;  %v2509_v44 = vmul.f32 %v5660_v39, %v5654_v13 }
 0x43a   :  { %v2508_v46 = vmul.f32 %v5662_v23, %v6357_v12  ;;  %v2552_v4 = vpack.c.bf16 %v2289_v40, %v2289_v40  ;;  %v2297_v47 = vrot.slane %v2289_v40, %v6196_v15 }
 0x43c   :  { %v6515_v51 = vadd.f32 %v2509_v44, %v2508_v46  ;;  %5248 = vmatmul.mubr.msk.bf16.vlgmr.msra.gmra.mrb[80].mxu0 %vm58_vm1, %v2552_v4  ;;  %5256 = vmatmul.mubr.msk.bf16.vlgmr.msra.gmra.mrb[80].mxu1 %vm58_vm1, %v2552_v4  ;;  %v2305_v52 = vrot.slane %v2297_v47, %v6196_v15  ;;  %v2298_v54 = vcombine.high %v2297_v47, %v2297_v47  ;;  %v2640_v46 = vld [vmem:[#allocation2 + $0x28] sm:$0x3] }
 0x43d   :  { %5260 = vmatpush3.bf16.msra.mxu0 %v6365_v16  ;;  %5268 = vmatpush3.bf16.msra.mxu1 %v6371_v53 }
 0x43e   :  { %5665 = vtanh.f32 %v6515_v51  ;;  %5261 = vmatprep.subr.bf16.mxu0 %v5863_v2  ;;  %5269 = vmatprep.subr.bf16.mxu1 %v5863_v2  ;;  %2315 = vst.msk [vmem:[#allocation3 + $0x3] sm:$0x1] %vm895_vm2, %v2305_v52  ;;  %v2312_v12 = vrot.slane %v2298_v54, %v6196_v15 }
 0x43f   :  { %5263 = vmatprep.mubr.msk.bf16.mxu0 %vm5864_vm0, %v5863_v2  ;;  %5271 = vmatprep.mubr.msk.bf16.mxu1 %vm5864_vm0, %v5863_v2 }
 0x440   :  { %2316 = vst.msk [vmem:[#allocation3 + $0xb] sm:$0x1] %vm895_vm2, %v2312_v12  ;;  %v5664_v30 = vpop.eup %5663  ;;  %v2776_v12 = vld [vmem:[#allocation2 + $0x46] sm:$0x3] }
 0x441   :  { %5262 = vmatpush3.bf16.msra.mxu0 %v6387_v18  ;;  %5270 = vmatpush3.bf16.msra.mxu1 %v6393_v19 }
 0x442   :  { %5275 = vmatprep.subr.bf16.mxu0 %v5863_v2  ;;  %5283 = vmatprep.subr.bf16.mxu1 %v5863_v2 }
 0x444   :  { %5264 = vmatmul.mubr.msk.bf16.vlgmr.msra.gmra.mrb[84].mxu0 %vm58_vm1, %v2552_v4  ;;  %5272 = vmatmul.mubr.msk.bf16.vlgmr.msra.gmra.mrb[84].mxu1 %vm58_vm1, %v2552_v4 }
 0x445   :  { %5276 = vmatpush3.bf16.msra.mxu0 %v6403_v27  ;;  %5284 = vmatpush3.bf16.msra.mxu1 %v6409_v38 }
 0x446   :  { %5277 = vmatprep.subr.bf16.mxu0 %v5863_v2  ;;  %5285 = vmatprep.subr.bf16.mxu1 %v5863_v2 }
 0x447   :  { %5279 = vmatprep.mubr.msk.bf16.mxu0 %vm5864_vm0, %v5863_v2  ;;  %5287 = vmatprep.mubr.msk.bf16.mxu1 %vm5864_vm0, %v5863_v2 }
 0x448   :  { %v5666_v31 = vpop.eup %5665 }
 0x449   :  { %5278 = vmatpush3.bf16.msra.mxu0 %v6421_v42  ;;  %5286 = vmatpush3.bf16.msra.mxu1 %v6427_v43  ;;  %v2512_v56 = vmul.f32 %v5666_v31, %v5664_v30 }
 0x44a   :  { %5291 = vmatprep.subr.bf16.mxu0 %v5863_v2  ;;  %5299 = vmatprep.subr.bf16.mxu1 %v5863_v2 }
 0x44b   :  { %v2775_v32 = vpack.c.bf16 %v2512_v56, %v2512_v56  ;;  %v2520_v33 = vrot.slane %v2512_v56, %v6196_v15  ;;  %v2821_v56 = vld [vmem:[#allocation2 + $0x56] sm:$0x3] }
 0x44d   :  { %5280 = vmatmul.mubr.msk.bf16.vlgmr.msra.gmra.mrb[88].mxu0 %vm58_vm1, %v2775_v32  ;;  %5288 = vmatmul.mubr.msk.bf16.vlgmr.msra.gmra.mrb[88].mxu1 %vm58_vm1, %v2775_v32  ;;  %v2528_v34 = vrot.slane %v2520_v33, %v6196_v15  ;;  %v2521_v21 = vcombine.high %v2520_v33, %v2520_v33 }
 0x44e   :  { %5292 = vmatpush3.bf16.msra.mxu0 %v6439_v48  ;;  %5300 = vmatpush3.bf16.msra.mxu1 %v6445_v49 }
 0x44f   :  { %5293 = vmatprep.subr.bf16.mxu0 %v5863_v2  ;;  %5301 = vmatprep.subr.bf16.mxu1 %v5863_v2  ;;  %v2539_v22 = vrot.slane %v2528_v34, %v6235_v50  ;;  %v2535_v35 = vrot.slane %v2521_v21, %v6196_v15 }
 0x450   :  { %5295 = vmatprep.mubr.msk.bf16.mxu0 %vm5864_vm0, %v5863_v2  ;;  %5303 = vmatprep.mubr.msk.bf16.mxu1 %vm5864_vm0, %v5863_v2 }
 0x451   :  { %2544 = vrot.lane.b32.xlu0 %v2539_v22, %s5867_s2  ;;  %v2543_v36 = vrot.slane %v2535_v35, %v6235_v50 }
 0x452   :  { %5294 = vmatpush3.bf16.msra.mxu0 %v6461_v55  ;;  %5302 = vmatpush3.bf16.msra.mxu1 %v6467_v41 }
 0x453   :  { %2546 = vrot.lane.b32.xlu1 %v2543_v36, %s5867_s2  ;;  %5307 = vmatprep.subr.bf16.mxu0 %v5863_v2 }
 0x454   :  { %5315 = vmatprep.subr.bf16.mxu1 %v5863_v2 }
 0x455   :  { %5296 = vmatmul.mubr.msk.bf16.vlgmr.msra.gmra.mrb[92].mxu0 %vm58_vm1, %v2775_v32  ;;  %5304 = vmatmul.mubr.msk.bf16.vlgmr.msra.gmra.mrb[92].mxu1 %vm58_vm1, %v2775_v32 }
 0x456   :  { %5308 = vmatpush3.bf16.msra.mxu0 %v6478_v25  ;;  %5316 = vmatpush3.bf16.msra.mxu1 %v6484_v26 }
 0x457   :  { %5309 = vmatprep.subr.bf16.mxu0 %v5863_v2  ;;  %5317 = vmatprep.subr.bf16.mxu1 %v5863_v2 }
 0x458   :  { %5311 = vmatprep.mubr.msk.bf16.mxu0 %vm5864_vm0, %v5863_v2  ;;  %5319 = vmatprep.mubr.msk.bf16.mxu1 %vm5864_vm0, %v5863_v2 }
 0x45a   :  { %5310 = vmatpush3.bf16.msra.mxu0 %v6496_v28  ;;  %5318 = vmatpush3.bf16.msra.mxu1 %v6502_v29 }
 0x45b   :  { %5323 = vmatprep.subr.bf16.mxu0 %v5863_v2  ;;  %5331 = vmatprep.subr.bf16.mxu1 %v5863_v2 }
 0x4c3   :  { %v2545_v37 = vpop.permute.xlu0 %2544 }
 0x4c4   :  { %2550 = vst.msk [vmem:[#allocation3 + $0x4] sm:$0x1] %vm1175_vm3, %v2545_v37 }
 0x4c5   :  { %v2547_v57 = vpop.permute.xlu1 %2546 }
 0x4c6   :  { %2551 = vst.msk [vmem:[#allocation3 + $0xc] sm:$0x1] %vm1175_vm3, %v2547_v57 }
 0x50f   :  { %v2591_v59 = vpop.f32.mrb[80].mxu0  ;;  %v2633_v61 = vpop.f32.mrb[80].mxu1 }
 0x510   :  { %v2597_v24 = vadd.f32 %v2591_v59, %v2553_v58  ;;  %v2639_v62 = vadd.f32 %v2633_v61, %v2598_v60  ;;  %v5249_v63 = vpop.f32.mrb[81].mxu0  ;;  %v5257_v0 = vpop.f32.mrb[81].mxu1 }
 0x511   :  { %v2594_v1 = vpop.f32.mrb[82].mxu0  ;;  %v2636_v3 = vpop.f32.mrb[82].mxu1 }
 0x512   :  { %v4651_v5 = vmul.f32 -1.442695, %v2597_v24  ;;  %v4652_v6 = vmul.f32 -1.442695, %v2639_v62  ;;  %v5250_v20 = vpop.f32.mrb[83].mxu0  ;;  %v5258_v8 = vpop.f32.mrb[83].mxu1 }
 0x513   :  { %v2905_v24 = vld [vmem:[#allocation2 + $0x76] sm:$0x3] }
 0x514   :  { %5667 = vpow2.f32 %v4651_v5 }
 0x515   :  { %5669 = vpow2.f32 %v4652_v6  ;;  %v2863_v6 = vld [vmem:[#allocation2 + $0x66] sm:$0x3] }
 0x517   :  { %v2675_v9 = vpop.f32.mrb[84].mxu0  ;;  %v2717_v11 = vpop.f32.mrb[84].mxu1 }
 0x518   :  { %v2723_v13 = vadd.f32 %v2717_v11, %v2682_v10  ;;  %v5265_v14 = vpop.f32.mrb[85].mxu0  ;;  %v5273_v17 = vpop.f32.mrb[85].mxu1  ;;  %v2681_v4 = vadd.f32 %v2675_v9, %v2640_v46 }
 0x519   :  { %v2678_v39 = vpop.f32.mrb[86].mxu0  ;;  %v2720_v40 = vpop.f32.mrb[86].mxu1 }
 0x51a   :  { %v4653_v23 = vmul.f32 -1.442695, %v2723_v13  ;;  %v5266_v44 = vpop.f32.mrb[87].mxu0  ;;  %v5274_v45 = vpop.f32.mrb[87].mxu1 }
 0x51c   :  { %5671 = vpow2.f32 %v4653_v23 }
 0x51d   :  { %5673 = vtanh.f32 %v2681_v4 }
 0x51e   :  { %v5668_v47 = vpop.eup %5667 }
 0x51f   :  { %v5670_v52 = vpop.eup %5669  ;;  %v2727_v54 = vadd.f32 1.0, %v5668_v47 }
 0x520   :  { %v2733_v30 = vadd.f32 1.0, %v5670_v52  ;;  %v2814_v31 = vpop.f32.mrb[88].mxu0  ;;  %v2856_v32 = vpop.f32.mrb[88].mxu1 }
 0x521   :  { %5675 = vrcp.f32 %v2727_v54  ;;  %v2820_v33 = vadd.f32 %v2814_v31, %v2776_v12  ;;  %v2862_v34 = vadd.f32 %v2856_v32, %v2821_v56  ;;  %v5281_v21 = vpop.f32.mrb[89].mxu0  ;;  %v5289_v22 = vpop.f32.mrb[89].mxu1 }
 0x522   :  { %5677 = vrcp.f32 %v2733_v30  ;;  %v2817_v35 = vpop.f32.mrb[90].mxu0  ;;  %v2859_v36 = vpop.f32.mrb[90].mxu1 }
 0x523   :  { %v4658_v37 = vmul.f32 -1.442695, %v2820_v33  ;;  %v4659_v57 = vmul.f32 -1.442695, %v2862_v34  ;;  %v5282_v58 = vpop.f32.mrb[91].mxu0  ;;  %v5290_v59 = vpop.f32.mrb[91].mxu1 }
 0x525   :  { %5679 = vpow2.f32 %v4658_v37 }
 0x526   :  { %5681 = vpow2.f32 %v4659_v57  ;;  %v5672_v60 = vpop.eup %5671 }
 0x527   :  { %v5674_v3 = vpop.eup %5673  ;;  %v2740_v5 = vadd.f32 1.0, %v5672_v60 }
 0x528   :  { %v2898_v61 = vpop.f32.mrb[92].mxu0  ;;  %v2940_v62 = vpop.f32.mrb[92].mxu1 }
 0x529   :  { %v2946_v63 = vadd.f32 %v2940_v62, %v2905_v24  ;;  %v5297_v0 = vpop.f32.mrb[93].mxu0  ;;  %v5305_v1 = vpop.f32.mrb[93].mxu1  ;;  %v2904_v10 = vadd.f32 %v2898_v61, %v2863_v6  ;;  %5683 = vrcp.f32 %v2740_v5  ;;  %v3011_v5 = vld [vmem:[#allocation2 + $0xa] sm:$0x3] }
 0x52a   :  { %v2901_v20 = vpop.f32.mrb[94].mxu0  ;;  %v2943_v8 = vpop.f32.mrb[94].mxu1 }
 0x52b   :  { %v5676_v9 = vpop.eup %5675  ;;  %v5298_v11 = vpop.f32.mrb[95].mxu0  ;;  %v4660_v39 = vmul.f32 -1.442695, %v2946_v63  ;;  %5685 = vtanh.f32 %v2904_v10  ;;  %v3056_v20 = vld [vmem:[#allocation2 + $0x1a] sm:$0x3] }
 0x52c   :  { %v5306_v13 = vpop.f32.mrb[95].mxu1  ;;  %v5678_v14 = vpop.eup %5677  ;;  %v2744_v17 = vmul.f32 %v5676_v9, %v5674_v3 }
 0x52d   :  { %v2743_v40 = vmul.f32 %v5678_v14, %v6510_v7  ;;  %5687 = vpow2.f32 %v4660_v39 }
 0x52f   :  { %v5680_v23 = vpop.eup %5679  ;;  %v6588_v44 = vadd.f32 %v2744_v17, %v2743_v40 }
 0x530   :  { %v5682_v45 = vpop.eup %5681  ;;  %v2950_v46 = vadd.f32 1.0, %v5680_v23 }
 0x531   :  { %5689 = vtanh.f32 %v6588_v44  ;;  %v2956_v4 = vadd.f32 1.0, %v5682_v45 }
 0x532   :  { %5691 = vrcp.f32 %v2950_v46 }
 0x533   :  { %5693 = vrcp.f32 %v2956_v4  ;;  %v5684_v47 = vpop.eup %5683  ;;  %v3140_v4 = vld [vmem:[#allocation2 + $0x3a] sm:$0x3] }
 0x535   :  { %v5686_v52 = vpop.eup %5685 }
 0x537   :  { %v5688_v54 = vpop.eup %5687 }
 0x538   :  { %v2963_v32 = vadd.f32 1.0, %v5688_v54 }
 0x53a   :  { %5695 = vrcp.f32 %v2963_v32 }
 0x53b   :  { %v5690_v12 = vpop.eup %5689 }
 0x53c   :  { %v5692_v30 = vpop.eup %5691  ;;  %v2747_v31 = vmul.f32 %v5690_v12, %v5684_v47 }
 0x53d   :  { %v5694_v7 = vpop.eup %5693  ;;  %v2967_v56 = vmul.f32 %v5692_v30, %v5686_v52 }
 0x53e   :  { %v2966_v33 = vmul.f32 %v5694_v7, %v6515_v51  ;;  %v2755_v34 = vrot.slane %v2747_v31, %v6196_v15  ;;  %v3010_v21 = vpack.c.bf16 %v2747_v31, %v2747_v31 }
 0x540   :  { %v6593_v22 = vadd.f32 %v2967_v56, %v2966_v33  ;;  %v2756_v35 = vcombine.high %v2755_v34, %v2755_v34  ;;  %v2763_v36 = vrot.slane %v2755_v34, %v6196_v15  ;;  %5312 = vmatmul.mubr.msk.bf16.vlgmr.msra.gmra.mrb[96].mxu0 %vm58_vm1, %v3010_v21  ;;  %5320 = vmatmul.mubr.msk.bf16.vlgmr.msra.gmra.mrb[96].mxu1 %vm58_vm1, %v3010_v21  ;;  %v3098_v33 = vld [vmem:[#allocation2 + $0x2a] sm:$0x3] }
 0x541   :  { %5324 = vmatpush3.bf16.msra.mxu0 %v6365_v16  ;;  %5332 = vmatpush3.bf16.msra.mxu1 %v6371_v53 }
 0x542   :  { %5697 = vtanh.f32 %v6593_v22  ;;  %v2770_v51 = vrot.slane %v2756_v35, %v6196_v15  ;;  %2773 = vst.msk [vmem:[#allocation3 + $0x4] sm:$0x1] %vm895_vm2, %v2763_v36  ;;  %5325 = vmatprep.subr.bf16.mxu0 %v5863_v2  ;;  %5333 = vmatprep.subr.bf16.mxu1 %v5863_v2 }
 0x543   :  { %5327 = vmatprep.mubr.msk.bf16.mxu0 %vm5864_vm0, %v5863_v2  ;;  %5335 = vmatprep.mubr.msk.bf16.mxu1 %vm5864_vm0, %v5863_v2 }
 0x544   :  { %2774 = vst.msk [vmem:[#allocation3 + $0xc] sm:$0x1] %vm895_vm2, %v2770_v51  ;;  %v5696_v37 = vpop.eup %5695  ;;  %v3234_v51 = vld [vmem:[#allocation2 + $0x44] sm:$0x3] }
 0x545   :  { %5326 = vmatpush3.bf16.msra.mxu0 %v6387_v18  ;;  %5334 = vmatpush3.bf16.msra.mxu1 %v6393_v19 }
 0x546   :  { %5339 = vmatprep.subr.bf16.mxu0 %v5863_v2  ;;  %5347 = vmatprep.subr.bf16.mxu1 %v5863_v2 }
 0x548   :  { %5328 = vmatmul.mubr.msk.bf16.vlgmr.msra.gmra.mrb[100].mxu0 %vm58_vm1, %v3010_v21  ;;  %5336 = vmatmul.mubr.msk.bf16.vlgmr.msra.gmra.mrb[100].mxu1 %vm58_vm1, %v3010_v21 }
 0x549   :  { %5340 = vmatpush3.bf16.msra.mxu0 %v6403_v27  ;;  %5348 = vmatpush3.bf16.msra.mxu1 %v6409_v38 }
 0x54a   :  { %5341 = vmatprep.subr.bf16.mxu0 %v5863_v2  ;;  %5349 = vmatprep.subr.bf16.mxu1 %v5863_v2 }
 0x54b   :  { %5343 = vmatprep.mubr.msk.bf16.mxu0 %vm5864_vm0, %v5863_v2  ;;  %5351 = vmatprep.mubr.msk.bf16.mxu1 %vm5864_vm0, %v5863_v2 }
 0x54c   :  { %v5698_v57 = vpop.eup %5697 }
 0x54d   :  { %5342 = vmatpush3.bf16.msra.mxu0 %v6421_v42  ;;  %5350 = vmatpush3.bf16.msra.mxu1 %v6427_v43  ;;  %v2970_v58 = vmul.f32 %v5698_v57, %v5696_v37 }
 0x54e   :  { %5355 = vmatprep.subr.bf16.mxu0 %v5863_v2  ;;  %5363 = vmatprep.subr.bf16.mxu1 %v5863_v2 }
 0x54f   :  { %v3233_v59 = vpack.c.bf16 %v2970_v58, %v2970_v58  ;;  %v2978_v60 = vrot.slane %v2970_v58, %v6196_v15  ;;  %v3279_v58 = vld [vmem:[#allocation2 + $0x54] sm:$0x3] }
 0x551   :  { %5344 = vmatmul.mubr.msk.bf16.vlgmr.msra.gmra.mrb[104].mxu0 %vm58_vm1, %v3233_v59  ;;  %5352 = vmatmul.mubr.msk.bf16.vlgmr.msra.gmra.mrb[104].mxu1 %vm58_vm1, %v3233_v59  ;;  %v2986_v61 = vrot.slane %v2978_v60, %v6196_v15  ;;  %v2979_v24 = vcombine.high %v2978_v60, %v2978_v60 }
 0x552   :  { %5356 = vmatpush3.bf16.msra.mxu0 %v6439_v48  ;;  %5364 = vmatpush3.bf16.msra.mxu1 %v6445_v49 }
 0x553   :  { %5357 = vmatprep.subr.bf16.mxu0 %v5863_v2  ;;  %5365 = vmatprep.subr.bf16.mxu1 %v5863_v2  ;;  %v2997_v62 = vrot.slane %v2986_v61, %v6235_v50  ;;  %v2993_v63 = vrot.slane %v2979_v24, %v6196_v15 }
 0x554   :  { %5359 = vmatprep.mubr.msk.bf16.mxu0 %vm5864_vm0, %v5863_v2  ;;  %5367 = vmatprep.mubr.msk.bf16.mxu1 %vm5864_vm0, %v5863_v2 }
 0x555   :  { %3002 = vrot.lane.b32.xlu0 %v2997_v62, %s5867_s2  ;;  %v3001_v0 = vrot.slane %v2993_v63, %v6235_v50 }
 0x556   :  { %5358 = vmatpush3.bf16.msra.mxu0 %v6461_v55  ;;  %5366 = vmatpush3.bf16.msra.mxu1 %v6467_v41 }
 0x557   :  { %3004 = vrot.lane.b32.xlu1 %v3001_v0, %s5867_s2  ;;  %5371 = vmatprep.subr.bf16.mxu0 %v5863_v2 }
 0x558   :  { %5379 = vmatprep.subr.bf16.mxu1 %v5863_v2 }
 0x559   :  { %5360 = vmatmul.mubr.msk.bf16.vlgmr.msra.gmra.mrb[108].mxu0 %vm58_vm1, %v3233_v59  ;;  %5368 = vmatmul.mubr.msk.bf16.vlgmr.msra.gmra.mrb[108].mxu1 %vm58_vm1, %v3233_v59 }
 0x55a   :  { %5372 = vmatpush3.bf16.msra.mxu0 %v6478_v25  ;;  %5380 = vmatpush3.bf16.msra.mxu1 %v6484_v26 }
 0x55b   :  { %5373 = vmatprep.subr.bf16.mxu0 %v5863_v2  ;;  %5381 = vmatprep.subr.bf16.mxu1 %v5863_v2 }
 0x55c   :  { %5375 = vmatprep.mubr.msk.bf16.mxu0 %vm5864_vm0, %v5863_v2  ;;  %5383 = vmatprep.mubr.msk.bf16.mxu1 %vm5864_vm0, %v5863_v2 }
 0x55e   :  { %5374 = vmatpush3.bf16.msra.mxu0 %v6496_v28  ;;  %5382 = vmatpush3.bf16.msra.mxu1 %v6502_v29 }
 0x55f   :  { %5387 = vmatprep.subr.bf16.mxu0 %v5863_v2  ;;  %5395 = vmatprep.subr.bf16.mxu1 %v5863_v2 }
 0x5c7   :  { %v3003_v1 = vpop.permute.xlu0 %3002 }
 0x5c8   :  { %3008 = vst.msk [vmem:[#allocation3 + $0x3] sm:$0x1] %vm1175_vm3, %v3003_v1 }
 0x5c9   :  { %v3005_v3 = vpop.permute.xlu1 %3004 }
 0x5ca   :  { %3009 = vst.msk [vmem:[#allocation3 + $0xb] sm:$0x1] %vm1175_vm3, %v3005_v3 }
 0x613   :  { %v3049_v6 = vpop.f32.mrb[96].mxu0  ;;  %v3091_v8 = vpop.f32.mrb[96].mxu1 }
 0x614   :  { %v3055_v9 = vadd.f32 %v3049_v6, %v3011_v5  ;;  %v3097_v10 = vadd.f32 %v3091_v8, %v3056_v20  ;;  %v5313_v11 = vpop.f32.mrb[97].mxu0  ;;  %v5321_v13 = vpop.f32.mrb[97].mxu1 }
 0x615   :  { %v3052_v14 = vpop.f32.mrb[98].mxu0  ;;  %v3094_v17 = vpop.f32.mrb[98].mxu1 }
 0x616   :  { %v4665_v39 = vmul.f32 -1.442695, %v3055_v9  ;;  %v4666_v40 = vmul.f32 -1.442695, %v3097_v10  ;;  %v5314_v23 = vpop.f32.mrb[99].mxu0  ;;  %v5322_v45 = vpop.f32.mrb[99].mxu1 }
 0x617   :  { %v3363_v9 = vld [vmem:[#allocation2 + $0x74] sm:$0x3] }
 0x618   :  { %5699 = vpow2.f32 %v4665_v39 }
 0x619   :  { %5701 = vpow2.f32 %v4666_v40  ;;  %v3321_v40 = vld [vmem:[#allocation2 + $0x64] sm:$0x3] }
 0x61b   :  { %v3133_v46 = vpop.f32.mrb[100].mxu0  ;;  %v3175_v47 = vpop.f32.mrb[100].mxu1 }
 0x61c   :  { %v3181_v52 = vadd.f32 %v3175_v47, %v3140_v4  ;;  %v5329_v54 = vpop.f32.mrb[101].mxu0  ;;  %v5337_v12 = vpop.f32.mrb[101].mxu1  ;;  %v3139_v34 = vadd.f32 %v3133_v46, %v3098_v33 }
 0x61d   :  { %v3136_v30 = vpop.f32.mrb[102].mxu0  ;;  %v3178_v31 = vpop.f32.mrb[102].mxu1 }
 0x61e   :  { %v4667_v7 = vmul.f32 -1.442695, %v3181_v52  ;;  %v5330_v56 = vpop.f32.mrb[103].mxu0  ;;  %v5338_v32 = vpop.f32.mrb[103].mxu1 }
 0x620   :  { %5703 = vpow2.f32 %v4667_v7 }
 0x621   :  { %5705 = vtanh.f32 %v3139_v34 }
 0x622   :  { %v5700_v21 = vpop.eup %5699 }
 0x623   :  { %v5702_v35 = vpop.eup %5701  ;;  %v3185_v36 = vadd.f32 1.0, %v5700_v21 }
 0x624   :  { %v3191_v37 = vadd.f32 1.0, %v5702_v35  ;;  %v3272_v57 = vpop.f32.mrb[104].mxu0  ;;  %v3314_v59 = vpop.f32.mrb[104].mxu1 }
 0x625   :  { %5707 = vrcp.f32 %v3185_v36  ;;  %v3278_v60 = vadd.f32 %v3272_v57, %v3234_v51  ;;  %v3320_v61 = vadd.f32 %v3314_v59, %v3279_v58  ;;  %v5345_v24 = vpop.f32.mrb[105].mxu0  ;;  %v5353_v62 = vpop.f32.mrb[105].mxu1 }
 0x626   :  { %5709 = vrcp.f32 %v3191_v37  ;;  %v3275_v63 = vpop.f32.mrb[106].mxu0  ;;  %v3317_v0 = vpop.f32.mrb[106].mxu1 }
 0x627   :  { %v4672_v1 = vmul.f32 -1.442695, %v3278_v60  ;;  %v4673_v3 = vmul.f32 -1.442695, %v3320_v61  ;;  %v5346_v5 = vpop.f32.mrb[107].mxu0  ;;  %v5354_v6 = vpop.f32.mrb[107].mxu1 }
 0x629   :  { %5711 = vpow2.f32 %v4672_v1 }
 0x62a   :  { %5713 = vpow2.f32 %v4673_v3  ;;  %v5704_v20 = vpop.eup %5703 }
 0x62b   :  { %v5706_v17 = vpop.eup %5705  ;;  %v3198_v39 = vadd.f32 1.0, %v5704_v20 }
 0x62c   :  { %v3356_v8 = vpop.f32.mrb[108].mxu0  ;;  %v3398_v10 = vpop.f32.mrb[108].mxu1 }
 0x62d   :  { %v3404_v11 = vadd.f32 %v3398_v10, %v3363_v9  ;;  %v5361_v13 = vpop.f32.mrb[109].mxu0  ;;  %v5369_v14 = vpop.f32.mrb[109].mxu1  ;;  %v3362_v4 = vadd.f32 %v3356_v8, %v3321_v40  ;;  %5715 = vrcp.f32 %v3198_v39 }
 0x62e   :  { %v3359_v23 = vpop.f32.mrb[110].mxu0  ;;  %v3401_v45 = vpop.f32.mrb[110].mxu1 }
 0x62f   :  { %v5708_v46 = vpop.eup %5707  ;;  %v5362_v47 = vpop.f32.mrb[111].mxu0  ;;  %v4674_v30 = vmul.f32 -1.442695, %v3404_v11  ;;  %5717 = vtanh.f32 %v3362_v4 }
 0x630   :  { %v5370_v52 = vpop.f32.mrb[111].mxu1  ;;  %v5710_v54 = vpop.eup %5709  ;;  %v3202_v12 = vmul.f32 %v5708_v46, %v5706_v17  ;;  %v3598_v17 = vld [vmem:[#allocation2 + $0x3c] sm:$0x3] }
 0x631   :  { %v3201_v31 = vmul.f32 %v5710_v54, %v6588_v44  ;;  %5719 = vpow2.f32 %v4674_v30 }
 0x633   :  { %v5712_v7 = vpop.eup %5711  ;;  %v6666_v56 = vadd.f32 %v3202_v12, %v3201_v31  ;;  %v3556_v12 = vld [vmem:[#allocation2 + $0x2c] sm:$0x3] }
 0x634   :  { %v5714_v32 = vpop.eup %5713  ;;  %v3408_v33 = vadd.f32 1.0, %v5712_v7 }
 0x635   :  { %5721 = vtanh.f32 %v6666_v56  ;;  %v3414_v34 = vadd.f32 1.0, %v5714_v32 }
 0x636   :  { %5723 = vrcp.f32 %v3408_v33  ;;  %v3692_v33 = vld [vmem:[#allocation2 + $0x42] sm:$0x3] }
 0x637   :  { %5725 = vrcp.f32 %v3414_v34  ;;  %v5716_v21 = vpop.eup %5715 }
 0x639   :  { %v5718_v35 = vpop.eup %5717 }
 0x63b   :  { %v5720_v36 = vpop.eup %5719 }
 0x63c   :  { %v3421_v59 = vadd.f32 1.0, %v5720_v36 }
 0x63e   :  { %5727 = vrcp.f32 %v3421_v59 }
 0x63f   :  { %v5722_v51 = vpop.eup %5721 }
 0x640   :  { %v5724_v37 = vpop.eup %5723  ;;  %v3205_v57 = vmul.f32 %v5722_v51, %v5716_v21 }
 0x641   :  { %v5726_v44 = vpop.eup %5725  ;;  %v3425_v58 = vmul.f32 %v5724_v37, %v5718_v35  ;;  %v3737_v35 = vld [vmem:[#allocation2 + $0x52] sm:$0x3] }
 0x642   :  { %v3424_v60 = vmul.f32 %v5726_v44, %v6593_v22  ;;  %v3213_v61 = vrot.slane %v3205_v57, %v6196_v15  ;;  %v3468_v24 = vpack.c.bf16 %v3205_v57, %v3205_v57 }
 0x644   :  { %v6671_v62 = vadd.f32 %v3425_v58, %v3424_v60  ;;  %v3214_v63 = vcombine.high %v3213_v61, %v3213_v61  ;;  %v3221_v0 = vrot.slane %v3213_v61, %v6196_v15  ;;  %5376 = vmatmul.mubr.msk.bf16.vlgmr.msra.gmra.mrb[112].mxu0 %vm58_vm1, %v3468_v24  ;;  %5384 = vmatmul.mubr.msk.bf16.vlgmr.msra.gmra.mrb[112].mxu1 %vm58_vm1, %v3468_v24 }
 0x645   :  { %5388 = vmatpush3.bf16.msra.mxu0 %v6365_v16  ;;  %5396 = vmatpush3.bf16.msra.mxu1 %v6371_v53 }
 0x646   :  { %5729 = vtanh.f32 %v6671_v62  ;;  %v3228_v22 = vrot.slane %v3214_v63, %v6196_v15  ;;  %3231 = vst.msk [vmem:[#allocation3 + $0x5] sm:$0x1] %vm895_vm2, %v3221_v0  ;;  %5389 = vmatprep.subr.bf16.mxu0 %v5863_v2  ;;  %5397 = vmatprep.subr.bf16.mxu1 %v5863_v2 }
 0x647   :  { %5391 = vmatprep.mubr.msk.bf16.mxu0 %vm5864_vm0, %v5863_v2  ;;  %5399 = vmatprep.mubr.msk.bf16.mxu1 %vm5864_vm0, %v5863_v2 }
 0x648   :  { %3232 = vst.msk [vmem:[#allocation3 + $0xd] sm:$0x1] %vm895_vm2, %v3228_v22  ;;  %v5728_v16 = vpop.eup %5727 }
 0x649   :  { %5390 = vmatpush3.bf16.msra.mxu0 %v6387_v18  ;;  %5398 = vmatpush3.bf16.msra.mxu1 %v6393_v19 }
 0x64a   :  { %5403 = vmatprep.subr.bf16.mxu0 %v5863_v2  ;;  %5411 = vmatprep.subr.bf16.mxu1 %v5863_v2 }
 0x64c   :  { %5392 = vmatmul.mubr.msk.bf16.vlgmr.msra.gmra.mrb[116].mxu0 %vm58_vm1, %v3468_v24  ;;  %5400 = vmatmul.mubr.msk.bf16.vlgmr.msra.gmra.mrb[116].mxu1 %vm58_vm1, %v3468_v24 }
 0x64d   :  { %5404 = vmatpush3.bf16.msra.mxu0 %v6403_v27  ;;  %5412 = vmatpush3.bf16.msra.mxu1 %v6409_v38 }
 0x64e   :  { %5405 = vmatprep.subr.bf16.mxu0 %v5863_v2  ;;  %5413 = vmatprep.subr.bf16.mxu1 %v5863_v2 }
 0x64f   :  { %5407 = vmatprep.mubr.msk.bf16.mxu0 %vm5864_vm0, %v5863_v2  ;;  %5415 = vmatprep.mubr.msk.bf16.mxu1 %vm5864_vm0, %v5863_v2 }
 0x650   :  { %v5730_v53 = vpop.eup %5729 }
 0x651   :  { %5406 = vmatpush3.bf16.msra.mxu0 %v6421_v42  ;;  %5414 = vmatpush3.bf16.msra.mxu1 %v6427_v43  ;;  %v3428_v18 = vmul.f32 %v5730_v53, %v5728_v16  ;;  %v3821_v16 = vld [vmem:[#allocation2 + $0x72] sm:$0x3] }
 0x652   :  { %5419 = vmatprep.subr.bf16.mxu0 %v5863_v2  ;;  %5427 = vmatprep.subr.bf16.mxu1 %v5863_v2 }
 0x653   :  { %v3691_v19 = vpack.c.bf16 %v3428_v18, %v3428_v18  ;;  %v3436_v27 = vrot.slane %v3428_v18, %v6196_v15 }
 0x655   :  { %5408 = vmatmul.mubr.msk.bf16.vlgmr.msra.gmra.mrb[120].mxu0 %vm58_vm1, %v3691_v19  ;;  %5416 = vmatmul.mubr.msk.bf16.vlgmr.msra.gmra.mrb[120].mxu1 %vm58_vm1, %v3691_v19  ;;  %v3444_v38 = vrot.slane %v3436_v27, %v6196_v15  ;;  %v3437_v1 = vcombine.high %v3436_v27, %v3436_v27 }
 0x656   :  { %5420 = vmatpush3.bf16.msra.mxu0 %v6439_v48  ;;  %5428 = vmatpush3.bf16.msra.mxu1 %v6445_v49 }
 0x657   :  { %5421 = vmatprep.subr.bf16.mxu0 %v5863_v2  ;;  %5429 = vmatprep.subr.bf16.mxu1 %v5863_v2  ;;  %v3455_v42 = vrot.slane %v3444_v38, %v6235_v50  ;;  %v3451_v43 = vrot.slane %v3437_v1, %v6196_v15 }
 0x658   :  { %5423 = vmatprep.mubr.msk.bf16.mxu0 %vm5864_vm0, %v5863_v2  ;;  %5431 = vmatprep.mubr.msk.bf16.mxu1 %vm5864_vm0, %v5863_v2 }
 0x659   :  { %3460 = vrot.lane.b32.xlu0 %v3455_v42, %s5867_s2  ;;  %v3459_v48 = vrot.slane %v3451_v43, %v6235_v50  ;;  %v3779_v42 = vld [vmem:[#allocation2 + $0x62] sm:$0x3] }
 0x65a   :  { %5422 = vmatpush3.bf16.msra.mxu0 %v6461_v55  ;;  %5430 = vmatpush3.bf16.msra.mxu1 %v6467_v41  ;;  %v3469_v41 = vld [vmem:[#allocation2 + $0xc] sm:$0x3] }
 0x65b   :  { %3462 = vrot.lane.b32.xlu1 %v3459_v48, %s5867_s2  ;;  %5435 = vmatprep.subr.bf16.mxu0 %v5863_v2 }
 0x65c   :  { %5443 = vmatprep.subr.bf16.mxu1 %v5863_v2 }
 0x65d   :  { %5424 = vmatmul.mubr.msk.bf16.vlgmr.msra.gmra.mrb[124].mxu0 %vm58_vm1, %v3691_v19  ;;  %5432 = vmatmul.mubr.msk.bf16.vlgmr.msra.gmra.mrb[124].mxu1 %vm58_vm1, %v3691_v19 }
 0x65e   :  { %5436 = vmatpush3.bf16.msra.mxu0 %v6478_v25  ;;  %5444 = vmatpush3.bf16.msra.mxu1 %v6484_v26  ;;  %v3514_v26 = vld [vmem:[#allocation2 + $0x1c] sm:$0x3] }
 0x65f   :  { %5437 = vmatprep.subr.bf16.mxu0 %v5863_v2  ;;  %5445 = vmatprep.subr.bf16.mxu1 %v5863_v2 }
 0x660   :  { %5439 = vmatprep.mubr.msk.bf16.mxu0 %vm5864_vm0, %v5863_v2  ;;  %5447 = vmatprep.mubr.msk.bf16.mxu1 %vm5864_vm0, %v5863_v2 }
 0x662   :  { %5438 = vmatpush3.bf16.msra.mxu0 %v6496_v28  ;;  %5446 = vmatpush3.bf16.msra.mxu1 %v6502_v29 }
 0x663   :  { %5451 = vmatprep.subr.bf16.mxu0 %v5863_v2  ;;  %5459 = vmatprep.subr.bf16.mxu1 %v5863_v2 }
 0x6cb   :  { %v3461_v49 = vpop.permute.xlu0 %3460 }
 0x6cc   :  { %3466 = vst.msk [vmem:[#allocation3 + $0x2] sm:$0x1] %vm1175_vm3, %v3461_v49 }
 0x6cd   :  { %v3463_v55 = vpop.permute.xlu1 %3462 }
 0x6ce   :  { %3467 = vst.msk [vmem:[#allocation3 + $0xa] sm:$0x1] %vm1175_vm3, %v3463_v55 }
 0x717   :  { %v3507_v25 = vpop.f32.mrb[112].mxu0  ;;  %v3549_v3 = vpop.f32.mrb[112].mxu1 }
 0x718   :  { %v3513_v5 = vadd.f32 %v3507_v25, %v3469_v41  ;;  %v3555_v6 = vadd.f32 %v3549_v3, %v3514_v26  ;;  %v5377_v20 = vpop.f32.mrb[113].mxu0  ;;  %v5385_v28 = vpop.f32.mrb[113].mxu1 }
 0x719   :  { %v3510_v8 = vpop.f32.mrb[114].mxu0  ;;  %v3552_v29 = vpop.f32.mrb[114].mxu1 }
 0x71a   :  { %v4679_v9 = vmul.f32 -1.442695, %v3513_v5  ;;  %v4680_v10 = vmul.f32 -1.442695, %v3555_v6  ;;  %v5378_v11 = vpop.f32.mrb[115].mxu0  ;;  %v5386_v13 = vpop.f32.mrb[115].mxu1 }
 0x71c   :  { %5731 = vpow2.f32 %v4679_v9 }
 0x71d   :  { %5733 = vpow2.f32 %v4680_v10 }
 0x71f   :  { %v3591_v14 = vpop.f32.mrb[116].mxu0  ;;  %v3633_v39 = vpop.f32.mrb[116].mxu1 }
 0x720   :  { %v3639_v40 = vadd.f32 %v3633_v39, %v3598_v17  ;;  %v5393_v23 = vpop.f32.mrb[117].mxu0  ;;  %v5401_v45 = vpop.f32.mrb[117].mxu1  ;;  %v3597_v30 = vadd.f32 %v3591_v14, %v3556_v12  ;;  %v5827_v12 = vld [vmem:[%s6881_s3 + $0x20] sm:$0xff]  }
 0x721   :  { %v3594_v46 = vpop.f32.mrb[118].mxu0  ;;  %v3636_v4 = vpop.f32.mrb[118].mxu1 }
 0x722   :  { %v4681_v47 = vmul.f32 -1.442695, %v3639_v40  ;;  %v5394_v52 = vpop.f32.mrb[119].mxu0  ;;  %v5402_v54 = vpop.f32.mrb[119].mxu1 }
 0x724   :  { %5735 = vpow2.f32 %v4681_v47 }
 0x725   :  { %5737 = vtanh.f32 %v3597_v30 }
 0x726   :  { %v5732_v31 = vpop.eup %5731 }
 0x727   :  { %v5734_v7 = vpop.eup %5733  ;;  %v3643_v32 = vadd.f32 1.0, %v5732_v31  ;;  %v5829_v31 = vld [vmem:[%s6881_s3 + $0x28] sm:$0xff]  }
 0x728   :  { %v3649_v34 = vadd.f32 1.0, %v5734_v7  ;;  %v3730_v21 = vpop.f32.mrb[120].mxu0  ;;  %v3772_v36 = vpop.f32.mrb[120].mxu1  ;;  %v5830_v7 = vld [vmem:[%s6881_s3 + $0x38] sm:$0xff]  }
 0x729   :  { %5739 = vrcp.f32 %v3643_v32  ;;  %v3736_v51 = vadd.f32 %v3730_v21, %v3692_v33  ;;  %v3778_v37 = vadd.f32 %v3772_v36, %v3737_v35  ;;  %v5409_v57 = vpop.f32.mrb[121].mxu0  ;;  %v5417_v44 = vpop.f32.mrb[121].mxu1  ;;  %v5831_v32 = vld [vmem:[%s6881_s3 + $0x40] sm:$0xff]   ;;  %v5832_v33 = vld [vmem:[%s6881_s3 + $0x50] sm:$0xff]   ;;  %v5833_v35 = vld [vmem:[%s6881_s3 + $0x48] sm:$0xff]  }
 0x72a   :  { %5741 = vrcp.f32 %v3649_v34  ;;  %v3733_v58 = vpop.f32.mrb[122].mxu0  ;;  %v3775_v59 = vpop.f32.mrb[122].mxu1  ;;  %v5834_v36 = vld [vmem:[%s6881_s3 + $0x58] sm:$0xff]  }
 0x72b   :  { %v4686_v60 = vmul.f32 -1.442695, %v3736_v51  ;;  %v4687_v61 = vmul.f32 -1.442695, %v3778_v37  ;;  %v5410_v24 = vpop.f32.mrb[123].mxu0  ;;  %v5418_v63 = vpop.f32.mrb[123].mxu1 }
 0x72c   :  { %v5835_v59 = vld [vmem:[%s6881_s3 + $0x60] sm:$0xff]  }
 0x72d   :  { %5743 = vpow2.f32 %v4686_v60  ;;  %v5836_v60 = vld [vmem:[%s6881_s3 + $0x70] sm:$0xff]  }
 0x72e   :  { %5745 = vpow2.f32 %v4687_v61  ;;  %v5736_v0 = vpop.eup %5735 }
 0x72f   :  { %v5738_v38 = vpop.eup %5737  ;;  %v3656_v1 = vadd.f32 1.0, %v5736_v0  ;;  %v5837_v0 = vld [vmem:[%s6881_s3 + $0x68] sm:$0xff]  }
 0x730   :  { %v3814_v22 = vpop.f32.mrb[124].mxu0  ;;  %v3856_v53 = vpop.f32.mrb[124].mxu1 }
 0x731   :  { %v3862_v18 = vadd.f32 %v3856_v53, %v3821_v16  ;;  %v5425_v19 = vpop.f32.mrb[125].mxu0  ;;  %v5433_v27 = vpop.f32.mrb[125].mxu1  ;;  %v3820_v55 = vadd.f32 %v3814_v22, %v3779_v42  ;;  %5747 = vrcp.f32 %v3656_v1  ;;  %v5838_v22 = vld [vmem:[%s6881_s3 + $0x78] sm:$0xff]   ;;  %v3927_v53 = vld [vmem:[#allocation2 + $0xe] sm:$0x3] }
 0x732   :  { %v3817_v43 = vpop.f32.mrb[126].mxu0  ;;  %v3859_v48 = vpop.f32.mrb[126].mxu1  ;;  %v3972_v19 = vld [vmem:[#allocation2 + $0x1e] sm:$0x3] }
 0x733   :  { %v5740_v49 = vpop.eup %5739  ;;  %v5426_v41 = vpop.f32.mrb[127].mxu0  ;;  %v4688_v5 = vmul.f32 -1.442695, %v3862_v18  ;;  %5749 = vtanh.f32 %v3820_v55 }
 0x734   :  { %v5434_v25 = vpop.f32.mrb[127].mxu1  ;;  %v5742_v26 = vpop.eup %5741  ;;  %v3660_v3 = vmul.f32 %v5740_v49, %v5738_v38 }
 0x735   :  { %v3659_v6 = vmul.f32 %v5742_v26, %v6666_v56  ;;  %5751 = vpow2.f32 %v4688_v5  ;;  %v4056_v5 = vld [vmem:[#allocation2 + $0x3e] sm:$0x3] }
 0x737   :  { %v5744_v20 = vpop.eup %5743  ;;  %v6744_v28 = vadd.f32 %v3660_v3, %v3659_v6 }
 0x738   :  { %v5746_v8 = vpop.eup %5745  ;;  %v3866_v29 = vadd.f32 1.0, %v5744_v20 }
 0x739   :  { %5753 = vtanh.f32 %v6744_v28  ;;  %v3872_v9 = vadd.f32 1.0, %v5746_v8 }
 0x73a   :  { %5755 = vrcp.f32 %v3866_v29 }
 0x73b   :  { %5757 = vrcp.f32 %v3872_v9  ;;  %v5748_v10 = vpop.eup %5747 }
 0x73d   :  { %v5750_v11 = vpop.eup %5749 }
 0x73f   :  { %v5752_v13 = vpop.eup %5751 }
 0x740   :  { %v3879_v23 = vadd.f32 1.0, %v5752_v13 }
 0x742   :  { %5759 = vrcp.f32 %v3879_v23 }
 0x743   :  { %v5754_v14 = vpop.eup %5753 }
 0x744   :  { %v5756_v17 = vpop.eup %5755  ;;  %v3663_v39 = vmul.f32 %v5754_v14, %v5748_v10 }
 0x745   :  { %v5758_v56 = vpop.eup %5757  ;;  %v3883_v40 = vmul.f32 %v5756_v17, %v5750_v11  ;;  %v4014_v17 = vld [vmem:[#allocation2 + $0x2e] sm:$0x3] }
 0x746   :  { %v3882_v45 = vmul.f32 %v5758_v56, %v6671_v62  ;;  %v3671_v46 = vrot.slane %v3663_v39, %v6196_v15  ;;  %v3926_v4 = vpack.c.bf16 %v3663_v39, %v3663_v39  ;;  %v5828_v62 = vld [vmem:[%s6881_s3 + $0x30] sm:$0xff]  }
 0x748   :  { %v6749_v47 = vadd.f32 %v3883_v40, %v3882_v45  ;;  %v3672_v52 = vcombine.high %v3671_v46, %v3671_v46  ;;  %v3679_v54 = vrot.slane %v3671_v46, %v6196_v15  ;;  %5440 = vmatmul.mubr.msk.bf16.vlgmr.msra.gmra.mrb[128].mxu0 %vm58_vm1, %v3926_v4  ;;  %5448 = vmatmul.mubr.msk.bf16.vlgmr.msra.gmra.mrb[128].mxu1 %vm58_vm1, %v3926_v4  ;;  %v4150_v45 = vld [vmem:[#allocation2 + $0x40] sm:$0x3] }
 0x749   :  { %5452 = vmatpush3.bf16.msra.mxu0 %v5827_v12  ;;  %5460 = vmatpush3.bf16.msra.mxu1 %v5828_v62 }
 0x74a   :  { %5761 = vtanh.f32 %v6749_v47  ;;  %v3686_v30 = vrot.slane %v3672_v52, %v6196_v15  ;;  %3689 = vst.msk [vmem:[#allocation3 + $0x6] sm:$0x1] %vm895_vm2, %v3679_v54  ;;  %5453 = vmatprep.subr.bf16.mxu0 %v5863_v2  ;;  %5461 = vmatprep.subr.bf16.mxu1 %v5863_v2  ;;  %v4195_v52 = vld [vmem:[#allocation2 + $0x50] sm:$0x3] }
 0x74b   :  { %5455 = vmatprep.mubr.msk.bf16.mxu0 %vm5864_vm0, %v5863_v2  ;;  %5463 = vmatprep.mubr.msk.bf16.mxu1 %vm5864_vm0, %v5863_v2 }
 0x74c   :  { %3690 = vst.msk [vmem:[#allocation3 + $0xe] sm:$0x1] %vm895_vm2, %v3686_v30  ;;  %v5760_v34 = vpop.eup %5759 }
 0x74d   :  { %5454 = vmatpush3.bf16.msra.mxu0 %v5829_v31  ;;  %5462 = vmatpush3.bf16.msra.mxu1 %v5830_v7 }
 0x74e   :  { %5467 = vmatprep.subr.bf16.mxu0 %v5863_v2  ;;  %5475 = vmatprep.subr.bf16.mxu1 %v5863_v2 }
 0x750   :  { %5456 = vmatmul.mubr.msk.bf16.vlgmr.msra.gmra.mrb[132].mxu0 %vm58_vm1, %v3926_v4  ;;  %5464 = vmatmul.mubr.msk.bf16.vlgmr.msra.gmra.mrb[132].mxu1 %vm58_vm1, %v3926_v4 }
 0x751   :  { %5468 = vmatpush3.bf16.msra.mxu0 %v5831_v32  ;;  %5476 = vmatpush3.bf16.msra.mxu1 %v5832_v33 }
 0x752   :  { %5469 = vmatprep.subr.bf16.mxu0 %v5863_v2  ;;  %5477 = vmatprep.subr.bf16.mxu1 %v5863_v2 }
 0x753   :  { %5471 = vmatprep.mubr.msk.bf16.mxu0 %vm5864_vm0, %v5863_v2  ;;  %5479 = vmatprep.mubr.msk.bf16.mxu1 %vm5864_vm0, %v5863_v2 }
 0x754   :  { %v5762_v21 = vpop.eup %5761 }
 0x755   :  { %5470 = vmatpush3.bf16.msra.mxu0 %v5833_v35  ;;  %5478 = vmatpush3.bf16.msra.mxu1 %v5834_v36  ;;  %v3886_v51 = vmul.f32 %v5762_v21, %v5760_v34 }
 0x756   :  { %5483 = vmatprep.subr.bf16.mxu0 %v5863_v2  ;;  %5491 = vmatprep.subr.bf16.mxu1 %v5863_v2 }
 0x757   :  { %v4149_v37 = vpack.c.bf16 %v3886_v51, %v3886_v51  ;;  %v3894_v57 = vrot.slane %v3886_v51, %v6196_v15 }
 0x759   :  { %5472 = vmatmul.mubr.msk.bf16.vlgmr.msra.gmra.mrb[136].mxu0 %vm58_vm1, %v4149_v37  ;;  %5480 = vmatmul.mubr.msk.bf16.vlgmr.msra.gmra.mrb[136].mxu1 %vm58_vm1, %v4149_v37  ;;  %v3902_v44 = vrot.slane %v3894_v57, %v6196_v15  ;;  %v3895_v58 = vcombine.high %v3894_v57, %v3894_v57 }
 0x75a   :  { %5484 = vmatpush3.bf16.msra.mxu0 %v5835_v59  ;;  %5492 = vmatpush3.bf16.msra.mxu1 %v5836_v60 }
 0x75b   :  { %5485 = vmatprep.subr.bf16.mxu0 %v5863_v2  ;;  %5493 = vmatprep.subr.bf16.mxu1 %v5863_v2  ;;  %v3913_v61 = vrot.slane %v3902_v44, %v6235_v50  ;;  %v3909_v24 = vrot.slane %v3895_v58, %v6196_v15 }
 0x75c   :  { %5487 = vmatprep.mubr.msk.bf16.mxu0 %vm5864_vm0, %v5863_v2  ;;  %5495 = vmatprep.mubr.msk.bf16.mxu1 %vm5864_vm0, %v5863_v2 }
 0x75d   :  { %3918 = vrot.lane.b32.xlu0 %v3913_v61, %s5867_s2  ;;  %v3917_v63 = vrot.slane %v3909_v24, %v6235_v50  ;;  %v4237_v24 = vld [vmem:[#allocation2 + $0x60] sm:$0x3] }
 0x75e   :  { %5486 = vmatpush3.bf16.msra.mxu0 %v5837_v0  ;;  %5494 = vmatpush3.bf16.msra.mxu1 %v5838_v22 }
 0x75f   :  { %3920 = vrot.lane.b32.xlu1 %v3917_v63, %s5867_s2 }
 0x761   :  { %5488 = vmatmul.mubr.msk.bf16.vlgmr.msra.gmra.mrb[140].mxu0 %vm58_vm1, %v4149_v37  ;;  %5496 = vmatmul.mubr.msk.bf16.vlgmr.msra.gmra.mrb[140].mxu1 %vm58_vm1, %v4149_v37  ;;  %v4279_v37 = vld [vmem:[#allocation2 + $0x70] sm:$0x3] }
 0x7cf   :  { %v3919_v2 = vpop.permute.xlu0 %3918 }
 0x7d0   :  { %3924 = vst.msk [vmem:[#allocation3 + $0x1] sm:$0x1] %vm1175_vm3, %v3919_v2 }
 0x7d1   :  { %v3921_v16 = vpop.permute.xlu1 %3920 }
 0x7d2   :  { %3925 = vst.msk [vmem:[#allocation3 + $0x9] sm:$0x1] %vm1175_vm3, %v3921_v16 }
 0x81b   :  { %v3965_v18 = vpop.f32.mrb[128].mxu0  ;;  %v4007_v27 = vpop.f32.mrb[128].mxu1 }
 0x81c   :  { %v3971_v38 = vadd.f32 %v3965_v18, %v3927_v53  ;;  %v4013_v1 = vadd.f32 %v4007_v27, %v3972_v19  ;;  %v5441_v42 = vpop.f32.mrb[129].mxu0  ;;  %v5449_v43 = vpop.f32.mrb[129].mxu1 }
 0x81d   :  { %v3968_v48 = vpop.f32.mrb[130].mxu0  ;;  %v4010_v49 = vpop.f32.mrb[130].mxu1 }
 0x81e   :  { %v4693_v55 = vmul.f32 -1.442695, %v3971_v38  ;;  %v4694_v41 = vmul.f32 -1.442695, %v4013_v1  ;;  %v5442_v25 = vpop.f32.mrb[131].mxu0  ;;  %v5450_v26 = vpop.f32.mrb[131].mxu1 }
 0x820   :  { %5763 = vpow2.f32 %v4693_v55 }
 0x821   :  { %5765 = vpow2.f32 %v4694_v41 }
 0x823   :  { %v4049_v3 = vpop.f32.mrb[132].mxu0  ;;  %v4091_v6 = vpop.f32.mrb[132].mxu1 }
 0x824   :  { %v4097_v20 = vadd.f32 %v4091_v6, %v4056_v5  ;;  %v5457_v8 = vpop.f32.mrb[133].mxu0  ;;  %v5465_v29 = vpop.f32.mrb[133].mxu1  ;;  %v4055_v39 = vadd.f32 %v4049_v3, %v4014_v17 }
 0x825   :  { %v4052_v9 = vpop.f32.mrb[134].mxu0  ;;  %v4094_v10 = vpop.f32.mrb[134].mxu1 }
 0x826   :  { %v4695_v11 = vmul.f32 -1.442695, %v4097_v20  ;;  %v5458_v13 = vpop.f32.mrb[135].mxu0  ;;  %v5466_v14 = vpop.f32.mrb[135].mxu1 }
 0x828   :  { %5767 = vpow2.f32 %v4695_v11 }
 0x829   :  { %5769 = vtanh.f32 %v4055_v39 }
 0x82a   :  { %v5764_v56 = vpop.eup %5763 }
 0x82b   :  { %v5766_v40 = vpop.eup %5765  ;;  %v4101_v23 = vadd.f32 1.0, %v5764_v56 }
 0x82c   :  { %v4107_v46 = vadd.f32 1.0, %v5766_v40  ;;  %v4188_v4 = vpop.f32.mrb[136].mxu0  ;;  %v4230_v54 = vpop.f32.mrb[136].mxu1 }
 0x82d   :  { %5771 = vrcp.f32 %v4101_v23  ;;  %v4194_v12 = vadd.f32 %v4188_v4, %v4150_v45  ;;  %v4236_v62 = vadd.f32 %v4230_v54, %v4195_v52  ;;  %v5473_v30 = vpop.f32.mrb[137].mxu0  ;;  %v5481_v31 = vpop.f32.mrb[137].mxu1  ;;  %v4703_v54 = vld [vmem:[%s6882_s4] ss:$0 sm:$0xff] }
 0x82e   :  { %5773 = vrcp.f32 %v4107_v46  ;;  %v4191_v7 = vpop.f32.mrb[138].mxu0  ;;  %v4233_v32 = vpop.f32.mrb[138].mxu1 }
 0x82f   :  { %v4700_v33 = vmul.f32 -1.442695, %v4194_v12  ;;  %v4701_v34 = vmul.f32 -1.442695, %v4236_v62  ;;  %v5474_v21 = vpop.f32.mrb[139].mxu0  ;;  %v5482_v35 = vpop.f32.mrb[139].mxu1 }
 0x830   :  { %v4704_v7 = vld [vmem:[#allocation4] ss:$0 sm:$0xff] }
 0x831   :  { %5775 = vpow2.f32 %v4700_v33 }
 0x832   :  { %5777 = vpow2.f32 %v4701_v34  ;;  %v5768_v36 = vpop.eup %5767 }
 0x833   :  { %v5770_v60 = vpop.eup %5769  ;;  %v4114_v61 = vadd.f32 1.0, %v5768_v36 }
 0x834   :  { %v4272_v51 = vpop.f32.mrb[140].mxu0  ;;  %v4314_v57 = vpop.f32.mrb[140].mxu1 }
 0x835   :  { %v4320_v44 = vadd.f32 %v4314_v57, %v4279_v37  ;;  %v5489_v58 = vpop.f32.mrb[141].mxu0  ;;  %v5497_v59 = vpop.f32.mrb[141].mxu1  ;;  %v4278_v2 = vadd.f32 %v4272_v51, %v4237_v24  ;;  %5779 = vrcp.f32 %v4114_v61 }
 0x836   :  { %v4275_v63 = vpop.f32.mrb[142].mxu0  ;;  %v4317_v0 = vpop.f32.mrb[142].mxu1 }
 0x837   :  { %v5772_v22 = vpop.eup %5771  ;;  %v5490_v16 = vpop.f32.mrb[143].mxu0  ;;  %v4702_v27 = vmul.f32 -1.442695, %v4320_v44  ;;  %5781 = vtanh.f32 %v4278_v2  ;;  %v4426_v63 = vld [vmem:[%s6884_s6] sm:$0xff]  ;;  %v4427_v2 = vld [vmem:[%s6884_s6 + $0x8] sm:$0xff]  ;;  %s5868_s6 = smov [#allocation5]  }
 0x838   :  { %v5498_v53 = vpop.f32.mrb[143].mxu1  ;;  %v5774_v18 = vpop.eup %5773  ;;  %v4118_v19 = vmul.f32 %v5772_v22, %v5770_v60 }
 0x839   :  { %v4117_v38 = vmul.f32 %v5774_v18, %v6744_v28  ;;  %5783 = vpow2.f32 %v4702_v27 }
 0x83b   :  { %v5776_v1 = vpop.eup %5775  ;;  %v4119_v42 = vadd.f32 %v4118_v19, %v4117_v38  ;;  %v4444_v38 = vsub.f32 1.0, %v4426_v63 }
 0x83c   :  { %v5778_v43 = vpop.eup %5777  ;;  %v4324_v48 = vadd.f32 1.0, %v5776_v1 }
 0x83d   :  { %5785 = vtanh.f32 %v4119_v42  ;;  %v4330_v49 = vadd.f32 1.0, %v5778_v43  ;;  %v4445_v43 = vsub.f32 1.0, %v4427_v2 }
 0x83e   :  { %5787 = vrcp.f32 %v4324_v48 }
 0x83f   :  { %5789 = vrcp.f32 %v4330_v49  ;;  %v5780_v55 = vpop.eup %5779 }
 0x841   :  { %v5782_v41 = vpop.eup %5781 }
 0x843   :  { %v5784_v25 = vpop.eup %5783 }
 0x844   :  { %v4337_v28 = vadd.f32 1.0, %v5784_v25 }
 0x846   :  { %5791 = vrcp.f32 %v4337_v28 }
 0x847   :  { %v5786_v26 = vpop.eup %5785 }
 0x848   :  { %v5788_v3 = vpop.eup %5787  ;;  %v4121_v5 = vmul.f32 %v5786_v26, %v5780_v55 }
 0x849   :  { %v5790_v6 = vpop.eup %5789  ;;  %v4341_v20 = vmul.f32 %v5788_v3, %v5782_v41 }
 0x84a   :  { %v4129_v8 = vrot.slane %v4121_v5, %v6196_v15  ;;  %v4340_v29 = vmul.f32 %v5790_v6, %v6749_v47 }
 0x84c   :  { %v4130_v9 = vcombine.high %v4129_v8, %v4129_v8  ;;  %v4137_v10 = vrot.slane %v4129_v8, %v6196_v15  ;;  %v4342_v11 = vadd.f32 %v4341_v20, %v4340_v29 }
 0x84e   :  { %v4144_v13 = vrot.slane %v4130_v9, %v6196_v15  ;;  %4147 = vst.msk [vmem:[#allocation3 + $0x7] sm:$0x1] %vm895_vm2, %v4137_v10  ;;  %5793 = vtanh.f32 %v4342_v11 }
 0x850   :  { %4148 = vst.msk [vmem:[#allocation3 + $0xf] sm:$0x1] %vm895_vm2, %v4144_v13  ;;  %v5792_v14 = vpop.eup %5791 }
 0x858   :  { %v5794_v17 = vpop.eup %5793 }
 0x859   :  { %v4344_v39 = vmul.f32 %v5794_v17, %v5792_v14 }
 0x85b   :  { %v4352_v56 = vrot.slane %v4344_v39, %v6196_v15 }
 0x85d   :  { %v4360_v40 = vrot.slane %v4352_v56, %v6196_v15  ;;  %v4353_v47 = vcombine.high %v4352_v56, %v4352_v56 }
 0x85f   :  { %v4371_v23 = vrot.slane %v4360_v40, %v6235_v50  ;;  %v4367_v45 = vrot.slane %v4353_v47, %v6196_v15 }
 0x861   :  { %4376 = vrot.lane.b32.xlu0 %v4371_v23, %s5867_s2  ;;  %v4375_v46 = vrot.slane %v4367_v45, %v6235_v50 }
 0x863   :  { %4378 = vrot.lane.b32.xlu1 %v4375_v46, %s5867_s2 }
 0x8d3   :  { %v4377_v4 = vpop.permute.xlu0 %4376 }
 0x8d4   :  { %4382 = vst.msk [vmem:[#allocation3] sm:$0x1] %vm1175_vm3, %v4377_v4 }
 0x8d5   :  { %v4379_v52 = vpop.permute.xlu1 %4378 }
 0x8d6   :  { %4383 = vst.msk [vmem:[#allocation3 + $0x8] sm:$0x1] %vm1175_vm3, %v4379_v52 }
 0x8db   :  { %v4384_v12 = vld [vmem:[#allocation3] sm:$0xff] }
 0x8dc   :  { %v4393_v62 = vmul.f32 %v4703_v54, %v4384_v12 }
 0x8dd   :  { %v4385_v15 = vld [vmem:[#allocation3 + $0x8] sm:$0xff] }
 0x8de   :  { %v4396_v30 = vsel %vm4395_vm4, %v4393_v62, 0.0  ;;  %v4394_v31 = vmul.f32 %v4703_v54, %v4385_v15 }
 0x8df   :  { %4397 = vadd.xlane.f32.xlu0 %v4396_v30 }
 0x8e0   :  { %v4399_v50 = vsel %vm4395_vm4, %v4394_v31, 0.0 }
 0x8e1   :  { %4400 = vadd.xlane.f32.xlu1 %v4399_v50 }
 0x96c   :  { %v4398_v32 = vpop.xlane.xlu0 %4397 }
 0x96d   :  { %v4409_v33 = vadd.f32 %v4704_v7, %v4398_v32 }
 0x96e   :  { %v4401_v34 = vpop.xlane.xlu1 %4400 }
 0x96f   :  { %v4705_v21 = vmul.f32 -1.442695, %v4409_v33  ;;  %v4410_v35 = vadd.f32 %v4704_v7, %v4401_v34 }
 0x971   :  { %5795 = vpow2.f32 %v4705_v21  ;;  %v4706_v36 = vmul.f32 -1.442695, %v4410_v35 }
 0x973   :  { %5797 = vpow2.f32 %v4706_v36 }
 0x97b   :  { %v5796_v51 = vpop.eup %5795 }
 0x97c   :  { %v4417_v37 = vadd.f32 1.0, %v5796_v51 }
 0x97d   :  { %v5798_v57 = vpop.eup %5797 }
 0x97e   :  { %5799 = vrcp.f32 %v4417_v37  ;;  %v4418_v44 = vadd.f32 1.0, %v5798_v57 }
 0x980   :  { %5801 = vrcp.f32 %v4418_v44 }
 0x988   :  { %v5800_v58 = vpop.eup %5799 }
 0x989   :  { %4424 = vst.msk [vmem:[%s6885_s7] sm:$0xff] %vm4423_vm5, %v5800_v58  ;;  %5803 = vlog2.f32 %v5800_v58  ;;  %v4434_v59 = vsub.f32 1.0, %v5800_v58 }
 0x98a   :  { %v5802_v60 = vpop.eup %5801 }
 0x98b   :  { %5805 = vlog2.f32 %v5802_v60  ;;  %v4435_v61 = vsub.f32 1.0, %v5802_v60  ;;  %4425 = vst.msk [vmem:[%s6885_s7 + $0x8] sm:$0xff] %vm4423_vm5, %v5802_v60  ;;  %s4478_s7 = sshll.u32 %s5868_s6, 4  ;;  %s4479_s7 = int_to_ptr.vmem [resolvable:$true] %s4478_s7 }
 0x98c   :  { %5807 = vlog2.f32 %v4434_v59  ;;  %s5839_s29 = scalar_lea.vmem %s4479_s7, 16  ;;  %s5843_s30 = scalar_lea.vmem %s4479_s7, 32 }
 0x98d   :  { %5809 = vlog2.f32 %v4435_v61  ;;  %p5840_p0 = scmp.ne.s32.totalorder %s4479_s7, %s5839_s29  ;;  %p5844_p1 = scmp.lt.s32.totalorder %s4479_s7, %s4479_s7 }
 0x98e   :  { %p5845_p2 = scmp.lt.s32.totalorder %s5843_s30, %s5839_s29 }
 0x990   :  { %p5846_p3 = por %p5845_p2, %p5844_p1 }
 0x992   :  { %p5847_p4 = pnand %p5846_p3, %p5840_p0 }
 0x993   :  { %v5804_v24 = vpop.eup %5803 }
 0x994   :  { %v4429_v0 = vmul.f32 0.6931472, %v5804_v24 }
 0x995   :  { %v5806_v22 = vpop.eup %5805 }
 0x996   :  { %v5808_v16 = vpop.eup %5807  ;;  %v4431_v53 = vmul.f32 0.6931472, %v5806_v22  ;;  %v4432_v19 = vmax.f32 %v4429_v0, -100.0 }
 0x997   :  { %v5810_v18 = vpop.eup %5809  ;;  %v4437_v27 = vmul.f32 0.6931472, %v5808_v16 }
 0x998   :  { %v4433_v1 = vmax.f32 %v4431_v53, -100.0  ;;  %v4439_v42 = vmul.f32 0.6931472, %v5810_v18  ;;  %v4442_v55 = vmul.f32 %v4432_v19, %v4426_v63 }
 0x999   :  { %v4440_v48 = vmax.f32 %v4437_v27, -100.0 }
 0x99a   :  { %v4441_v49 = vmax.f32 %v4439_v42, -100.0  ;;  %v4443_v25 = vmul.f32 %v4433_v1, %v4427_v2 }
 0x99b   :  { %v4446_v41 = vmul.f32 %v4444_v38, %v4440_v48 }
 0x99c   :  { %v4447_v26 = vmul.f32 %v4445_v43, %v4441_v49 }
 0x99d   :  { %v4448_v3 = vadd.f32 %v4446_v41, %v4442_v55 }
 0x99e   :  { %v4449_v5 = vadd.f32 %v4447_v26, %v4443_v25 }
 0x99f   :  { %v4450_v6 = vsub.f32 0.0, %v4448_v3 }
 0x9a0   :  { %v4451_v20 = vsub.f32 0.0, %v4449_v5 }
 0x9a1   :  { %v4452_v28 = vsel %vm4423_vm5, %v4450_v6, 0.0 }
 0x9a2   :  { %v4453_v8 = vsel %vm4423_vm5, %v4451_v20, 0.0 }
 0x9a3   :  { %v4454_v29 = vadd.f32 %v4453_v8, %v4452_v28 }
 0x9a5   :  { %4455 = vadd.xlane.f32.xlu0 %v4454_v29 }
 0xa32   :  { %v4456_v9 = vpop.xlane.xlu0 %4455 }
 0xa33   :  { %v4457_v10 = vrot.slane %v4456_v9, 4 }
 0xa35   :  { %v4458_v11 = vadd.f32 %v4457_v10, %v4456_v9 }
 0xa37   :  { %v4459_v13 = vrot.slane %v4458_v11, 2 }
 0xa39   :  { %v4460_v14 = vadd.f32 %v4459_v13, %v4458_v11 }
 0xa3b   :  { %v4461_v17 = vrot.slane %v4460_v14, 1 }
 0xa3d   :  { %v4462_v39 = vadd.f32 %v4461_v17, %v4460_v14 }
 0xa3f   :  { %5499 = vpush %v4462_v39 }
 0xa70   :  { %s5500_s27 = spop %5499 }
 0xa71   :  { %s4466_s28 = smul.f32 0.0625, %s5500_s27 }
 0xa73   :  { %v4467_v56 = vstv %s4466_s28 }
 0xa74   :  { %4469 = vst.msk [vmem:[#allocation5] sm:$0x1] %vm4468_vm6, %v4467_v56 }
 0xa75   :  { %5850 = shalt.err (!%p5847_p4)
}
 0xa76   :  { %s5851_s11 = scalar_lea.hbm %s6886_s8, 16 }
 0xa77   :  { %p5852_p5 = scmp.ne.s32.totalorder %s6886_s8, %s5851_s11  ;;  %p5855_p6 = scmp.lt.u32.totalorder %s5851_s11, %s6886_s8 }
 0xa79   :  { %p5857_p7 = pnand %p5855_p6, %p5852_p5 }
 0xa7b   :  { %5860 = shalt.err (!%p5857_p7)
}
 0xa7c   :  { %4481 = dma.vmem_to_hbm [thread:$0]  %s4479_s7, 16, %s6886_s8, [#allocation6]  }
 0xa7d   :  { %5861 = dma.done.wait [#allocation6], 16  }
 0xa7e   :  { %5862 = vsyncadd [#allocation6], 4294967280 }
 0xa7f   :  { %4487 = vsyncpa [#allocation6], 1 }

</bundles_post_ra>
